<compile_context>
chip_gen: v6e
topology: v6e:2x2x1
jax: 0.10.0
libtpu: 0.0.40
codegen_flags: <defaults>
</compile_context>

<pallas_src>
import math

import numpy as np
import jax
import jax.numpy as jnp
from jax.experimental import pallas as pl
from jax.experimental.pallas import tpu as pltpu

_SQRT2 = float(math.sqrt(2.0))
_LRELU_SLOPE = 0.2
_DEFAULT_MAX_ROWS = 64          # production default upper bound on the row tile

_TPU_VMEM = None


# ----------------------------- small utilities ------------------------------ #

def _vmem_capacity():
    global _TPU_VMEM
    if _TPU_VMEM is None:
        try:
            _TPU_VMEM = int(pltpu.get_tpu_info().vmem_capacity_bytes)
        except Exception:
            _TPU_VMEM = 64 * 1024 * 1024           # v7x per-core floor
    return _TPU_VMEM


def _vmem_limit(need):
    cap = _vmem_capacity()
    return int(min(0.9 * cap, max(2 * need + (4 << 20), 32 << 20)))


def _pick_rows(H, bytes_fn, max_rows):
    """Largest row tile TH (divides H, multiple of 8 or == H, <= max_rows) whose
    per-step VMEM estimate fits in ~45% of the chip's VMEM."""
    budget = int(0.45 * _vmem_capacity())
    cands = sorted({d for d in range(8, H + 1, 8) if H % d == 0} | {H})
    capped = [c for c in cands if c <= max_rows] or [cands[0]]
    for c in reversed(capped):
        if bytes_fn(c) <= budget:
            return c
    return capped[0]


def _nbytes(a):
    return int(a.size) * a.dtype.itemsize


def _w_spec(shape):
    """Broadcast (weight) operand: full block, same tile for every grid step."""
    nd = len(shape)
    return pl.BlockSpec(shape, lambda b, t: (0,) * nd)


def _row_halos(x, TH):
    """x: (B, H, W, C) -> (B, HT, 2, W, C) with the row above / below each TH-row
    tile (zero rows at the array border).  Tiny side tensor, auto-pipelined."""
    B, H, W, C = x.shape
    HT = H // TH
    zero = jnp.zeros((B, 1, W, C), x.dtype)
    if HT == 1:
        top, bot = zero, zero
    else:
        top = jnp.concatenate([zero, x[:, TH - 1::TH][:, :HT - 1]], axis=1)
        bot = jnp.concatenate([x[:, TH::TH][:, :HT - 1], zero], axis=1)
    return jnp.stack([top, bot], axis=2)


# ------------------------- per-step VMEM estimators -------------------------- #

def _conv1_bytes(TH, W, cin, cout):
    x = TH * W * cin * 2
    halo = 2 * W * cin * 2
    skip = TH * 2 * W * 2 * cout * 2
    noise = 4 * TH * W * 4
    out = TH * 2 * W * 2 * cout * 2
    scratch = (TH + 2) * (W + 2) * cin * 2
    tmp = 4 * TH * W * (cin + cout) * 4
    return 2 * (x + halo + skip + noise + out) + scratch + tmp + (2 << 20)


def _conv2_bytes(TH, W, cin, cout):
    x = TH * W * cin * 2
    halo = 2 * W * cin * 2
    noise = TH * W * 4
    out = TH * W * cout * 2
    scratch = (TH + 2) * (W + 2) * cin * 2
    tmp = TH * W * (cin + cout) * 4
    return 2 * (x + halo + noise + out) + scratch + tmp + (2 << 20)


def _head_bytes(TH, W, cin, cout):
    x = TH * W * cin * 2
    out = 2 * TH * W * cout * 4
    tmp = TH * W * 2 * cout * 4
    return 2 * (x + out) + tmp + (1 << 20)


# ----------------------------- Pallas kernels ------------------------------- #

def _styled_up_conv_kernel(x_ref, halo_ref, skip_ref, style_ref, noise_ref,
                           modw_ref, modb_ref, cw_ref, sq_ref, wpw_ref, bias_ref,
                           o_ref, xp_ref):
    """Fused nearest-2x upsample + modulated depthwise 3x3 (zero pad) + pointwise
    1x1 + style-dependent demod + noise + bias + leaky-relu + encoder skip-add.

    Grid is (batch, row-tile).  x_ref holds TH coarse rows; halo_ref holds the
    coarse row above / below (zeros at the array border, built by the wrapper);
    o_ref is the subpixel-packed (1, TH, 2, W, 2*Cout) fine-resolution tile.
    """
    _, TH, W, cin = x_ref.shape
    cout = wpw_ref.shape[1]

    # modulation scale + style-dependent demodulation (tiny matmuls)
    scale = jnp.dot(style_ref[0], modw_ref[...],
                    preferred_element_type=jnp.float32) + modb_ref[...]        # (1, Cin)
    demod = jax.lax.rsqrt(jnp.dot(scale * scale, sq_ref[...],
                                  preferred_element_type=jnp.float32) + 1e-8)  # (1, Cout)
    cw = cw_ref[...] * scale.reshape(1, 1, cin)          # modulation folded into dw taps
    w_pw = (wpw_ref[...] * demod).astype(jnp.bfloat16)   # demod (and sqrt2) on pw weight

    # bf16 padded scratch: interior + wrapper-built halo rows + zeroed columns only
    xp_ref[1:TH + 1, 1:W + 1, :] = x_ref[0]
    hal = halo_ref[...].reshape(2, W, cin)
    xp_ref[0:1, 1:W + 1, :] = hal[0:1]
    xp_ref[TH + 1:TH + 2, 1:W + 1, :] = hal[1:2]
    zcol = jnp.zeros((TH + 2, 1, cin), xp_ref.dtype)
    xp_ref[:, 0:1, :] = zcol
    xp_ref[:, W + 1:W + 2, :] = zcol

    xp = xp_ref[...]
    cols = [xp[:, c:c + W, :] for c in range(3)]         # 3 sublane shifts total

    # collapsed 2x2 depthwise taps on the coarse grid, one accumulator per subpixel
    accs = []
    for a in range(2):
        for b in range(2):
            s = 2 * a + b
            acc = jnp.zeros((TH, W, cin), jnp.float32)
            for v in range(2):
                col = cols[b + v]
                for u in range(2):
                    acc = acc + col[a + u:a + u + TH] * cw[s, 2 * u + v, :].reshape(1, 1, cin)
            accs.append(acc)

    # one merged pointwise matmul over all four subpixels (M = 4*TH*W)
    lhs = jnp.stack(accs, axis=0).reshape(4 * TH * W, cin).astype(jnp.bfloat16)
    y = jnp.dot(lhs, w_pw, preferred_element_type=jnp.float32)
    y4 = y.reshape(2, 2, TH, W, cout)
    y4 = y4 + noise_ref[...][..., None] + bias_ref[...]  # noise already * nw * sqrt2
    y4 = jnp.where(y4 >= 0.0, y4, _LRELU_SLOPE * y4)

    # lane-dense stores (2 x full 2*Cout lanes) with the encoder skip fused in
    skp = skip_ref[...]
    for a in range(2):
        row = jnp.concatenate([y4[a, 0], y4[a, 1]], axis=-1)       # (TH, W, 2*Cout)
        o_ref[0, :, a, :, :] = (row + skp[0, :, a, :, :]).astype(jnp.bfloat16)


def _styled_conv_kernel(x_ref, halo_ref, style_ref, noise_ref, modw_ref, modb_ref,
                        wdw_ref, sq_ref, wpw_ref, bias_ref, o_ref, xp_ref):
    """Modulated depthwise 3x3 (zero pad) + pointwise 1x1 + demod + noise + bias
    + leaky-relu on a TH-row tile (halo rows supplied by the wrapper)."""
    _, TH, W, cin = x_ref.shape
    cout = wpw_ref.shape[1]

    scale = jnp.dot(style_ref[0], modw_ref[...],
                    preferred_element_type=jnp.float32) + modb_ref[...]        # (1, Cin)
    demod = jax.lax.rsqrt(jnp.dot(scale * scale, sq_ref[...],
                                  preferred_element_type=jnp.float32) + 1e-8)  # (1, Cout)
    wdw = wdw_ref[...] * scale                            # (9, Cin)
    w_pw = (wpw_ref[...] * demod).astype(jnp.bfloat16)

    xp_ref[1:TH + 1, 1:W + 1, :] = x_ref[0]
    hal = halo_ref[...].reshape(2, W, cin)
    xp_ref[0:1, 1:W + 1, :] = hal[0:1]
    xp_ref[TH + 1:TH + 2, 1:W + 1, :] = hal[1:2]
    zcol = jnp.zeros((TH + 2, 1, cin), xp_ref.dtype)
    xp_ref[:, 0:1, :] = zcol
    xp_ref[:, W + 1:W + 2, :] = zcol

    xp = xp_ref[...]
    acc = jnp.zeros((TH, W, cin), jnp.float32)
    for dw in range(3):                                   # 1 column shift per dw
        col = xp[:, dw:dw + W, :]
        for dh in range(3):                               # row shifts are leading-dim
            acc = acc + col[dh:dh + TH] * wdw[3 * dh + dw, :].reshape(1, 1, cin)

    y = jnp.dot(acc.reshape(TH * W, cin).astype(jnp.bfloat16), w_pw,
                preferred_element_type=jnp.float32)
    y = y.reshape(TH, W, cout) + noise_ref[...][:, :, None] + bias_ref[...]
    y = jnp.where(y >= 0.0, y, _LRELU_SLOPE * y)
    o_ref[0] = y.astype(jnp.bfloat16)


def _to_img_kernel(x_ref, style_ref, modw_t_ref, modb_ref, w_ref, bias_ref, o_ref):
    """Modulated 1x1 conv head (no demodulation) + bias on a TH-row tile."""
    _, TH, W, cin = x_ref.shape
    cout = w_ref.shape[1]
    scale = jnp.dot(modw_t_ref[...], style_ref[0],
                    preferred_element_type=jnp.float32) + modb_ref[...]        # (Cin, 1)
    w_eff = (w_ref[...] * scale).astype(jnp.bfloat16)
    y = jnp.dot(x_ref[0].reshape(TH * W, cin), w_eff,
                preferred_element_type=jnp.float32) + bias_ref[...]
    o_ref[0] = y.reshape(TH, W, cout)


def _to_img_idwt_kernel(x_ref, style_ref, modw_t_ref, modb_ref, w_ref, bias_ref,
                        m_ref, freq_ref, sub_ref):
    """to_img head with the Haar (db1, zero mode) IDWT channel mix folded into the
    head weight (single matmul, N=24) and tanh applied in-kernel."""
    _, TH, W, cin = x_ref.shape
    cout = w_ref.shape[1]
    scale = jnp.dot(modw_t_ref[...], style_ref[0],
                    preferred_element_type=jnp.float32) + modb_ref[...]        # (Cin, 1)
    w_eff = w_ref[...] * scale                                                 # (Cin, 12)
    w_cat = jnp.concatenate(
        [w_eff, jnp.dot(w_eff, m_ref[...], preferred_element_type=jnp.float32)],
        axis=1).astype(jnp.bfloat16)                                           # (Cin, 24)
    b_cat = jnp.concatenate(
        [bias_ref[...], jnp.dot(bias_ref[...], m_ref[...],
                                preferred_element_type=jnp.float32)], axis=1)  # (1, 24)
    y = jnp.dot(x_ref[0].reshape(TH * W, cin), w_cat,
                preferred_element_type=jnp.float32) + b_cat                    # (TH*W, 24)
    freq_ref[0] = y[:, :cout].reshape(TH, W, cout)
    sub_ref[0] = jnp.tanh(y[:, cout:]).reshape(TH, W, cout)


# ----------------------------- kernel wrappers ------------------------------ #

def styled_conv_up(x, skip, style, p, noise, max_rows=_DEFAULT_MAX_ROWS):
    """Fused 2x upsample + StyledConv + encoder skip-add.
    x: (B, H, W, Cin) bf16 coarse; skip: (B, 2H, 2W, Cout) bf16; noise (1,1,2H,2W).
    Returns (B, 2H, 2W, Cout) bf16."""
    B, H, W, Cin = x.shape
    Cout = p["wpw_s2"].shape[1]
    S = style.shape[-1]
    TH = _pick_rows(H, lambda t: _conv1_bytes(t, W, Cin, Cout), max_rows)
    HT = H // TH

    halos = _row_halos(x, TH)                              # (B, HT, 2, W, Cin)
    skip_p = skip.reshape(B, H, 2, W, 2 * Cout)            # free row-major repack
    n = noise[0, 0] * (p["noise_weight"] * _SQRT2)         # (2H, 2W)
    n4 = n.reshape(H, 2, W, 2).transpose(1, 3, 0, 2)       # (2, 2, H, W) lane-dense
    style3 = style[:, None, :].astype(jnp.float32)         # (B, 1, S)

    need = _conv1_bytes(TH, W, Cin, Cout)
    flops = 2 * B * (4 * H * W) * Cin * (Cout + 4)
    bytes_acc = (_nbytes(x) + _nbytes(halos) + _nbytes(skip_p) + _nbytes(n4)
                 + B * H * 2 * W * 2 * Cout * 2)

    out = pl.pallas_call(
        _styled_up_conv_kernel,
        out_shape=jax.ShapeDtypeStruct((B, H, 2, W, 2 * Cout), jnp.bfloat16),
        grid=(B, HT),
        in_specs=[
            pl.BlockSpec((1, TH, W, Cin), lambda b, t: (b, t, 0, 0)),
            pl.BlockSpec((1, 1, 2, W, Cin), lambda b, t: (b, t, 0, 0, 0)),
            pl.BlockSpec((1, TH, 2, W, 2 * Cout), lambda b, t: (b, t, 0, 0, 0)),
            pl.BlockSpec((1, 1, S), lambda b, t: (b, 0, 0)),
            pl.BlockSpec((2, 2, TH, W), lambda b, t: (0, 0, t, 0)),
            _w_spec(p["modw"].shape), _w_spec(p["modb"].shape),
            _w_spec(p["cw"].shape), _w_spec(p["sq"].shape),
            _w_spec(p["wpw_s2"].shape), _w_spec(p["bias_s2"].shape),
        ],
        out_specs=pl.BlockSpec((1, TH, 2, W, 2 * Cout), lambda b, t: (b, t, 0, 0, 0)),
        scratch_shapes=[pltpu.VMEM((TH + 2, W + 2, Cin), jnp.bfloat16)],
        compiler_params=pltpu.CompilerParams(
            dimension_semantics=("parallel", "parallel"),
            vmem_limit_bytes=_vmem_limit(need)),
        cost_estimate=pl.CostEstimate(flops=int(flops),
                                      transcendentals=int(B * HT * Cout),
                                      bytes_accessed=int(bytes_acc)),
    )(x, halos, skip_p, style3, n4, p["modw"], p["modb"], p["cw"], p["sq"],
      p["wpw_s2"], p["bias_s2"])
    # free (row-major) reshape: subpixel-packed -> fine NHWC
    return out.reshape(B, 2 * H, 2 * W, Cout)


def styled_conv(x, style, p, noise, max_rows=_DEFAULT_MAX_ROWS):
    """StyledConv at the fine resolution.  Returns (B, H, W, Cout) bf16."""
    B, H, W, Cin = x.shape
    Cout = p["wpw_s2"].shape[1]
    S = style.shape[-1]
    TH = _pick_rows(H, lambda t: _conv2_bytes(t, W, Cin, Cout), max_rows)
    HT = H // TH

    halos = _row_halos(x, TH)
    n = noise[0, 0] * (p["noise_weight"] * _SQRT2)         # (H, W) lane-dense
    style3 = style[:, None, :].astype(jnp.float32)

    need = _conv2_bytes(TH, W, Cin, Cout)
    flops = 2 * B * H * W * Cin * (Cout + 9)
    bytes_acc = (_nbytes(x) + _nbytes(halos) + _nbytes(n) + B * H * W * Cout * 2)

    return pl.pallas_call(
        _styled_conv_kernel,
        out_shape=jax.ShapeDtypeStruct((B, H, W, Cout), jnp.bfloat16),
        grid=(B, HT),
        in_specs=[
            pl.BlockSpec((1, TH, W, Cin), lambda b, t: (b, t, 0, 0)),
            pl.BlockSpec((1, 1, 2, W, Cin), lambda b, t: (b, t, 0, 0, 0)),
            pl.BlockSpec((1, 1, S), lambda b, t: (b, 0, 0)),
            pl.BlockSpec((TH, W), lambda b, t: (t, 0)),
            _w_spec(p["modw"].shape), _w_spec(p["modb"].shape),
            _w_spec(p["wdw"].shape), _w_spec(p["sq"].shape),
            _w_spec(p["wpw_s2"].shape), _w_spec(p["bias_s2"].shape),
        ],
        out_specs=pl.BlockSpec((1, TH, W, Cout), lambda b, t: (b, t, 0, 0)),
        scratch_shapes=[pltpu.VMEM((TH + 2, W + 2, Cin), jnp.bfloat16)],
        compiler_params=pltpu.CompilerParams(
            dimension_semantics=("parallel", "parallel"),
            vmem_limit_bytes=_vmem_limit(need)),
        cost_estimate=pl.CostEstimate(flops=int(flops),
                                      transcendentals=int(B * HT * Cout),
                                      bytes_accessed=int(bytes_acc)),
    )(x, halos, style3, n, p["modw"], p["modb"], p["wdw"], p["sq"],
      p["wpw_s2"], p["bias_s2"])


def to_img(x, style, p, max_rows=_DEFAULT_MAX_ROWS):
    B, H, W, Cin = x.shape
    Cout = p["w"].shape[1]
    S = style.shape[-1]
    TH = _pick_rows(H, lambda t: _head_bytes(t, W, Cin, Cout), max_rows)
    HT = H // TH
    style3 = style[:, :, None].astype(jnp.float32)
    return pl.pallas_call(
        _to_img_kernel,
        out_shape=jax.ShapeDtypeStruct((B, H, W, Cout), jnp.float32),
        grid=(B, HT),
        in_specs=[
            pl.BlockSpec((1, TH, W, Cin), lambda b, t: (b, t, 0, 0)),
            pl.BlockSpec((1, S, 1), lambda b, t: (b, 0, 0)),
            _w_spec(p["modw_t"].shape), _w_spec(p["modb_c"].shape),
            _w_spec(p["w"].shape), _w_spec(p["bias"].shape),
        ],
        out_specs=pl.BlockSpec((1, TH, W, Cout), lambda b, t: (b, t, 0, 0)),
        compiler_params=pltpu.CompilerParams(
            dimension_semantics=("parallel", "parallel")),
    )(x, style3, p["modw_t"], p["modb_c"], p["w"], p["bias"])


def to_img_idwt(x, style, p, max_rows=_DEFAULT_MAX_ROWS):
    """Last-layer head: returns (freq, tanh(freq @ idwt_mix)) in one kernel."""
    B, H, W, Cin = x.shape
    Cout = p["w"].shape[1]
    S = style.shape[-1]
    TH = _pick_rows(H, lambda t: _head_bytes(t, W, Cin, Cout), max_rows)
    HT = H // TH
    style3 = style[:, :, None].astype(jnp.float32)
    m = _build_idwt_mix()
    return pl.pallas_call(
        _to_img_idwt_kernel,
        out_shape=(jax.ShapeDtypeStruct((B, H, W, Cout), jnp.float32),
                   jax.ShapeDtypeStruct((B, H, W, Cout), jnp.float32)),
        grid=(B, HT),
        in_specs=[
            pl.BlockSpec((1, TH, W, Cin), lambda b, t: (b, t, 0, 0)),
            pl.BlockSpec((1, S, 1), lambda b, t: (b, 0, 0)),
            _w_spec(p["modw_t"].shape), _w_spec(p["modb_c"].shape),
            _w_spec(p["w"].shape), _w_spec(p["bias"].shape),
            _w_spec((12, 12)),
        ],
        out_specs=(pl.BlockSpec((1, TH, W, Cout), lambda b, t: (b, t, 0, 0)),
                   pl.BlockSpec((1, TH, W, Cout), lambda b, t: (b, t, 0, 0))),
        compiler_params=pltpu.CompilerParams(
            dimension_semantics=("parallel", "parallel")),
    )(x, style3, p["modw_t"], p["modb_c"], p["w"], p["bias"], m)


# ---------------------------- IDWT helpers (glue) --------------------------- #

def _build_idwt_mix():
    # input freq channels (PyTorch layout): [LL_r, LL_g, LL_b, 3 + color*3 + band]
    # output channels: [subpixel q (a,b,c,d)] x [rgb], q = 2*row_sub + col_sub
    # Haar / db1 zero-mode synthesis coefficients are +-1/2 per subpixel.
    # TODO(synk): validate the band sign convention against pywt / DWTInverse.
    m = np.zeros((12, 12), np.float32)
    band_signs = [(1, 1, 1, 1),      # LL
                  (1, 1, -1, -1),    # LH
                  (1, -1, 1, -1),    # HL
                  (1, -1, -1, 1)]    # HH
    for c in range(3):
        for band in range(4):
            in_ch = c if band == 0 else 3 + c * 3 + (band - 1)
            for q in range(4):
                m[in_ch, q * 3 + c] = 0.5 * band_signs[band][q]
    return jnp.asarray(m)


def _assemble_idwt(sub):
    """sub: (B, H, W, 12) subpixel/rgb channels -> NCHW image (B, 3, 2H, 2W)."""
    B, H, W, _ = sub.shape
    sub = sub.reshape(B, H, W, 2, 2, 3)
    img = jnp.transpose(sub, (0, 1, 3, 2, 4, 5)).reshape(B, 2 * H, 2 * W, 3)
    return jnp.transpose(img, (0, 3, 1, 2))


# ------------------------- parameter initialization ------------------------- #

def _collapse_dw_weights(wdw, cin):
    """Collapse the 3x3 depthwise kernel onto the coarse grid for each of the 4
    nearest-upsample subpixels -> (4 subpixels, 4 coarse taps (u,v), cin)."""
    w3 = wdw.reshape(3, 3, cin)

    def pair(w, s):
        return (w[0], w[1] + w[2]) if s == 0 else (w[0] + w[1], w[2])

    rows = []
    for a in (0, 1):
        ra = pair(w3, a)
        for b in (0, 1):
            taps = []
            for u in (0, 1):
                cu = pair(ra[u], b)
                taps.append(cu[0])
                taps.append(cu[1])
            rows.append(jnp.stack(taps, axis=0))       # (4, cin)
    return jnp.stack(rows, axis=0)                     # (4, 4, cin), s = 2a + b


def _init_mod_dwconv(key, cin, cout, style_dim, ksize=3):
    k1, k2, k3 = jax.random.split(key, 3)
    dw_scale = 1.0 / math.sqrt(cin * ksize * ksize)    # equalized-lr, depthwise
    pw_scale = 1.0 / math.sqrt(cin)                    # equalized-lr, pointwise
    wdw = jax.random.normal(k1, (ksize * ksize, cin), jnp.float32) * dw_scale
    wpw = jax.random.normal(k2, (cin, cout), jnp.float32) * pw_scale
    modw = jax.random.normal(k3, (style_dim, cin), jnp.float32) / math.sqrt(style_dim)
    modb = jnp.ones((1, cin), jnp.float32)             # bias_init = 1
    sq = jnp.sum(wdw ** 2, axis=0)[:, None] * (wpw ** 2)   # (cin, cout), for demod
    return {
        "wdw": wdw,                                    # (9, cin) raw taps (conv2 path)
        "cw": _collapse_dw_weights(wdw, cin),          # (4, 4, cin) collapsed (conv1)
        "wpw_s2": wpw * _SQRT2,                        # sqrt(2) of fused lrelu folded
        "sq": sq,
        "modw": modw,
        "modb": modb,
        "bias_s2": jnp.zeros((1, cout), jnp.float32),
        "noise_weight": jnp.float32(0.1),
    }


def _init_to_img(key, cin, style_dim, cout=12):
    k1, k2 = jax.random.split(key)
    conv_scale = 1.0 / math.sqrt(cin)
    w = jax.random.normal(k1, (cin, cout), jnp.float32) * conv_scale
    modw = jax.random.normal(k2, (style_dim, cin), jnp.float32) / math.sqrt(style_dim)
    return {"w": w,
            "modw_t": modw.T,                                   # (cin, style_dim)
            "modb_c": jnp.ones((cin, 1), jnp.float32),          # bias_init = 1
            "bias": jnp.zeros((1, cout), jnp.float32)}


def init_params(key, style_dim, channels):
    layers = []
    cin = channels[0]
    for cout in channels[1:]:
        key, k1, k2, k3 = jax.random.split(key, 4)
        layers.append({"conv1": _init_mod_dwconv(k1, cin, cout, style_dim),
                       "conv2": _init_mod_dwconv(k2, cout, cout, style_dim),
                       "to_img": _init_to_img(k3, cout, style_dim)})
        cin = cout
    return {"layers": layers}


# --------------------------------- forward ---------------------------------- #

def mobile_synthesis_forward(params, style, en_feats, noise_key,
                             max_rows=_DEFAULT_MAX_ROWS):
    """style: (B, n_w, S) or (B, S); en_feats: list of NCHW arrays."""
    out = {"noise": [], "freq": [], "img": None, "en_feats": en_feats}
    # NHWC/bf16 conversion once at the API boundary; kernels stay channels-last.
    feats = [jnp.transpose(f, (0, 2, 3, 1)).astype(jnp.bfloat16) for f in en_feats]
    hidden = feats[0]
    n_layers = len(params["layers"])
    for i, p in enumerate(params["layers"]):
        sz = 2 * hidden.shape[1]
        noise_key, k0, k1 = jax.random.split(noise_key, 3)
        n0 = jax.random.normal(k0, (1, 1, sz, sz), jnp.float32)
        n1 = jax.random.normal(k1, (1, 1, sz, sz), jnp.float32)
        out["noise"].append([n0, n1])
        if style.ndim == 2:
            s0 = s1 = s2 = style
        else:
            s0 = style[:, 3 * i + 1, :]
            s1 = style[:, 3 * i + 2, :]
            s2 = style[:, 3 * i + 3, :]

        skip = feats[i + 1]
        # TODO(synk): reference fuses encoder features via an FFC module (not
        #             provided); an additive skip fused into conv1's epilogue is used.
        h = styled_conv_up(hidden, skip, s0, p["conv1"], n0, max_rows)
        h = styled_conv(h, s1, p["conv2"], n1, max_rows)
        if i == n_layers - 1:
            freq, sub = to_img_idwt(h, s2, p["to_img"], max_rows)
            out["img"] = _assemble_idwt(sub)
        else:
            freq = to_img(h, s2, p["to_img"], max_rows)
        out["freq"].append(jnp.transpose(freq, (0, 3, 1, 2)))  # NCHW API convention
        hidden = h
    return out


# ----------------------------------- main ------------------------------------ #

if __name__ == "__main__":
    key = jax.random.PRNGKey(0)
    style_dim = 16
    channels = [16, 16, 8]      # small stand-in for [512, 512, 512, 512, 256, 128, 64]
    B = 2
    base = 8                    # spatial size of en_feats[0]

    kp, ks, kf, kn = jax.random.split(key, 4)
    params = init_params(kp, style_dim, channels)

    n_layers = len(channels) - 1
    n_w = n_layers * 3 + 2      # == MobileSynthesisNetwork.wsize()
    style = jax.random.normal(ks, (B, n_w, style_dim), jnp.float32)

    en_feats = []
    s = base
    for c in channels:
        kf, k = jax.random.split(kf)
        en_feats.append(jax.random.normal(k, (B, c, s, s), jnp.float32))
        s *= 2

    # max_rows=8 forces multi-tile row grids (HT >= 2) even at toy sizes so the
    # halo path is exercised; production would use the default (VMEM-budgeted).
    out = mobile_synthesis_forward(params, style, en_feats, kn, max_rows=8)
    img = jax.block_until_ready(out["img"])

    final_hw = base * (2 ** n_layers)               # resolution of the last freq map
    expected = (B, 3, 2 * final_hw, 2 * final_hw)   # IDWT doubles the freq resolution
    assert img.shape == expected, (img.shape, expected)
    assert len(out["freq"]) == n_layers
    assert out["freq"][-1].shape == (B, 12, final_hw, final_hw), out["freq"][-1].shape
    assert bool(jnp.all(jnp.isfinite(img)))
    print("KERNEL_OK")
</pallas_src>

<mosaic_0001>
module attributes {stable_mosaic.version = 11 : i64} {
  func.func @_styled_up_conv_kernel(%arg0: i32, %arg1: i32, %arg2: memref<1x8x8x16xbf16, #tpu.memory_space<vmem>>, %arg3: memref<1x1x2x8x16xbf16, #tpu.memory_space<vmem>>, %arg4: memref<1x8x2x8x32xbf16, #tpu.memory_space<vmem>>, %arg5: memref<1x1x16xf32, #tpu.memory_space<vmem>>, %arg6: memref<2x2x8x8xf32, #tpu.memory_space<vmem>>, %arg7: memref<16x16xf32, #tpu.memory_space<vmem>>, %arg8: memref<1x16xf32, #tpu.memory_space<vmem>>, %arg9: memref<4x4x16xf32, #tpu.memory_space<vmem>>, %arg10: memref<16x16xf32, #tpu.memory_space<vmem>>, %arg11: memref<16x16xf32, #tpu.memory_space<vmem>>, %arg12: memref<1x16xf32, #tpu.memory_space<vmem>>, %arg13: memref<1x8x2x8x32xbf16, #tpu.memory_space<vmem>>, %arg14: memref<10x10x16xbf16, #tpu.memory_space<vmem>>) attributes {dimension_semantics = [#tpu.dimension_semantics<parallel>, #tpu.dimension_semantics<parallel>], iteration_bounds = array<i64: 2, 1>, scalar_prefetch = 0 : i64, scratch_operands = 1 : i64, tpu.core_type = #tpu.core_type<tc>, window_params = [{transform_indices = @transform_0, window_bounds = array<i64: 1, 8, 8, 16>}, {transform_indices = @transform_1, window_bounds = array<i64: 1, 1, 2, 8, 16>}, {transform_indices = @transform_2, window_bounds = array<i64: 1, 8, 2, 8, 32>}, {transform_indices = @transform_3, window_bounds = array<i64: 1, 1, 16>}, {transform_indices = @transform_4, window_bounds = array<i64: 2, 2, 8, 8>}, {pipeline_mode = #tpu.pipeline_mode<synchronous>, transform_indices = @transform_5, window_bounds = array<i64: 16, 16>}, {pipeline_mode = #tpu.pipeline_mode<synchronous>, transform_indices = @transform_6, window_bounds = array<i64: 1, 16>}, {pipeline_mode = #tpu.pipeline_mode<synchronous>, transform_indices = @transform_7, window_bounds = array<i64: 4, 4, 16>}, {pipeline_mode = #tpu.pipeline_mode<synchronous>, transform_indices = @transform_8, window_bounds = array<i64: 16, 16>}, {pipeline_mode = #tpu.pipeline_mode<synchronous>, transform_indices = @transform_9, window_bounds = array<i64: 16, 16>}, {pipeline_mode = #tpu.pipeline_mode<synchronous>, transform_indices = @transform_10, window_bounds = array<i64: 1, 16>}, {transform_indices = @transform_11, window_bounds = array<i64: 1, 8, 2, 8, 32>}]} {
    %c0 = arith.constant 0 : index
    %c0_0 = arith.constant 0 : index
    %c0_1 = arith.constant 0 : index
    %0 = vector.load %arg5[%c0, %c0_0, %c0_1] : memref<1x1x16xf32, #tpu.memory_space<vmem>>, vector<1x1x16xf32>
    %1 = vector.shape_cast %0 : vector<1x1x16xf32> to vector<1x16xf32>
    %c0_2 = arith.constant 0 : index
    %c0_3 = arith.constant 0 : index
    %2 = vector.load %arg7[%c0_2, %c0_3] : memref<16x16xf32, #tpu.memory_space<vmem>>, vector<16x16xf32>
    %cst = arith.constant dense<0.000000e+00> : vector<1x16xf32>
    %3 = tpu.matmul %1, %2, %cst {dimension_numbers = #tpu.dot_dimension_numbers<[1], [0], [0], [1], [0, 0, 1, 1], [], []>} : vector<1x16xf32>, vector<16x16xf32>, vector<1x16xf32> -> vector<1x16xf32>
    %c0_4 = arith.constant 0 : index
    %c0_5 = arith.constant 0 : index
    %4 = vector.load %arg8[%c0_4, %c0_5] : memref<1x16xf32, #tpu.memory_space<vmem>>, vector<1x16xf32>
    %5 = arith.addf %3, %4 : vector<1x16xf32>
    %6 = arith.mulf %5, %5 : vector<1x16xf32>
    %c0_6 = arith.constant 0 : index
    %c0_7 = arith.constant 0 : index
    %7 = vector.load %arg10[%c0_6, %c0_7] : memref<16x16xf32, #tpu.memory_space<vmem>>, vector<16x16xf32>
    %cst_8 = arith.constant dense<0.000000e+00> : vector<1x16xf32>
    %8 = tpu.matmul %6, %7, %cst_8 {dimension_numbers = #tpu.dot_dimension_numbers<[1], [0], [0], [1], [0, 0, 1, 1], [], []>} : vector<1x16xf32>, vector<16x16xf32>, vector<1x16xf32> -> vector<1x16xf32>
    %cst_9 = arith.constant 9.99999993E-9 : f32
    %9 = vector.broadcast %cst_9 : f32 to vector<1x16xf32>
    %10 = arith.addf %8, %9 : vector<1x16xf32>
    %11 = math.rsqrt %10 : vector<1x16xf32>
    %c0_10 = arith.constant 0 : index
    %c0_11 = arith.constant 0 : index
    %c0_12 = arith.constant 0 : index
    %12 = vector.load %arg9[%c0_10, %c0_11, %c0_12] : memref<4x4x16xf32, #tpu.memory_space<vmem>>, vector<4x4x16xf32>
    %13 = vector.shape_cast %5 : vector<1x16xf32> to vector<1x1x16xf32>
    %14 = vector.broadcast %13 : vector<1x1x16xf32> to vector<4x4x16xf32>
    %15 = arith.mulf %12, %14 : vector<4x4x16xf32>
    %c0_13 = arith.constant 0 : index
    %c0_14 = arith.constant 0 : index
    %16 = vector.load %arg11[%c0_13, %c0_14] : memref<16x16xf32, #tpu.memory_space<vmem>>, vector<16x16xf32>
    %17 = vector.broadcast %11 : vector<1x16xf32> to vector<16x16xf32>
    %18 = arith.mulf %16, %17 : vector<16x16xf32>
    %19 = arith.truncf %18 : vector<16x16xf32> to vector<16x16xbf16>
    %c0_15 = arith.constant 0 : index
    %c0_16 = arith.constant 0 : index
    %c0_17 = arith.constant 0 : index
    %c0_18 = arith.constant 0 : index
    %20 = vector.load %arg2[%c0_15, %c0_16, %c0_17, %c0_18] : memref<1x8x8x16xbf16, #tpu.memory_space<vmem>>, vector<1x8x8x16xbf16>
    %21 = vector.shape_cast %20 : vector<1x8x8x16xbf16> to vector<8x8x16xbf16>
    %c1 = arith.constant 1 : index
    %c1_19 = arith.constant 1 : index
    %c0_20 = arith.constant 0 : index
    %22 = vector.load %arg14[%c1, %c1_19, %c0_20] : memref<10x10x16xbf16, #tpu.memory_space<vmem>>, vector<8x8x16xbf16>
    tpu.vector_store %arg14[%c1, %c1_19, %c0_20], %21 {strides = array<i32>} : memref<10x10x16xbf16, #tpu.memory_space<vmem>>, vector<8x8x16xbf16>,
    %c0_21 = arith.constant 0 : index
    %c0_22 = arith.constant 0 : index
    %c0_23 = arith.constant 0 : index
    %c0_24 = arith.constant 0 : index
    %c0_25 = arith.constant 0 : index
    %23 = vector.load %arg3[%c0_21, %c0_22, %c0_23, %c0_24, %c0_25] : memref<1x1x2x8x16xbf16, #tpu.memory_space<vmem>>, vector<1x1x2x8x16xbf16>
    %24 = vector.shape_cast %23 : vector<1x1x2x8x16xbf16> to vector<2x8x16xbf16>
    %25 = vector.extract_strided_slice %24 {offsets = [0, 0, 0], sizes = [1, 8, 16], strides = [1, 1, 1]} : vector<2x8x16xbf16> to vector<1x8x16xbf16>
    %c0_26 = arith.constant 0 : index
    %c1_27 = arith.constant 1 : index
    %c0_28 = arith.constant 0 : index
    %26 = vector.load %arg14[%c0_26, %c1_27, %c0_28] : memref<10x10x16xbf16, #tpu.memory_space<vmem>>, vector<1x8x16xbf16>
    tpu.vector_store %arg14[%c0_26, %c1_27, %c0_28], %25 {strides = array<i32>} : memref<10x10x16xbf16, #tpu.memory_space<vmem>>, vector<1x8x16xbf16>,
    %27 = vector.extract_strided_slice %24 {offsets = [1, 0, 0], sizes = [1, 8, 16], strides = [1, 1, 1]} : vector<2x8x16xbf16> to vector<1x8x16xbf16>
    %c9 = arith.constant 9 : index
    %c1_29 = arith.constant 1 : index
    %c0_30 = arith.constant 0 : index
    %28 = vector.load %arg14[%c9, %c1_29, %c0_30] : memref<10x10x16xbf16, #tpu.memory_space<vmem>>, vector<1x8x16xbf16>
    tpu.vector_store %arg14[%c9, %c1_29, %c0_30], %27 {strides = array<i32>} : memref<10x10x16xbf16, #tpu.memory_space<vmem>>, vector<1x8x16xbf16>,
    %cst_31 = arith.constant 0.000000e+00 : bf16
    %29 = vector.broadcast %cst_31 : bf16 to vector<10x1x16xbf16>
    %c0_32 = arith.constant 0 : index
    %c0_33 = arith.constant 0 : index
    %c0_34 = arith.constant 0 : index
    %30 = vector.load %arg14[%c0_32, %c0_33, %c0_34] : memref<10x10x16xbf16, #tpu.memory_space<vmem>>, vector<10x1x16xbf16>
    tpu.vector_store %arg14[%c0_32, %c0_33, %c0_34], %29 {strides = array<i32>} : memref<10x10x16xbf16, #tpu.memory_space<vmem>>, vector<10x1x16xbf16>,
    %c0_35 = arith.constant 0 : index
    %c9_36 = arith.constant 9 : index
    %c0_37 = arith.constant 0 : index
    %31 = vector.load %arg14[%c0_35, %c9_36, %c0_37] : memref<10x10x16xbf16, #tpu.memory_space<vmem>>, vector<10x1x16xbf16>
    tpu.vector_store %arg14[%c0_35, %c9_36, %c0_37], %29 {strides = array<i32>} : memref<10x10x16xbf16, #tpu.memory_space<vmem>>, vector<10x1x16xbf16>,
    %c0_38 = arith.constant 0 : index
    %c0_39 = arith.constant 0 : index
    %c0_40 = arith.constant 0 : index
    %32 = vector.load %arg14[%c0_38, %c0_39, %c0_40] : memref<10x10x16xbf16, #tpu.memory_space<vmem>>, vector<10x10x16xbf16>
    %33 = vector.extract_strided_slice %32 {offsets = [0, 0, 0], sizes = [10, 8, 16], strides = [1, 1, 1]} : vector<10x10x16xbf16> to vector<10x8x16xbf16>
    %34 = vector.extract_strided_slice %32 {offsets = [0, 1, 0], sizes = [10, 8, 16], strides = [1, 1, 1]} : vector<10x10x16xbf16> to vector<10x8x16xbf16>
    %35 = vector.extract_strided_slice %32 {offsets = [0, 2, 0], sizes = [10, 8, 16], strides = [1, 1, 1]} : vector<10x10x16xbf16> to vector<10x8x16xbf16>
    %cst_41 = arith.constant 0.000000e+00 : f32
    %36 = vector.broadcast %cst_41 : f32 to vector<8x8x16xf32>
    %37 = vector.extract_strided_slice %33 {offsets = [0, 0, 0], sizes = [8, 8, 16], strides = [1, 1, 1]} : vector<10x8x16xbf16> to vector<8x8x16xbf16>
    %38 = vector.extract_strided_slice %15 {offsets = [0, 0, 0], sizes = [1, 1, 16], strides = [1, 1, 1]} : vector<4x4x16xf32> to vector<1x1x16xf32>
    %39 = vector.shape_cast %38 : vector<1x1x16xf32> to vector<16xf32>
    %40 = vector.shape_cast %39 : vector<16xf32> to vector<1x1x16xf32>
    %41 = arith.extf %37 : vector<8x8x16xbf16> to vector<8x8x16xf32>
    %42 = vector.broadcast %40 : vector<1x1x16xf32> to vector<8x8x16xf32>
    %43 = arith.mulf %41, %42 : vector<8x8x16xf32>
    %44 = arith.addf %36, %43 : vector<8x8x16xf32>
    %45 = vector.extract_strided_slice %33 {offsets = [1, 0, 0], sizes = [8, 8, 16], strides = [1, 1, 1]} : vector<10x8x16xbf16> to vector<8x8x16xbf16>
    %46 = vector.extract_strided_slice %15 {offsets = [0, 2, 0], sizes = [1, 1, 16], strides = [1, 1, 1]} : vector<4x4x16xf32> to vector<1x1x16xf32>
    %47 = vector.shape_cast %46 : vector<1x1x16xf32> to vector<16xf32>
    %48 = vector.shape_cast %47 : vector<16xf32> to vector<1x1x16xf32>
    %49 = arith.extf %45 : vector<8x8x16xbf16> to vector<8x8x16xf32>
    %50 = vector.broadcast %48 : vector<1x1x16xf32> to vector<8x8x16xf32>
    %51 = arith.mulf %49, %50 : vector<8x8x16xf32>
    %52 = arith.addf %44, %51 : vector<8x8x16xf32>
    %53 = vector.extract_strided_slice %34 {offsets = [0, 0, 0], sizes = [8, 8, 16], strides = [1, 1, 1]} : vector<10x8x16xbf16> to vector<8x8x16xbf16>
    %54 = vector.extract_strided_slice %15 {offsets = [0, 1, 0], sizes = [1, 1, 16], strides = [1, 1, 1]} : vector<4x4x16xf32> to vector<1x1x16xf32>
    %55 = vector.shape_cast %54 : vector<1x1x16xf32> to vector<16xf32>
    %56 = vector.shape_cast %55 : vector<16xf32> to vector<1x1x16xf32>
    %57 = arith.extf %53 : vector<8x8x16xbf16> to vector<8x8x16xf32>
    %58 = vector.broadcast %56 : vector<1x1x16xf32> to vector<8x8x16xf32>
    %59 = arith.mulf %57, %58 : vector<8x8x16xf32>
    %60 = arith.addf %52, %59 : vector<8x8x16xf32>
    %61 = vector.extract_strided_slice %34 {offsets = [1, 0, 0], sizes = [8, 8, 16], strides = [1, 1, 1]} : vector<10x8x16xbf16> to vector<8x8x16xbf16>
    %62 = vector.extract_strided_slice %15 {offsets = [0, 3, 0], sizes = [1, 1, 16], strides = [1, 1, 1]} : vector<4x4x16xf32> to vector<1x1x16xf32>
    %63 = vector.shape_cast %62 : vector<1x1x16xf32> to vector<16xf32>
    %64 = vector.shape_cast %63 : vector<16xf32> to vector<1x1x16xf32>
    %65 = arith.extf %61 : vector<8x8x16xbf16> to vector<8x8x16xf32>
    %66 = vector.broadcast %64 : vector<1x1x16xf32> to vector<8x8x16xf32>
    %67 = arith.mulf %65, %66 : vector<8x8x16xf32>
    %68 = arith.addf %60, %67 : vector<8x8x16xf32>
    %cst_42 = arith.constant 0.000000e+00 : f32
    %69 = vector.broadcast %cst_42 : f32 to vector<8x8x16xf32>
    %70 = vector.extract_strided_slice %34 {offsets = [0, 0, 0], sizes = [8, 8, 16], strides = [1, 1, 1]} : vector<10x8x16xbf16> to vector<8x8x16xbf16>
    %71 = vector.extract_strided_slice %15 {offsets = [1, 0, 0], sizes = [1, 1, 16], strides = [1, 1, 1]} : vector<4x4x16xf32> to vector<1x1x16xf32>
    %72 = vector.shape_cast %71 : vector<1x1x16xf32> to vector<16xf32>
    %73 = vector.shape_cast %72 : vector<16xf32> to vector<1x1x16xf32>
    %74 = arith.extf %70 : vector<8x8x16xbf16> to vector<8x8x16xf32>
    %75 = vector.broadcast %73 : vector<1x1x16xf32> to vector<8x8x16xf32>
    %76 = arith.mulf %74, %75 : vector<8x8x16xf32>
    %77 = arith.addf %69, %76 : vector<8x8x16xf32>
    %78 = vector.extract_strided_slice %34 {offsets = [1, 0, 0], sizes = [8, 8, 16], strides = [1, 1, 1]} : vector<10x8x16xbf16> to vector<8x8x16xbf16>
    %79 = vector.extract_strided_slice %15 {offsets = [1, 2, 0], sizes = [1, 1, 16], strides = [1, 1, 1]} : vector<4x4x16xf32> to vector<1x1x16xf32>
    %80 = vector.shape_cast %79 : vector<1x1x16xf32> to vector<16xf32>
    %81 = vector.shape_cast %80 : vector<16xf32> to vector<1x1x16xf32>
    %82 = arith.extf %78 : vector<8x8x16xbf16> to vector<8x8x16xf32>
    %83 = vector.broadcast %81 : vector<1x1x16xf32> to vector<8x8x16xf32>
    %84 = arith.mulf %82, %83 : vector<8x8x16xf32>
    %85 = arith.addf %77, %84 : vector<8x8x16xf32>
    %86 = vector.extract_strided_slice %35 {offsets = [0, 0, 0], sizes = [8, 8, 16], strides = [1, 1, 1]} : vector<10x8x16xbf16> to vector<8x8x16xbf16>
    %87 = vector.extract_strided_slice %15 {offsets = [1, 1, 0], sizes = [1, 1, 16], strides = [1, 1, 1]} : vector<4x4x16xf32> to vector<1x1x16xf32>
    %88 = vector.shape_cast %87 : vector<1x1x16xf32> to vector<16xf32>
    %89 = vector.shape_cast %88 : vector<16xf32> to vector<1x1x16xf32>
    %90 = arith.extf %86 : vector<8x8x16xbf16> to vector<8x8x16xf32>
    %91 = vector.broadcast %89 : vector<1x1x16xf32> to vector<8x8x16xf32>
    %92 = arith.mulf %90, %91 : vector<8x8x16xf32>
    %93 = arith.addf %85, %92 : vector<8x8x16xf32>
    %94 = vector.extract_strided_slice %35 {offsets = [1, 0, 0], sizes = [8, 8, 16], strides = [1, 1, 1]} : vector<10x8x16xbf16> to vector<8x8x16xbf16>
    %95 = vector.extract_strided_slice %15 {offsets = [1, 3, 0], sizes = [1, 1, 16], strides = [1, 1, 1]} : vector<4x4x16xf32> to vector<1x1x16xf32>
    %96 = vector.shape_cast %95 : vector<1x1x16xf32> to vector<16xf32>
    %97 = vector.shape_cast %96 : vector<16xf32> to vector<1x1x16xf32>
    %98 = arith.extf %94 : vector<8x8x16xbf16> to vector<8x8x16xf32>
    %99 = vector.broadcast %97 : vector<1x1x16xf32> to vector<8x8x16xf32>
    %100 = arith.mulf %98, %99 : vector<8x8x16xf32>
    %101 = arith.addf %93, %100 : vector<8x8x16xf32>
    %cst_43 = arith.constant 0.000000e+00 : f32
    %102 = vector.broadcast %cst_43 : f32 to vector<8x8x16xf32>
    %103 = vector.extract_strided_slice %33 {offsets = [1, 0, 0], sizes = [8, 8, 16], strides = [1, 1, 1]} : vector<10x8x16xbf16> to vector<8x8x16xbf16>
    %104 = vector.extract_strided_slice %15 {offsets = [2, 0, 0], sizes = [1, 1, 16], strides = [1, 1, 1]} : vector<4x4x16xf32> to vector<1x1x16xf32>
    %105 = vector.shape_cast %104 : vector<1x1x16xf32> to vector<16xf32>
    %106 = vector.shape_cast %105 : vector<16xf32> to vector<1x1x16xf32>
    %107 = arith.extf %103 : vector<8x8x16xbf16> to vector<8x8x16xf32>
    %108 = vector.broadcast %106 : vector<1x1x16xf32> to vector<8x8x16xf32>
    %109 = arith.mulf %107, %108 : vector<8x8x16xf32>
    %110 = arith.addf %102, %109 : vector<8x8x16xf32>
    %111 = vector.extract_strided_slice %33 {offsets = [2, 0, 0], sizes = [8, 8, 16], strides = [1, 1, 1]} : vector<10x8x16xbf16> to vector<8x8x16xbf16>
    %112 = vector.extract_strided_slice %15 {offsets = [2, 2, 0], sizes = [1, 1, 16], strides = [1, 1, 1]} : vector<4x4x16xf32> to vector<1x1x16xf32>
    %113 = vector.shape_cast %112 : vector<1x1x16xf32> to vector<16xf32>
    %114 = vector.shape_cast %113 : vector<16xf32> to vector<1x1x16xf32>
    %115 = arith.extf %111 : vector<8x8x16xbf16> to vector<8x8x16xf32>
    %116 = vector.broadcast %114 : vector<1x1x16xf32> to vector<8x8x16xf32>
    %117 = arith.mulf %115, %116 : vector<8x8x16xf32>
    %118 = arith.addf %110, %117 : vector<8x8x16xf32>
    %119 = vector.extract_strided_slice %34 {offsets = [1, 0, 0], sizes = [8, 8, 16], strides = [1, 1, 1]} : vector<10x8x16xbf16> to vector<8x8x16xbf16>
    %120 = vector.extract_strided_slice %15 {offsets = [2, 1, 0], sizes = [1, 1, 16], strides = [1, 1, 1]} : vector<4x4x16xf32> to vector<1x1x16xf32>
    %121 = vector.shape_cast %120 : vector<1x1x16xf32> to vector<16xf32>
    %122 = vector.shape_cast %121 : vector<16xf32> to vector<1x1x16xf32>
    %123 = arith.extf %119 : vector<8x8x16xbf16> to vector<8x8x16xf32>
    %124 = vector.broadcast %122 : vector<1x1x16xf32> to vector<8x8x16xf32>
    %125 = arith.mulf %123, %124 : vector<8x8x16xf32>
    %126 = arith.addf %118, %125 : vector<8x8x16xf32>
    %127 = vector.extract_strided_slice %34 {offsets = [2, 0, 0], sizes = [8, 8, 16], strides = [1, 1, 1]} : vector<10x8x16xbf16> to vector<8x8x16xbf16>
    %128 = vector.extract_strided_slice %15 {offsets = [2, 3, 0], sizes = [1, 1, 16], strides = [1, 1, 1]} : vector<4x4x16xf32> to vector<1x1x16xf32>
    %129 = vector.shape_cast %128 : vector<1x1x16xf32> to vector<16xf32>
    %130 = vector.shape_cast %129 : vector<16xf32> to vector<1x1x16xf32>
    %131 = arith.extf %127 : vector<8x8x16xbf16> to vector<8x8x16xf32>
    %132 = vector.broadcast %130 : vector<1x1x16xf32> to vector<8x8x16xf32>
    %133 = arith.mulf %131, %132 : vector<8x8x16xf32>
    %134 = arith.addf %126, %133 : vector<8x8x16xf32>
    %cst_44 = arith.constant 0.000000e+00 : f32
    %135 = vector.broadcast %cst_44 : f32 to vector<8x8x16xf32>
    %136 = vector.extract_strided_slice %34 {offsets = [1, 0, 0], sizes = [8, 8, 16], strides = [1, 1, 1]} : vector<10x8x16xbf16> to vector<8x8x16xbf16>
    %137 = vector.extract_strided_slice %15 {offsets = [3, 0, 0], sizes = [1, 1, 16], strides = [1, 1, 1]} : vector<4x4x16xf32> to vector<1x1x16xf32>
    %138 = vector.shape_cast %137 : vector<1x1x16xf32> to vector<16xf32>
    %139 = vector.shape_cast %138 : vector<16xf32> to vector<1x1x16xf32>
    %140 = arith.extf %136 : vector<8x8x16xbf16> to vector<8x8x16xf32>
    %141 = vector.broadcast %139 : vector<1x1x16xf32> to vector<8x8x16xf32>
    %142 = arith.mulf %140, %141 : vector<8x8x16xf32>
    %143 = arith.addf %135, %142 : vector<8x8x16xf32>
    %144 = vector.extract_strided_slice %34 {offsets = [2, 0, 0], sizes = [8, 8, 16], strides = [1, 1, 1]} : vector<10x8x16xbf16> to vector<8x8x16xbf16>
    %145 = vector.extract_strided_slice %15 {offsets = [3, 2, 0], sizes = [1, 1, 16], strides = [1, 1, 1]} : vector<4x4x16xf32> to vector<1x1x16xf32>
    %146 = vector.shape_cast %145 : vector<1x1x16xf32> to vector<16xf32>
    %147 = vector.shape_cast %146 : vector<16xf32> to vector<1x1x16xf32>
    %148 = arith.extf %144 : vector<8x8x16xbf16> to vector<8x8x16xf32>
    %149 = vector.broadcast %147 : vector<1x1x16xf32> to vector<8x8x16xf32>
    %150 = arith.mulf %148, %149 : vector<8x8x16xf32>
    %151 = arith.addf %143, %150 : vector<8x8x16xf32>
    %152 = vector.extract_strided_slice %35 {offsets = [1, 0, 0], sizes = [8, 8, 16], strides = [1, 1, 1]} : vector<10x8x16xbf16> to vector<8x8x16xbf16>
    %153 = vector.extract_strided_slice %15 {offsets = [3, 1, 0], sizes = [1, 1, 16], strides = [1, 1, 1]} : vector<4x4x16xf32> to vector<1x1x16xf32>
    %154 = vector.shape_cast %153 : vector<1x1x16xf32> to vector<16xf32>
    %155 = vector.shape_cast %154 : vector<16xf32> to vector<1x1x16xf32>
    %156 = arith.extf %152 : vector<8x8x16xbf16> to vector<8x8x16xf32>
    %157 = vector.broadcast %155 : vector<1x1x16xf32> to vector<8x8x16xf32>
    %158 = arith.mulf %156, %157 : vector<8x8x16xf32>
    %159 = arith.addf %151, %158 : vector<8x8x16xf32>
    %160 = vector.extract_strided_slice %35 {offsets = [2, 0, 0], sizes = [8, 8, 16], strides = [1, 1, 1]} : vector<10x8x16xbf16> to vector<8x8x16xbf16>
    %161 = vector.extract_strided_slice %15 {offsets = [3, 3, 0], sizes = [1, 1, 16], strides = [1, 1, 1]} : vector<4x4x16xf32> to vector<1x1x16xf32>
    %162 = vector.shape_cast %161 : vector<1x1x16xf32> to vector<16xf32>
    %163 = vector.shape_cast %162 : vector<16xf32> to vector<1x1x16xf32>
    %164 = arith.extf %160 : vector<8x8x16xbf16> to vector<8x8x16xf32>
    %165 = vector.broadcast %163 : vector<1x1x16xf32> to vector<8x8x16xf32>
    %166 = arith.mulf %164, %165 : vector<8x8x16xf32>
    %167 = arith.addf %159, %166 : vector<8x8x16xf32>
    %168 = vector.shape_cast %68 : vector<8x8x16xf32> to vector<1x8x8x16xf32>
    %169 = vector.shape_cast %101 : vector<8x8x16xf32> to vector<1x8x8x16xf32>
    %170 = vector.shape_cast %134 : vector<8x8x16xf32> to vector<1x8x8x16xf32>
    %171 = vector.shape_cast %167 : vector<8x8x16xf32> to vector<1x8x8x16xf32>
    %172 = tpu.concatenate %168, %169, %170, %171 in 0 : vector<1x8x8x16xf32>, vector<1x8x8x16xf32>, vector<1x8x8x16xf32>, vector<1x8x8x16xf32> -> vector<4x8x8x16xf32>
    %173 = vector.shape_cast %172 : vector<4x8x8x16xf32> to vector<256x16xf32>
    %174 = arith.truncf %173 : vector<256x16xf32> to vector<256x16xbf16>
    %cst_45 = arith.constant dense<0.000000e+00> : vector<256x16xf32>
    %175 = tpu.matmul %174, %19, %cst_45 {dimension_numbers = #tpu.dot_dimension_numbers<[1], [0], [0], [1], [0, 0, 1, 1], [], []>} : vector<256x16xbf16>, vector<16x16xbf16>, vector<256x16xf32> -> vector<256x16xf32>
    %176 = vector.shape_cast %175 : vector<256x16xf32> to vector<2x2x8x8x16xf32>
    %c0_46 = arith.constant 0 : index
    %c0_47 = arith.constant 0 : index
    %c0_48 = arith.constant 0 : index
    %c0_49 = arith.constant 0 : index
    %177 = vector.load %arg6[%c0_46, %c0_47, %c0_48, %c0_49] : memref<2x2x8x8xf32, #tpu.memory_space<vmem>>, vector<2x2x8x8xf32>
    %178 = vector.shape_cast %177 : vector<2x2x8x8xf32> to vector<2x2x8x8x1xf32>
    %179 = vector.broadcast %178 : vector<2x2x8x8x1xf32> to vector<2x2x8x8x16xf32>
    %180 = arith.addf %176, %179 : vector<2x2x8x8x16xf32>
    %c0_50 = arith.constant 0 : index
    %c0_51 = arith.constant 0 : index
    %181 = vector.load %arg12[%c0_50, %c0_51] : memref<1x16xf32, #tpu.memory_space<vmem>>, vector<1x16xf32>
    %182 = vector.shape_cast %181 : vector<1x16xf32> to vector<1x1x1x1x16xf32>
    %183 = vector.broadcast %182 : vector<1x1x1x1x16xf32> to vector<2x2x8x8x16xf32>
    %184 = arith.addf %180, %183 : vector<2x2x8x8x16xf32>
    %cst_52 = arith.constant 0.000000e+00 : f32
    %185 = vector.broadcast %cst_52 : f32 to vector<2x2x8x8x16xf32>
    %186 = arith.cmpf oge, %184, %185 : vector<2x2x8x8x16xf32>
    %cst_53 = arith.constant 2.000000e-01 : f32
    %187 = vector.broadcast %cst_53 : f32 to vector<2x2x8x8x16xf32>
    %188 = arith.mulf %187, %184 : vector<2x2x8x8x16xf32>
    %189 = arith.select %186, %184, %188 : vector<2x2x8x8x16xi1>, vector<2x2x8x8x16xf32>
    %c0_54 = arith.constant 0 : index
    %c0_55 = arith.constant 0 : index
    %c0_56 = arith.constant 0 : index
    %c0_57 = arith.constant 0 : index
    %c0_58 = arith.constant 0 : index
    %190 = vector.load %arg4[%c0_54, %c0_55, %c0_56, %c0_57, %c0_58] : memref<1x8x2x8x32xbf16, #tpu.memory_space<vmem>>, vector<1x8x2x8x32xbf16>
    %191 = vector.extract_strided_slice %189 {offsets = [0, 0, 0, 0, 0], sizes = [1, 1, 8, 8, 16], strides = [1, 1, 1, 1, 1]} : vector<2x2x8x8x16xf32> to vector<1x1x8x8x16xf32>
    %192 = vector.shape_cast %191 : vector<1x1x8x8x16xf32> to vector<8x8x16xf32>
    %193 = vector.extract_strided_slice %189 {offsets = [0, 1, 0, 0, 0], sizes = [1, 1, 8, 8, 16], strides = [1, 1, 1, 1, 1]} : vector<2x2x8x8x16xf32> to vector<1x1x8x8x16xf32>
    %194 = vector.shape_cast %193 : vector<1x1x8x8x16xf32> to vector<8x8x16xf32>
    %195 = tpu.concatenate %192, %194 in 2 : vector<8x8x16xf32>, vector<8x8x16xf32> -> vector<8x8x32xf32>
    %196 = vector.extract_strided_slice %190 {offsets = [0, 0, 0, 0, 0], sizes = [1, 8, 1, 8, 32], strides = [1, 1, 1, 1, 1]} : vector<1x8x2x8x32xbf16> to vector<1x8x1x8x32xbf16>
    %197 = vector.shape_cast %196 : vector<1x8x1x8x32xbf16> to vector<8x8x32xbf16>
    %198 = arith.extf %197 : vector<8x8x32xbf16> to vector<8x8x32xf32>
    %199 = arith.addf %195, %198 : vector<8x8x32xf32>
    %200 = arith.truncf %199 : vector<8x8x32xf32> to vector<8x8x32xbf16>
    %c0_59 = arith.constant 0 : index
    %c0_60 = arith.constant 0 : index
    %c0_61 = arith.constant 0 : index
    %c0_62 = arith.constant 0 : index
    %c0_63 = arith.constant 0 : index
    %201 = vector.load %arg13[%c0_59, %c0_60, %c0_61, %c0_62, %c0_63] : memref<1x8x2x8x32xbf16, #tpu.memory_space<vmem>>, vector<1x8x1x8x32xbf16>
    %202 = vector.shape_cast %201 : vector<1x8x1x8x32xbf16> to vector<8x8x32xbf16>
    %203 = vector.shape_cast %200 : vector<8x8x32xbf16> to vector<1x8x1x8x32xbf16>
    tpu.vector_store %arg13[%c0_59, %c0_60, %c0_61, %c0_62, %c0_63], %203 {strides = array<i32>} : memref<1x8x2x8x32xbf16, #tpu.memory_space<vmem>>, vector<1x8x1x8x32xbf16>,
    %204 = vector.extract_strided_slice %189 {offsets = [1, 0, 0, 0, 0], sizes = [1, 1, 8, 8, 16], strides = [1, 1, 1, 1, 1]} : vector<2x2x8x8x16xf32> to vector<1x1x8x8x16xf32>
    %205 = vector.shape_cast %204 : vector<1x1x8x8x16xf32> to vector<8x8x16xf32>
    %206 = vector.extract_strided_slice %189 {offsets = [1, 1, 0, 0, 0], sizes = [1, 1, 8, 8, 16], strides = [1, 1, 1, 1, 1]} : vector<2x2x8x8x16xf32> to vector<1x1x8x8x16xf32>
    %207 = vector.shape_cast %206 : vector<1x1x8x8x16xf32> to vector<8x8x16xf32>
    %208 = tpu.concatenate %205, %207 in 2 : vector<8x8x16xf32>, vector<8x8x16xf32> -> vector<8x8x32xf32>
    %209 = vector.extract_strided_slice %190 {offsets = [0, 0, 1, 0, 0], sizes = [1, 8, 1, 8, 32], strides = [1, 1, 1, 1, 1]} : vector<1x8x2x8x32xbf16> to vector<1x8x1x8x32xbf16>
    %210 = vector.shape_cast %209 : vector<1x8x1x8x32xbf16> to vector<8x8x32xbf16>
    %211 = arith.extf %210 : vector<8x8x32xbf16> to vector<8x8x32xf32>
    %212 = arith.addf %208, %211 : vector<8x8x32xf32>
    %213 = arith.truncf %212 : vector<8x8x32xf32> to vector<8x8x32xbf16>
    %c0_64 = arith.constant 0 : index
    %c0_65 = arith.constant 0 : index
    %c1_66 = arith.constant 1 : index
    %c0_67 = arith.constant 0 : index
    %c0_68 = arith.constant 0 : index
    %214 = vector.load %arg13[%c0_64, %c0_65, %c1_66, %c0_67, %c0_68] : memref<1x8x2x8x32xbf16, #tpu.memory_space<vmem>>, vector<1x8x1x8x32xbf16>
    %215 = vector.shape_cast %214 : vector<1x8x1x8x32xbf16> to vector<8x8x32xbf16>
    %216 = vector.shape_cast %213 : vector<8x8x32xbf16> to vector<1x8x1x8x32xbf16>
    tpu.vector_store %arg13[%c0_64, %c0_65, %c1_66, %c0_67, %c0_68], %216 {strides = array<i32>} : memref<1x8x2x8x32xbf16, #tpu.memory_space<vmem>>, vector<1x8x1x8x32xbf16>,
    return
  }
  func.func @transform_0(%arg0: i32, %arg1: i32) -> (i32, i32, i32, i32) {
    %c0_i32 = arith.constant 0 : i32
    %c0_i32_0 = arith.constant 0 : i32
    %c0_i32_1 = arith.constant 0 : i32
    return %arg0, %arg1, %c0_i32, %c0_i32_0 : i32, i32, i32, i32
  }
  func.func @transform_1(%arg0: i32, %arg1: i32) -> (i32, i32, i32, i32, i32) {
    %c0_i32 = arith.constant 0 : i32
    %c0_i32_0 = arith.constant 0 : i32
    %c0_i32_1 = arith.constant 0 : i32
    %c0_i32_2 = arith.constant 0 : i32
    return %arg0, %arg1, %c0_i32, %c0_i32_0, %c0_i32_1 : i32, i32, i32, i32, i32
  }
  func.func @transform_2(%arg0: i32, %arg1: i32) -> (i32, i32, i32, i32, i32) {
    %c0_i32 = arith.constant 0 : i32
    %c0_i32_0 = arith.constant 0 : i32
    %c0_i32_1 = arith.constant 0 : i32
    %c0_i32_2 = arith.constant 0 : i32
    return %arg0, %arg1, %c0_i32, %c0_i32_0, %c0_i32_1 : i32, i32, i32, i32, i32
  }
  func.func @transform_3(%arg0: i32, %arg1: i32) -> (i32, i32, i32) {
    %c0_i32 = arith.constant 0 : i32
    %c0_i32_0 = arith.constant 0 : i32
    %c0_i32_1 = arith.constant 0 : i32
    return %arg0, %c0_i32, %c0_i32_0 : i32, i32, i32
  }
  func.func @transform_4(%arg0: i32, %arg1: i32) -> (i32, i32, i32, i32) {
    %c0_i32 = arith.constant 0 : i32
    %c0_i32_0 = arith.constant 0 : i32
    %c0_i32_1 = arith.constant 0 : i32
    %c0_i32_2 = arith.constant 0 : i32
    return %c0_i32, %c0_i32_0, %arg1, %c0_i32_1 : i32, i32, i32, i32
  }
  func.func @transform_5(%arg0: i32, %arg1: i32) -> (i32, i32) {
    %c0_i32 = arith.constant 0 : i32
    %c0_i32_0 = arith.constant 0 : i32
    %c0_i32_1 = arith.constant 0 : i32
    return %c0_i32, %c0_i32_0 : i32, i32
  }
  func.func @transform_6(%arg0: i32, %arg1: i32) -> (i32, i32) {
    %c0_i32 = arith.constant 0 : i32
    %c0_i32_0 = arith.constant 0 : i32
    %c0_i32_1 = arith.constant 0 : i32
    return %c0_i32, %c0_i32_0 : i32, i32
  }
  func.func @transform_7(%arg0: i32, %arg1: i32) -> (i32, i32, i32) {
    %c0_i32 = arith.constant 0 : i32
    %c0_i32_0 = arith.constant 0 : i32
    %c0_i32_1 = arith.constant 0 : i32
    %c0_i32_2 = arith.constant 0 : i32
    return %c0_i32, %c0_i32_0, %c0_i32_1 : i32, i32, i32
  }
  func.func @transform_8(%arg0: i32, %arg1: i32) -> (i32, i32) {
    %c0_i32 = arith.constant 0 : i32
    %c0_i32_0 = arith.constant 0 : i32
    %c0_i32_1 = arith.constant 0 : i32
    return %c0_i32, %c0_i32_0 : i32, i32
  }
  func.func @transform_9(%arg0: i32, %arg1: i32) -> (i32, i32) {
    %c0_i32 = arith.constant 0 : i32
    %c0_i32_0 = arith.constant 0 : i32
    %c0_i32_1 = arith.constant 0 : i32
    return %c0_i32, %c0_i32_0 : i32, i32
  }
  func.func @transform_10(%arg0: i32, %arg1: i32) -> (i32, i32) {
    %c0_i32 = arith.constant 0 : i32
    %c0_i32_0 = arith.constant 0 : i32
    %c0_i32_1 = arith.constant 0 : i32
    return %c0_i32, %c0_i32_0 : i32, i32
  }
  func.func @transform_11(%arg0: i32, %arg1: i32) -> (i32, i32, i32, i32, i32) {
    %c0_i32 = arith.constant 0 : i32
    %c0_i32_0 = arith.constant 0 : i32
    %c0_i32_1 = arith.constant 0 : i32
    %c0_i32_2 = arith.constant 0 : i32
    return %arg0, %arg1, %c0_i32, %c0_i32_0, %c0_i32_1 : i32, i32, i32, i32, i32
  }
}

</mosaic_0001>

<bundles_post_ra>
// kernel: tpu_custom_call.1
= control target key start
LH: loop header
LB: loop body
LE: loop exit
PB: predicated region body
PF: predicated region fallthrough
CT: control target
= control target key end

     0   :  { %s5391_s0 = inlined_call_operand.hbm [shape: bf16[2,8,8,16], index: 0, kind: input, shape index: {}]   ;;  %s5392_s1 = inlined_call_operand.hbm [shape: bf16[2,1,2,8,16], index: 1, kind: input, shape index: {}]   ;;  %s5393_s2 = inlined_call_operand.hbm [shape: bf16[2,8,2,8,32], index: 2, kind: input, shape index: {}]   ;;  %s5394_s3 = inlined_call_operand.hbm [shape: f32[2,1,16], index: 3, kind: input, shape index: {}]   ;;  %s5395_s4 = inlined_call_operand.hbm [shape: f32[2,2,8,8], index: 4, kind: input, shape index: {}]   ;;  %s5396_s5 = inlined_call_operand.hbm [shape: f32[16,16], index: 5, kind: input, shape index: {}]   ;;  %s5397_s6 = inlined_call_operand.hbm [shape: f32[1,16], index: 6, kind: input, shape index: {}]   ;;  %s5398_s7 = inlined_call_operand.hbm [shape: f32[4,4,16], index: 7, kind: input, shape index: {}]   ;;  %s5399_s8 = inlined_call_operand.hbm [shape: f32[16,16], index: 8, kind: input, shape index: {}]   ;;  %s5400_s9 = inlined_call_operand.vmem [shape: f32[16,16], index: 9, kind: input, shape index: {}]   ;;  %s5401_s10 = inlined_call_operand.vmem [shape: f32[1,16], index: 10, kind: input, shape index: {}]   ;;  %s5402_s11 = inlined_call_operand.hbm [shape: bf16[2,8,2,8,32], index: 11, kind: output, shape index: {}]  }
   0x1   :  { %5444 = sst [smem:[#allocation51_spill]] %s5392_s1 }
   0x2   :  { %5445 = sst [smem:[#allocation52_spill]] %s5395_s4 }
   0x3   :  { %5446 = sst [smem:[#allocation53_spill]] %s5396_s5 }
   0x4   :  { %5447 = sst [smem:[#allocation54_spill]] %s5397_s6 }
   0x5   :  { %5448 = sst [smem:[#allocation55_spill]] %s5398_s7 }
   0x6   :  { %5449 = sst [smem:[#allocation56_spill]] %s5401_s10 }
   0x7   :  { %5450 = sst [smem:[#allocation57_spill]] %s5402_s11 }
   0x8   :  { %16 = vsyncpa [#allocation4], 0 }
   0x9   :  { %18 = vsyncpa [#allocation4 + $0x1], 0 }
   0xa   :  { %19 = vsyncpa [#allocation7], 0 }
   0xb   :  { %21 = vsyncpa [#allocation7 + $0x1], 0 }
   0xc   :  { %22 = vsyncpa [#allocation10], 0 }
   0xd   :  { %24 = vsyncpa [#allocation10 + $0x1], 0 }
   0xe   :  { %25 = vsyncpa [#allocation13], 0 }
   0xf   :  { %26 = vsyncpa [#allocation16], 0 }
  0x10   :  { %27 = vsyncpa [#allocation5], 0 }
  0x11   :  { %29 = vsyncpa [#allocation5 + $0x1], 0  ;;  %s3815_s17 = smov 0   ;;  %s3817_s18 = smov 0  }
  0x12   :  { %s3819_s19 = smov 0   ;;  %s3821_s20 = smov 0  }
  0x13   :  { %s3823_s21 = smov 0   ;;  %s3825_s22 = smov 0  }
  0x14 LB: > { %5451 = sst [smem:[#allocation26_spill]] %s3714_s17  ;;  %s3846_s23 = sadd.s32 4294967295, %s3734_s22   ;;  %s3734_s22 = sphi %s3825_s22, %s35_s22   ;;  %s3730_s21 = sphi %s3823_s21, %s5556_s21   ;;  %s3726_s20 = sphi %s3821_s20, %s5555_s20   ;;  %s3722_s19 = sphi %s3819_s19, %s5551_s19   ;;  %s3718_s18 = sphi %s3817_s18, %s5554_s18   ;;  %s3714_s17 = sphi %s3815_s17, %s5553_s17  }
  0x15   : > { %5452 = sst [smem:[#allocation27_spill]] %s3722_s19  ;;  %s3077_s24 = sadd.s32 4294967294, %s3734_s22  }
  0x16   : > { %5453 = sst [smem:[#allocation28_spill]] %s3726_s20  ;;  %p69_p0 = scmp.ne.s32.totalorder %s3718_s18, %s3714_s17 }
  0x17   : > { %p5405_p1 = scmp.eq.s32.totalorder %s3846_s23, 0  ;;  %p335_p3 = scmp.eq.s32.totalorder %s3077_s24, 1 }
  0x18   : > { %p3078_p5 = scmp.ge.s32.totalorder %s3734_s22, 1  ;;  %p342_p7 = scmp.lt.s32.totalorder %s3734_s22, 3 }
  0x19   : > { %p3855_p4 = por %p5405_p1, %p69_p0  ;;  %p3860_p6 = por %p335_p3, %p69_p0 }
  0x1a   : > { %p3865_p8 = pnand %p3078_p5, %p342_p7  ;;  %s3736_s28 = smov [#allocation11]  }
  0x1b   : > { %s5454_s25 = scalar_select %p3855_p4, 1, 0 }
  0x1c   : > { %s5455_s26 = scalar_select %p3860_p6, 1, 0 }
  0x1d   : > { %s5457_s27 = scalar_select %p3865_p8, 1, 0 }
  0x1e   : > { %5456 = sst [smem:[#allocation29_spill]] %s5455_s26  ;;  %s356_s29 = sshll.u32 %s3736_s28, 4  ;;  %s357_s29 = int_to_ptr.vmem [resolvable:$true] %s356_s29 }
  0x1f   : > { %p3283_p9 = pneg %p3865_p8  ;;  %s3737_s12 = smov [#allocation12]  }
  0x20   : > { %s369_s13 = sshll.u32 %s3737_s12, 4  ;;  %s3738_s14 = smov [#allocation15]   ;;  %s370_s13 = int_to_ptr.vmem [resolvable:$true] %s369_s13 }
  0x21   : > { %p3874_p11 = pnand %p3283_p9, %p5405_p1  ;;  %s393_s15 = sshll.u32 %s3738_s14, 4  ;;  %s394_s15 = int_to_ptr.vmem [resolvable:$true] %s393_s15 }
  0x22   : > { %s3403_s24 = scalar_lea.vmem %s357_s29, 512  ;;  %p3411_p5 = scmp.lt.s32.totalorder %s357_s29, %s357_s29 }
  0x23   : > { %p3880_p12 = pneg %p3874_p11  ;;  %p3404_p13 = scmp.ne.s32.totalorder %s357_s29, %s3403_s24 }
  0x24   : > { %p3412_p7 = scmp.lt.s32.totalorder %s3403_s24, %s3403_s24 }
  0x25   : > { %p3406_p0 = pnand %p3404_p13, %p3880_p12 }
  0x26   : > { %p3413_p9 = por %p3412_p7, %p3411_p5 }
  0x27   : > { %p3407_p3 = pneg %p3406_p0 }
  0x29   : > { %p3414_p10 = pnand %p3413_p9, %p3407_p3 }
  0x2b   : > { %3417 = shalt.err (!%p3414_p10)
}
  0x2c   : > { %s5407_s28 = smov 128   ;;  %s5408_s12 = smov 8  }
  0x2d   : > { %s5460_s4 = sld [smem:[#allocation52_spill]]  ;;  %s3429_s17 = scalar_lea.vmem %s370_s13, 256 }
  0x2e   : > { %p3430_p13 = scmp.ne.s32.totalorder %s370_s13, %s3429_s17  ;;  %p3437_p5 = scmp.lt.s32.totalorder %s370_s13, %s370_s13 }
  0x2f   : > { %p3438_p3 = scmp.lt.s32.totalorder %s3429_s17, %s3429_s17 }
  0x30   : > { %p3432_p0 = pnand %p3430_p13, %p3880_p12 }
  0x31   : > { %p3439_p10 = por %p3438_p3, %p3437_p5 }
  0x32   : > { %p3433_p1 = pneg %p3432_p0 }
  0x33   : > { %3286 = dma.hbm_to_vmem [thread:$0]  (!%p3874_p11), %s5460_s4, 512, %s357_s29, [#allocation10], %s5407_s28, %s5407_s28, %s5408_s12  }
  0x34   : > { %p3440_p7 = pnand %p3439_p10, %p3433_p1 }
  0x36   : > { %3443 = shalt.err (!%p3440_p7)
}
  0x37   : > { %s5461_s5 = sld [smem:[#allocation53_spill]]  ;;  %s3455_s26 = scalar_lea.vmem %s394_s15, 256 }
  0x38   : > { %p3456_p9 = scmp.ne.s32.totalorder %s394_s15, %s3455_s26  ;;  %p3463_p2 = scmp.lt.s32.totalorder %s394_s15, %s394_s15 }
  0x39   : > { %p3464_p5 = scmp.lt.s32.totalorder %s3455_s26, %s3455_s26 }
  0x3a   : > { %p3458_p13 = pnand %p3456_p9, %p3880_p12 }
  0x3b   : > { %p3465_p1 = por %p3464_p5, %p3463_p2 }
  0x3c   : > { %p3459_p0 = pneg %p3458_p13 }
  0x3d   : > { %3289 = dma.hbm_to_vmem [thread:$0]  (!%p3874_p11), %s5461_s5, 256, %s370_s13, [#allocation13], %s5407_s28, %s5407_s28, %s5408_s12  }
  0x3e   : > { %p3466_p3 = pnand %p3465_p1, %p3459_p0 }
  0x40   : > { %3469 = shalt.err (!%p3466_p3)
}
  0x41   : > { %s5409_s17 = smov 64   ;;  %s5411_s11 = smov 4  }
  0x42   : > { %s5462_s7 = sld [smem:[#allocation55_spill]]  ;;  %s56_s14 = sadd.s32 1, %s3722_s19 }
  0x43   : > { %s47_s24 = sadd.s32 1, %s3730_s21  ;;  %p63_p2 = scmp.ne.s32.totalorder %s3722_s19, %s3718_s18 }
  0x44   : > { %p49_p10 = scmp.ge.s32.totalorder %s47_s24, 2  ;;  %p64_p7 = scmp.eq.s32.totalorder %s3734_s22, 0 }
  0x45   : > { %p5463_p9 = scmp.eq.s32.totalorder %s3846_s23, 1  ;;  %p3321_p0 = scmp.lt.s32.totalorder %s3734_s22, 2 }
  0x46   : > { %s5558_s24 = smov (%p49_p10, %s47_s24), 0  ;;  %p65_p5 = por %p64_p7, %p63_p2 }
  0x47   : > { %p3921_p13 = por %p5463_p9, %p63_p2  ;;  %5466 = sst [smem:[#allocation31_spill]] %s5558_s24 }
  0x48   : > { %3295 = dma.hbm_to_vmem [thread:$0]  (!%p3874_p11), %s5462_s7, 256, %s394_s15, [#allocation16], %s5409_s17, %s5409_s17, %s5411_s11  }
  0x49   : > { %s5464_s26 = scalar_select %p3921_p13, 1, 0 }
  0x4a   : > { %s3929_s29 = sand.u32 1, %s3722_s19   ;;  %s51_s15 = ssub.s32 %s3730_s21, %s5558_s24 }
  0x4b   : > { %5465 = sst [smem:[#allocation30_spill]] %s5464_s26  ;;  %s5416_s13 = sand.u32 1, %s3734_s22  }
  0x4c   : > { %p54_p1 = scmp.eq.s32.totalorder %s51_s15, 0  ;;  %p3934_p3 = pnand %p3321_p0, %p65_p5 }
  0x4d   : > { %s3088_s12 = sshll.u32 %s3929_s29, 3  ;;  %s3138_s11 = sshll.u32 %s3730_s21, 7 }
  0x4e   : > { %s5467_s28 = scalar_select %p3934_p3, 1, 0 }
  0x4f   : > { %s3940_s17 = scalar_select %p54_p1, %s3722_s19, %s56_s14  }
  0x50   : > { %s453_s4 = scalar_lea.vmem [#allocation6], %s3088_s12  ;;  %s5469_s1 = sld [smem:[#allocation51_spill]] }
  0x51   : > { %5468 = sst [smem:[#allocation32_spill]] %s3940_s17  ;;  %s462_s5 = sshll.u32 %s453_s4, 4  ;;  %s463_s5 = int_to_ptr.vmem [resolvable:$true] %s462_s5 }
  0x52   : > { %s3948_s24 = scalar_lea.sflag [#allocation7], %s5416_s13  ;;  %p5417_p2 = pneg %p3934_p3 }
  0x53   : > { %s3483_s15 = scalar_lea.vmem %s463_s5, 128  ;;  %s3743_s14 = smov [#allocation6]  }
  0x54   : > { %p3484_p10 = scmp.ne.s32.totalorder %s463_s5, %s3483_s15  ;;  %s3488_s17 = sshll.u32 %s3743_s14, 4  ;;  %s3489_s17 = int_to_ptr.vmem [resolvable:$false] %s3488_s17 }
  0x55   : > { %s3490_s4 = scalar_lea.vmem %s3489_s17, 256  ;;  %p3491_p0 = scmp.lt.s32.totalorder %s463_s5, %s3489_s17 }
  0x56   : > { %s461_s20 = scalar_lea.hbm %s5469_s1, %s3138_s11  ;;  %p3486_p7 = pnand %p3484_p10, %p5417_p2 }
  0x57   : > { %p3492_p5 = scmp.lt.s32.totalorder %s3490_s4, %s3483_s15 }
  0x58   : > { %p3487_p9 = pneg %p3486_p7 }
  0x59   : > { %p3493_p1 = por %p3492_p5, %p3491_p0 }
  0x5b   : > { %p3494_p6 = pnand %p3493_p1, %p3487_p9 }
  0x5d   : > { %3497 = shalt.err (!%p3494_p6)
}
  0x5e   : > { %s5470_s7 = smov 4   ;;  %s5471_s12 = smov 64  }
  0x5f   : > { %3305 = dma.hbm_to_vmem [thread:$0]  (!%p3934_p3), %s461_s20, 128, %s463_s5, %s3948_s24, %s5471_s12, %s5471_s12, %s5470_s7  }
  0x60   : > { %s3744_s11 = smov [#allocation14]   ;;  %s3745_s13 = smov [#allocation17]  }
  0x61   : > { %s383_s26 = sshll.u32 %s3744_s11, 4  ;;  %s406_s1 = sshll.u32 %s3745_s13, 4  ;;  %s384_s26 = int_to_ptr.vmem [resolvable:$true] %s383_s26  ;;  %s407_s1 = int_to_ptr.vmem [resolvable:$true] %s406_s1 }
  0x62   : > { %s3509_s14 = scalar_lea.vmem %s384_s26, 16  ;;  %s3516_s17 = scalar_lea.vmem %s384_s26, 32 }
  0x63   : > { %p3510_p10 = scmp.ne.s32.totalorder %s384_s26, %s3509_s14  ;;  %p3517_p6 = scmp.lt.s32.totalorder %s384_s26, %s384_s26 }
  0x64   : > { %p3518_p0 = scmp.lt.s32.totalorder %s3516_s17, %s3509_s14 }
  0x65   : > { %p3512_p7 = pnand %p3510_p10, %p3880_p12 }
  0x66   : > { %p3519_p5 = por %p3518_p0, %p3517_p6 }
  0x67   : > { %p3513_p9 = pneg %p3512_p7 }
  0x69   : > { %p3520_p1 = pnand %p3519_p5, %p3513_p9 }
  0x6b   : > { %3523 = shalt.err (!%p3520_p1)
}
  0x6c   : > { %s5472_s6 = sld [smem:[#allocation54_spill]]  ;;  %s3535_s13 = scalar_lea.vmem %s407_s1, 256 }
  0x6d   : > { %p3536_p2 = scmp.ne.s32.totalorder %s407_s1, %s3535_s13  ;;  %p3543_p10 = scmp.lt.s32.totalorder %s407_s1, %s407_s1 }
  0x6e   : > { %p3544_p7 = scmp.lt.s32.totalorder %s3535_s13, %s3535_s13 }
  0x6f   : > { %p3538_p13 = pnand %p3536_p2, %p3880_p12 }
  0x70   : > { %p3545_p8 = por %p3544_p7, %p3543_p10 }
  0x71   : > { %p3539_p4 = pneg %p3538_p13 }
  0x72   : > { %3292 = dma.hbm_to_vmem [thread:$0]  (!%p3874_p11), %s5472_s6, 16, %s384_s26, [#allocation13]  }
  0x73   : > { %p3546_p3 = pnand %p3545_p8, %p3539_p4 }
  0x75   : > { %3549 = shalt.err (!%p3546_p3)
}
  0x76   : > { %s5473_s15 = smov 8   ;;  %s5474_s4 = smov 128  }
  0x77   : > { %3298 = dma.hbm_to_vmem [thread:$0]  (!%p3874_p11), %s5399_s8, 256, %s407_s1, [#allocation16], %s5474_s4, %s5474_s4, %s5473_s15  }
  0x78   : > { %s3085_s16 = sshll.u32 %s3929_s29, 5  ;;  %s3137_s26 = sshll.u32 %s3730_s21, 9 }
  0x79   : > { %s438_s20 = scalar_lea.hbm %s5391_s0, %s3137_s26  ;;  %s430_s13 = scalar_lea.vmem [#allocation3], %s3085_s16 }
  0x7a   : > { %s439_s30 = sshll.u32 %s430_s13, 4  ;;  %s3091_s6 = sshll.u32 %s3929_s29, 6  ;;  %s440_s30 = int_to_ptr.vmem [resolvable:$true] %s439_s30 }
  0x7b   : > { %s427_s19 = scalar_lea.sflag [#allocation4], %s3929_s29  ;;  %s3563_s10 = scalar_lea.vmem %s440_s30, 512 }
  0x7c   : > { %p3564_p4 = scmp.ne.s32.totalorder %s440_s30, %s3563_s10  ;;  %p5475_p8 = scmp.ne.s32.totalorder %s5467_s28, 0 }
  0x7d   : > { %s3746_s11 = smov [#allocation3]  }
  0x7e   : > { %p5476_p12 = pneg %p5475_p8  ;;  %s3568_s14 = sshll.u32 %s3746_s11, 4  ;;  %s3569_s14 = int_to_ptr.vmem [resolvable:$false] %s3568_s14 }
  0x7f   : > { %s3570_s1 = scalar_lea.vmem %s3569_s14, 1024  ;;  %p3571_p11 = scmp.lt.s32.totalorder %s440_s30, %s3569_s14 }
  0x80   : > { %p3566_p13 = pnand %p3564_p4, %p5476_p12  ;;  %p3572_p2 = scmp.lt.s32.totalorder %s3570_s1, %s3563_s10 }
  0x82   : > { %p3567_p3 = pneg %p3566_p13  ;;  %p3573_p9 = por %p3572_p2, %p3571_p11 }
  0x84   : > { %p3574_p6 = pnand %p3573_p9, %p3567_p3 }
  0x86   : > { %3577 = shalt.err (!%p3574_p6)
}
  0x87   : > { %3302 = dma.hbm_to_vmem [thread:$0]  (!%p5475_p8), %s438_s20, 512, %s440_s30, %s427_s19, %s5471_s12, %s5471_s12, %s5470_s7  }
  0x88   : > { %s3139_s15 = sshll.u32 %s3730_s21, 10  ;;  %s476_s17 = scalar_lea.vmem [#allocation8], %s3091_s6 }
  0x89   : > { %s485_s26 = scalar_lea.hbm %s5393_s2, %s3139_s15  ;;  %s486_s5 = sshll.u32 %s476_s17, 4  ;;  %s487_s5 = int_to_ptr.vmem [resolvable:$true] %s486_s5 }
  0x8a   : > { %s3591_s10 = scalar_lea.vmem %s487_s5, 1024  ;;  %p5477_p5 = pmov %p5476_p12 }
  0x8b   : > { %p3592_p0 = scmp.ne.s32.totalorder %s487_s5, %s3591_s10  ;;  %s3747_s13 = smov [#allocation8]  }
  0x8c   : > { %s3596_s11 = sshll.u32 %s3747_s13, 4  ;;  %s3597_s11 = int_to_ptr.vmem [resolvable:$false] %s3596_s11 }
  0x8d   : > { %p3594_p1 = pnand %p3592_p0, %p5477_p5  ;;  %s3598_s14 = scalar_lea.vmem %s3597_s11, 2048 }
  0x8e   : > { %p3599_p7 = scmp.lt.s32.totalorder %s487_s5, %s3597_s11  ;;  %p3600_p4 = scmp.lt.s32.totalorder %s3598_s14, %s3591_s10 }
  0x8f   : > { %p3595_p10 = pneg %p3594_p1 }
  0x90   : > { %p3601_p12 = por %p3600_p4, %p3599_p7 }
  0x92   : > { %p3602_p13 = pnand %p3601_p12, %p3595_p10 }
  0x94   : > { %3605 = shalt.err (!%p3602_p13)
}
  0x95   : > { %3308 = dma.hbm_to_vmem [thread:$0]  (!%p5475_p8), %s485_s26, 1024, %s487_s5, %s3948_s24, %s5471_s12, %s5471_s12, %s5470_s7  }
  0x96   : > { %s3094_s6 = sshll.u32 %s3730_s21, 4  ;;  %s499_s1 = scalar_lea.vmem [#allocation9], %s3929_s29 }
  0x97   : > { %s504_s30 = scalar_lea.hbm %s5394_s3, %s3094_s6  ;;  %s506_s15 = sshll.u32 %s499_s1, 4  ;;  %s507_s15 = int_to_ptr.vmem [resolvable:$true] %s506_s15 }
  0x98   : > { %s5478_s4 = sand.u32 1, %s3734_s22   ;;  %s3619_s17 = scalar_lea.vmem %s507_s15, 16 }
  0x99   : > { %s497_s16 = scalar_lea.sflag [#allocation10], %s5478_s4  ;;  %p3620_p3 = scmp.ne.s32.totalorder %s507_s15, %s3619_s17 }
  0x9a   : > { %p5479_p11 = pmov %p5477_p5  ;;  %s3748_s10 = smov [#allocation9]  }
  0x9b   : > { %s3624_s13 = sshll.u32 %s3748_s10, 4  ;;  %s3625_s13 = int_to_ptr.vmem [resolvable:$false] %s3624_s13 }
  0x9c   : > { %p3622_p2 = pnand %p3620_p3, %p5479_p11  ;;  %s3626_s24 = scalar_lea.vmem %s3625_s13, 32 }
  0x9d   : > { %p3627_p6 = scmp.lt.s32.totalorder %s507_s15, %s3625_s13  ;;  %p3628_p0 = scmp.lt.s32.totalorder %s3626_s24, %s3619_s17 }
  0x9e   : > { %p3623_p9 = pneg %p3622_p2 }
  0x9f   : > { %p3629_p5 = por %p3628_p0, %p3627_p6 }
  0xa1   : > { %p3630_p1 = pnand %p3629_p5, %p3623_p9 }
  0xa3   : > { %3633 = shalt.err (!%p3630_p1)
}
  0xa4   : > { %3311 = dma.hbm_to_vmem [thread:$0]  (!%p5475_p8), %s504_s30, 16, %s507_s15, %s497_s16  }
  0xa5   : > { %p5480_p10 = scmp.ne.s32.totalorder %s5457_s27, 0 }
  0xa7   : > { %515 = sbr.rel (%p5480_p10) target bundleno = 996 (0x3e4), region = 64 }
  0xac   : > { %s4021_s29 = sand.u32 1, %s3718_s18   ;;  %p5481_p7 = scmp.ne.s32.totalorder %s5454_s25, 0 }
  0xad   : > { %s3096_s7 = sshll.u32 %s4021_s29, 5  ;;  %s518_s12 = scalar_lea.sflag [#allocation4], %s4021_s29 }
  0xae   : > { %s4025_s26 = scalar_lea.vmem [#allocation3], %s3096_s7 }
  0xaf   : > { %3685 = dma.done.wait (%p5481_p7), %s518_s12, 512  }
  0xb0   : > { %3687 = vsyncadd (%p5481_p7), %s518_s12, 4294966784  ;;  %s526_s27 = sand.u32 1, %s3846_s23   ;;  %s3097_s28 = sshll.u32 %s4021_s29, 3 }
  0xb1   : > { %s527_s5 = scalar_lea.sflag [#allocation7], %s526_s27  ;;  %s4033_s11 = scalar_lea.vmem [#allocation6], %s3097_s28 }
  0xb2   : > { %3689 = dma.done.wait (%p5481_p7), %s527_s5, 1152  }
  0xb3   : > { %3691 = vsyncadd (%p5481_p7), %s527_s5, 4294966144  ;;  %s3098_s14 = sshll.u32 %s4021_s29, 6  ;;  %s545_s19 = scalar_lea.sflag [#allocation10], %s526_s27 }
  0xb4   : > { %s4042_s6 = scalar_lea.vmem [#allocation8], %s3098_s14  ;;  %s547_s20 = scalar_lea.vmem [#allocation9], %s4021_s29 }
  0xb5   : > { %3693 = dma.done.wait (%p5481_p7), %s545_s19, 16  }
  0xb6   : > { %3695 = vsyncadd (%p5481_p7), %s545_s19, 4294967280  ;;  %p5482_p8 = scmp.eq.s32.totalorder %s3846_s23, 0 }
  0xb8   : > { %3697 = dma.done.wait (%p5482_p8), [#allocation10], 512   ;;  %p5483_p4 = pmov %p5482_p8 }
  0xba   : > { %3699 = vsyncadd (%p5483_p4), [#allocation10], 4294966784  ;;  %p5484_p12 = pmov %p5483_p4 }
  0xbb   : > { %p5485_p13 = pmov %p5483_p4 }
  0xbc   : > { %3701 = dma.done.wait (%p5484_p12), [#allocation13], 272  }
  0xbd   : > { %3703 = vsyncadd (%p5485_p13), [#allocation13], 4294967024  ;;  %p5486_p3 = pmov %p5483_p4 }
  0xbf   : > { %3705 = dma.done.wait (%p5486_p3), [#allocation16], 512   ;;  %p5487_p11 = pmov %p5486_p3 }
  0xc0   : > { %v3749_v0 = vmov 0.0   ;;  %vm3750_vm0 = vmmov 0   ;;  %v626_v1 = vld [vmem:[#allocation12 + $0x8] sm:$0xff]  ;;  %v625_v2 = vld [vmem:[#allocation12] sm:$0xff]  ;;  %v624_v3 = vld [vmem:[%s547_s20] sm:$0x1] }
  0xc1   : > { %3707 = vsyncadd (%p5487_p11), [#allocation16], 4294966784  ;;  %3203 = vmatprep.subr.mxu0 %v3749_v0  ;;  %3207 = vmatprep.mubr.msk.f32.mxu0 %vm3750_vm0, %v3749_v0  ;;  %vm628_vm1 = vcmask 130048   ;;  %v800_v4 = vld [vmem:[%s4025_s26] sm:$0xf]  ;;  %vm889_vm2 = vcmask 125952  }
  0xc2   : > { %3210 = vmatprep.subr.mxu1 %v3749_v0  ;;  %3214 = vmatprep.mubr.msk.f32.mxu1 %vm3750_vm0, %v3749_v0  ;;  %v801_v5 = vld [vmem:[%s4025_s26 + $0x4] sm:$0xf]  ;;  %v802_v6 = vld [vmem:[%s4025_s26 + $0x8] sm:$0xf]  ;;  %v803_v7 = vld [vmem:[%s4025_s26 + $0xc] sm:$0xf] }
  0xc3   : > { %3204 = vmatpush3.msra.mxu0 %v626_v1  ;;  %v804_v8 = vld [vmem:[%s4025_s26 + $0x10] sm:$0xf]  ;;  %v805_v9 = vld [vmem:[%s4025_s26 + $0x14] sm:$0xf]  ;;  %v809_v10 = vshrl.u32 %v800_v4, 16  ;;  %v817_v11 = vshrl.u32 %v801_v5, 16 }
  0xc4   : > { %3205 = vmatprep.subr.mxu0 %v3749_v0  ;;  %v825_v12 = vshrl.u32 %v802_v6, 16  ;;  %v833_v13 = vshrl.u32 %v803_v7, 16  ;;  %v812_v14 = vshll.u32 %v800_v4, 16  ;;  %v820_v15 = vshll.u32 %v801_v5, 16  ;;  %v806_v22 = vld [vmem:[%s4025_s26 + $0x18] sm:$0xf] }
  0xc5   : > { %3206 = vmatpush3.msra.mxu0 %v625_v2  ;;  %v828_v16 = vshll.u32 %v802_v6, 16  ;;  %v836_v17 = vshll.u32 %v803_v7, 16  ;;  %v811_v18 = vrot.slane %v809_v10, 7  ;;  %v819_v19 = vrot.slane %v817_v11, 7  ;;  %v892_v31 = vld [vmem:[#allocation2 + $0x8] sm:$0xf] }
  0xc6   : > { %3208 = vmatmul.mubr.msk.f32.vlgmr.msra.gmra.mxu0 %vm628_vm1, %v624_v3  ;;  %v827_v20 = vrot.slane %v825_v12, 7  ;;  %v835_v21 = vrot.slane %v833_v13, 7  ;;  %v841_v23 = vshrl.u32 %v804_v8, 16  ;;  %v844_v24 = vshll.u32 %v804_v8, 16  ;;  %v898_v36 = vld [vmem:[#allocation2 + $0xc] sm:$0x1] }
  0xc7   : > { %v849_v25 = vshrl.u32 %v805_v9, 16  ;;  %v852_v26 = vshll.u32 %v805_v9, 16  ;;  %v814_v27 = vor.u32 %v812_v14, %v811_v18  ;;  %v815_v28 = vrot.slane %v811_v18, 4  ;;  %v901_v37 = vld [vmem:[#allocation2 + $0x10] sm:$0xf]  ;;  %s5541_s16 = sld [smem:[#allocation56_spill]] }
  0xc8   : > { %v822_v29 = vor.u32 %v820_v15, %v819_v19  ;;  %v823_v30 = vrot.slane %v819_v19, 4  ;;  %v830_v32 = vor.u32 %v828_v16, %v827_v20  ;;  %v831_v33 = vrot.slane %v827_v20, 4  ;;  %v904_v38 = vld [vmem:[#allocation2 + $0x14] sm:$0x1]  ;;  %v907_v43 = vld [vmem:[#allocation2 + $0x18] sm:$0xf] }
  0xc9   : > { %v838_v34 = vor.u32 %v836_v17, %v835_v21  ;;  %v839_v35 = vrot.slane %v835_v21, 4  ;;  %v843_v39 = vrot.slane %v841_v23, 7  ;;  %v851_v40 = vrot.slane %v849_v25, 7  ;;  %v910_v49 = vld [vmem:[#allocation2 + $0x1c] sm:$0x1]  ;;  %v704_v19 = vld [vmem:[#allocation17 + $0x8] sm:$0xff] }
  0xca   : > { %v857_v41 = vshrl.u32 %v806_v22, 16  ;;  %v860_v42 = vshll.u32 %v806_v22, 16  ;;  %vm890_vm3 = vsmask.f32 7938  ;;  %vm895_vm4 = vcmask 122880   ;;  %3211 = vmatpush3.msra.mxu1 %v704_v19  ;;  %s3751_s17 = smov 16  }
  0xcb   : > { %vm896_vm5 = vsmask.f32 256  ;;  %v846_v44 = vor.u32 %v844_v24, %v843_v39  ;;  %v847_v45 = vrot.slane %v843_v39, 4  ;;  %v854_v46 = vor.u32 %v852_v26, %v851_v40  ;;  %vm4075_vm6 = vmand %vm889_vm2, %vm890_vm3  ;;  %v913_v50 = vld [vmem:[#allocation2 + $0x20] sm:$0xf]  ;;  %3212 = vmatprep.subr.mxu1 %v3749_v0  ;;  %v703_v26 = vld [vmem:[#allocation17] sm:$0xff] }
  0xcc   : > { %v855_v47 = vrot.slane %v851_v40, 4  ;;  %v943_v51 = vld [vmem:[%s4033_s11] sm:$0xf]  ;;  %v859_v52 = vrot.slane %v857_v41, 7  ;;  %v893_v53 = vsel %vm4075_vm6, %v814_v27, %v892_v31  ;;  %vm4083_vm7 = vmand %vm895_vm4, %vm896_vm5  ;;  %v902_v55 = vsel %vm4075_vm6, %v822_v29, %v901_v37  ;;  %v916_v57 = vld [vmem:[#allocation2 + $0x24] sm:$0x1]  ;;  %3213 = vmatpush3.msra.mxu1 %v703_v26 }
  0xcd   : > { %v908_v56 = vsel %vm4075_vm6, %v830_v32, %v907_v43  ;;  %v919_v58 = vld [vmem:[#allocation2 + $0x28] sm:$0xf]  ;;  %894 = vst [vmem:[#allocation2 + $0x8] sm:$0xf] %v893_v53  ;;  %v899_v59 = vsel %vm4083_vm7, %v815_v28, %v898_v36  ;;  %903 = vst [vmem:[#allocation2 + $0x10] sm:$0xf] %v902_v55  ;;  %v905_v60 = vsel %vm4083_vm7, %v823_v30, %v904_v38 }
  0xce   : > { %909 = vst [vmem:[#allocation2 + $0x18] sm:$0xf] %v908_v56  ;;  %v911_v61 = vsel %vm4083_vm7, %v831_v33, %v910_v49  ;;  %v922_v62 = vld [vmem:[#allocation2 + $0x2c] sm:$0x1]  ;;  %v925_v63 = vld [vmem:[#allocation2 + $0x30] sm:$0xf]  ;;  %v862_v2 = vor.u32 %v860_v42, %v859_v52  ;;  %v914_v4 = vsel %vm4075_vm6, %v838_v34, %v913_v50  ;;  %v917_v5 = vsel %vm4083_vm7, %v839_v35, %v916_v57  ;;  %vm4117_vm8 = vmand %vm895_vm4, %vm890_vm3 }
  0xcf   : > { %v928_v1 = vld [vmem:[#allocation2 + $0x34] sm:$0x1]  ;;  %v863_v3 = vrot.slane %v859_v52, 4  ;;  %900 = vst [vmem:[#allocation2 + $0xc] sm:$0x1] %v899_v59  ;;  %v920_v8 = vsel %vm4075_vm6, %v846_v44, %v919_v58  ;;  %v923_v9 = vsel %vm4083_vm7, %v847_v45, %v922_v62  ;;  %v926_v10 = vsel %vm4075_vm6, %v854_v46, %v925_v63  ;;  %s5241_s10 = scalar_lea.vmem [#allocation18], %s3098_s14 }
  0xd0   : > { %906 = vst [vmem:[#allocation2 + $0x14] sm:$0x1] %v905_v60  ;;  %912 = vst [vmem:[#allocation2 + $0x1c] sm:$0x1] %v911_v61  ;;  %v931_v6 = vld [vmem:[#allocation2 + $0x38] sm:$0xf]  ;;  %v929_v11 = vsel %vm4083_vm7, %v855_v47, %v928_v1 }
  0xd1   : > { %v934_v7 = vld [vmem:[#allocation2 + $0x3c] sm:$0x1]  ;;  %915 = vst [vmem:[#allocation2 + $0x20] sm:$0xf] %v914_v4  ;;  %918 = vst [vmem:[#allocation2 + $0x24] sm:$0x1] %v917_v5  ;;  %v932_v12 = vsel %vm4075_vm6, %v862_v2, %v931_v6 }
  0xd2   : > { %921 = vst [vmem:[#allocation2 + $0x28] sm:$0xf] %v920_v8  ;;  %924 = vst [vmem:[#allocation2 + $0x2c] sm:$0x1] %v923_v9  ;;  %v935_v13 = vsel %vm4083_vm7, %v863_v3, %v934_v7  ;;  %v946_v14 = vshrl.u32 %v943_v51, 16  ;;  %v949_v15 = vshll.u32 %v943_v51, 16 }
  0xd3   : > { %927 = vst [vmem:[#allocation2 + $0x30] sm:$0xf] %v926_v10  ;;  %930 = vst [vmem:[#allocation2 + $0x34] sm:$0x1] %v929_v11  ;;  %v955_v17 = vld [vmem:[#allocation2] sm:$0xf] }
  0xd4   : > { %933 = vst [vmem:[#allocation2 + $0x38] sm:$0xf] %v932_v12  ;;  %936 = vst [vmem:[#allocation2 + $0x3c] sm:$0x1] %v935_v13  ;;  %v948_v16 = vrot.slane %v946_v14, 7  ;;  %vm1152_vm9 = vcmask 1046528  }
  0xd5   : > { %v958_v18 = vld [vmem:[#allocation2 + $0x4] sm:$0x1]  ;;  %v981_v22 = vld [vmem:[#allocation2 + $0x8] sm:$0x1]  ;;  %v984_v24 = vld [vmem:[#allocation2 + $0x10] sm:$0x1] }
  0xd6   : > { %v951_v20 = vor.u32 %v949_v15, %v948_v16  ;;  %v952_v21 = vrot.slane %v948_v16, 4  ;;  %v982_v23 = vsel %vm4083_vm7, 0, %v981_v22  ;;  %v985_v29 = vsel %vm4083_vm7, 0, %v984_v24  ;;  %v987_v30 = vld [vmem:[#allocation2 + $0x18] sm:$0x1]  ;;  %s5542_s13 = sld [smem:[#allocation28_spill]] }
  0xd7   : > { %983 = vst [vmem:[#allocation2 + $0x8] sm:$0x1] %v982_v23  ;;  %986 = vst [vmem:[#allocation2 + $0x10] sm:$0x1] %v985_v29  ;;  %v988_v0 = vsel %vm4083_vm7, 0, %v987_v30  ;;  %v783_v23 = vlaneseq  ;;  %s5543_s24 = sld [smem:[#allocation30_spill]] }
  0xd8   : > { %v956_v27 = vsel %vm4075_vm6, %v951_v20, %v955_v17  ;;  %v959_v28 = vsel %vm4083_vm7, %v952_v21, %v958_v18  ;;  %v990_v31 = vld [vmem:[#allocation2 + $0x20] sm:$0x1]  ;;  %989 = vst [vmem:[#allocation2 + $0x18] sm:$0x1] %v988_v0  ;;  %v1012_v38 = vld [vmem:[#allocation2 + $0xc] sm:$0x1] }
  0xd9   : > { %957 = vst [vmem:[#allocation2] sm:$0xf] %v956_v27  ;;  %960 = vst [vmem:[#allocation2 + $0x4] sm:$0x1] %v959_v28  ;;  %v991_v32 = vsel %vm4083_vm7, 0, %v990_v31  ;;  %v1013_v40 = vsel %vm4117_vm8, 0, %v1012_v38 }
  0xda   : > { %v993_v33 = vld [vmem:[#allocation2 + $0x28] sm:$0x1]  ;;  %v996_v34 = vld [vmem:[#allocation2 + $0x30] sm:$0x1]  ;;  %992 = vst [vmem:[#allocation2 + $0x20] sm:$0x1] %v991_v32 }
  0xdb   : > { %v994_v35 = vsel %vm4083_vm7, 0, %v993_v33  ;;  %v997_v36 = vsel %vm4083_vm7, 0, %v996_v34  ;;  %v999_v37 = vld [vmem:[#allocation2 + $0x38] sm:$0x1]  ;;  %v1015_v41 = vld [vmem:[#allocation2 + $0x14] sm:$0x1] }
  0xdc   : > { %995 = vst [vmem:[#allocation2 + $0x28] sm:$0x1] %v994_v35  ;;  %998 = vst [vmem:[#allocation2 + $0x30] sm:$0x1] %v997_v36  ;;  %v1000_v39 = vsel %vm4083_vm7, 0, %v999_v37  ;;  %v1016_v43 = vsel %vm4117_vm8, 0, %v1015_v41 }
  0xdd   : > { %v1018_v42 = vld [vmem:[#allocation2 + $0x1c] sm:$0x1]  ;;  %1001 = vst [vmem:[#allocation2 + $0x38] sm:$0x1] %v1000_v39  ;;  %1014 = vst [vmem:[#allocation2 + $0xc] sm:$0x1] %v1013_v40 }
  0xde   : > { %v1019_v44 = vsel %vm4117_vm8, 0, %v1018_v42  ;;  %v1021_v45 = vld [vmem:[#allocation2 + $0x24] sm:$0x1]  ;;  %v1024_v46 = vld [vmem:[#allocation2 + $0x2c] sm:$0x1]  ;;  %v4174_v24 = vshrl.u32 %v783_v23, 7 }
  0xdf   : > { %1017 = vst [vmem:[#allocation2 + $0x14] sm:$0x1] %v1016_v43  ;;  %1020 = vst [vmem:[#allocation2 + $0x1c] sm:$0x1] %v1019_v44  ;;  %v1022_v47 = vsel %vm4117_vm8, 0, %v1021_v45  ;;  %v1025_v49 = vsel %vm4117_vm8, 0, %v1024_v46 }
  0xe0   : > { %v1027_v50 = vld [vmem:[#allocation2 + $0x34] sm:$0x1]  ;;  %v1030_v51 = vld [vmem:[#allocation2 + $0x3c] sm:$0x1]  ;;  %1023 = vst [vmem:[#allocation2 + $0x24] sm:$0x1] %v1022_v47 }
  0xe1   : > { %1026 = vst [vmem:[#allocation2 + $0x2c] sm:$0x1] %v1025_v49  ;;  %v1028_v52 = vsel %vm4117_vm8, 0, %v1027_v50  ;;  %v1031_v53 = vsel %vm4117_vm8, 0, %v1030_v51  ;;  %v978_v55 = vld [vmem:[#allocation2] sm:$0x1] }
  0xe2   : > { %1029 = vst [vmem:[#allocation2 + $0x34] sm:$0x1] %v1028_v52  ;;  %1032 = vst [vmem:[#allocation2 + $0x3c] sm:$0x1] %v1031_v53  ;;  %v1009_v56 = vld [vmem:[#allocation2 + $0x4] sm:$0x1] }
  0xe3   : > { %v979_v57 = vsel %vm4083_vm7, 0, %v978_v55  ;;  %v1010_v58 = vsel %vm4117_vm8, 0, %v1009_v56  ;;  %v807_v59 = vld [vmem:[%s4025_s26 + $0x1c] sm:$0xf]  ;;  %v937_v2 = vld [vmem:[#allocation2 + $0x40] sm:$0xf] }
  0xe4   : > { %980 = vst [vmem:[#allocation2] sm:$0x1] %v979_v57  ;;  %1011 = vst [vmem:[#allocation2 + $0x4] sm:$0x1] %v1010_v58  ;;  %v865_v60 = vshrl.u32 %v807_v59, 16  ;;  %v868_v62 = vshll.u32 %v807_v59, 16 }
  0xe5   : > { %v940_v3 = vld [vmem:[#allocation2 + $0x44] sm:$0x1]  ;;  %v944_v6 = vld [vmem:[%s4033_s11 + $0x4] sm:$0xf]  ;;  %v972_v12 = vld [vmem:[#allocation2 + $0x48] sm:$0xf] }
  0xe6   : > { %v867_v61 = vrot.slane %v865_v60, 7  ;;  %v962_v7 = vshrl.u32 %v944_v6, 16  ;;  %v965_v9 = vshll.u32 %v944_v6, 16  ;;  %v975_v13 = vld [vmem:[#allocation2 + $0x4c] sm:$0x1]  ;;  %v4177_v28 = vsub.s32 0, %v4174_v24 }
  0xe7   : > { %v627_v26 = vld [vmem:[#allocation14] sm:$0x1]  ;;  %v1047_v29 = vld [vmem:[#allocation2 + $0x20] ss:$8 sps:$4 sm:$0xff]   ;;  %v779_v0 = vld [vmem:[#allocation15] sm:$0xf] }
  0xe8   : > { %v870_v63 = vor.u32 %v868_v62, %v867_v61  ;;  %v871_v1 = vrot.slane %v867_v61, 4  ;;  %v964_v8 = vrot.slane %v962_v7, 7  ;;  %v1043_v27 = vld [vmem:[#allocation2 + $0x10] ss:$8 sps:$4 sm:$0xff]   ;;  %v4180_v54 = vsub.s32 2, %v4174_v24  ;;  %s3140_s7 = sshll.u32 %s5542_s13, 10 }
  0xe9   : > { %v1051_v30 = vld [vmem:[#allocation2 + $0x30] ss:$8 sps:$4 sm:$0xff]   ;;  %v4183_v25 = vsub.s32 1, %v4174_v24  ;;  %v4186_v33 = vsub.s32 3, %v4174_v24  ;;  %v1042_v34 = vld [vmem:[#allocation2 + $0xc] sm:$0x1]  ;;  %v4188_v38 = vunpack.c.l.bf16 %v1043_v27  ;;  %v4190_v43 = vunpack.c.h.bf16 %v1043_v27 }
  0xea   : > { %v938_v4 = vsel %vm4075_vm6, %v870_v63, %v937_v2  ;;  %v941_v5 = vsel %vm4083_vm7, %v871_v1, %v940_v3  ;;  %v967_v10 = vor.u32 %v965_v9, %v964_v8  ;;  %v968_v11 = vrot.slane %v964_v8, 4  ;;  %v780_v32 = vld [vmem:[#allocation15 + $0x4] sm:$0xf]  ;;  %v1044_v37 = vld [vmem:[#allocation2 + $0x14] sm:$0x1]  ;;  %s2871_s12 = sshll.u32 %s5241_s10, 4  ;;  %s5341_s12 = int_to_ptr.vmem [resolvable:$true] %s2871_s12 }
  0xeb   : > { %939 = vst [vmem:[#allocation2 + $0x40] sm:$0xf] %v938_v4  ;;  %942 = vst [vmem:[#allocation2 + $0x44] sm:$0x1] %v941_v5  ;;  %v1039_v36 = vld [vmem:[#allocation2] ss:$8 sps:$4 sm:$0xff]   ;;  %v4192_v44 = vunpack.c.l.bf16 %v1047_v29  ;;  %v4194_v45 = vunpack.c.h.bf16 %v1047_v29  ;;  %v4196_v46 = vunpack.c.l.bf16 %v1051_v30  ;;  %v4201_v51 = vunpack.c.h.bf16 %v1051_v30 }
  0xec   : > { %v973_v16 = vsel %vm4075_vm6, %v967_v10, %v972_v12  ;;  %v976_v17 = vsel %vm4083_vm7, %v968_v11, %v975_v13  ;;  %v1046_v39 = vld [vmem:[#allocation2 + $0x1c] sm:$0x1]  ;;  %v1040_v42 = vld [vmem:[#allocation2 + $0x4] sm:$0x1]  ;;  %v4203_v52 = vunpack.c.l.bf16 %v1042_v34  ;;  %v1050_v53 = vld [vmem:[#allocation2 + $0x2c] sm:$0x1]  ;;  %v4205_v57 = vunpack.c.l.bf16 %v1039_v36 }
  0xed   : > { %974 = vst [vmem:[#allocation2 + $0x48] sm:$0xf] %v973_v16  ;;  %977 = vst [vmem:[#allocation2 + $0x4c] sm:$0x1] %v976_v17  ;;  %v781_v40 = vld [vmem:[#allocation15 + $0x8] sm:$0xf]  ;;  %v4207_v58 = vunpack.c.h.bf16 %v1039_v36  ;;  %v4209_v59 = vunpack.c.l.bf16 %v1044_v37  ;;  %v4211_v60 = vunpack.c.l.bf16 %v1046_v39  ;;  %v4216_v2 = vunpack.c.l.bf16 %v1040_v42 }
  0xee   : > { %v1048_v47 = vld [vmem:[#allocation2 + $0x24] sm:$0x1]  ;;  %v1052_v55 = vld [vmem:[#allocation2 + $0x34] sm:$0x1]  ;;  %v1054_v56 = vld [vmem:[#allocation2 + $0x3c] sm:$0x1]  ;;  %v4221_v7 = vunpack.c.l.bf16 %v1050_v53 }
  0xef   : > { %v4218_v3 = vunpack.c.l.bf16 %v1048_v47  ;;  %v4223_v8 = vunpack.c.l.bf16 %v1052_v55  ;;  %v4225_v9 = vunpack.c.l.bf16 %v1054_v56  ;;  %s5544_s28 = sld [smem:[#allocation57_spill]]  ;;  %s2855_s11 = scalar_lea.sflag [#allocation5], %s4021_s29 }
  0xf0   : > { %s3634_s14 = scalar_lea.vmem %s5341_s12, 1024  ;;  %p5545_p9 = scmp.ne.s32.totalorder %s5543_s24, 0 }
  0xf1   : > { %p3635_p2 = scmp.ne.s32.totalorder %s5341_s12, %s3634_s14 }
  0xf2   : > { %v1002_v14 = vld [vmem:[#allocation2 + $0x40] sm:$0x1]  ;;  %v1033_v15 = vld [vmem:[#allocation2 + $0x44] sm:$0x1] }
  0xf3   : > { %v1003_v18 = vsel %vm4083_vm7, 0, %v1002_v14  ;;  %v1034_v19 = vsel %vm4117_vm8, 0, %v1033_v15  ;;  %p3636_p6 = pnand %p3635_p2, %p5545_p9 }
  0xf4   : > { %1004 = vst [vmem:[#allocation2 + $0x40] sm:$0x1] %v1003_v18  ;;  %1035 = vst [vmem:[#allocation2 + $0x44] sm:$0x1] %v1034_v19  ;;  %v1005_v20 = vld [vmem:[#allocation2 + $0x48] sm:$0x1] }
  0xf5   : > { %v1036_v21 = vld [vmem:[#allocation2 + $0x4c] sm:$0x1]  ;;  %v1006_v22 = vsel %vm4083_vm7, 0, %v1005_v20  ;;  %s5339_s5 = scalar_lea.hbm %s5544_s28, %s3140_s7  ;;  %p3637_p0 = pneg %p3636_p6 }
  0xf6   : > { %v1037_v48 = vsel %vm4117_vm8, 0, %v1036_v21  ;;  %1007 = vst [vmem:[#allocation2 + $0x48] sm:$0x1] %v1006_v22 }
  0xf7   : > { %1038 = vst [vmem:[#allocation2 + $0x4c] sm:$0x1] %v1037_v48 }
  0xfb   : > { %v1055_v61 = vld [vmem:[#allocation2 + $0x40] sm:$0xf]  ;;  %v1056_v62 = vld [vmem:[#allocation2 + $0x44] sm:$0x1] }
  0xfc   : > { %v4233_v12 = vunpack.c.l.bf16 %v1055_v61  ;;  %v4235_v13 = vunpack.c.l.bf16 %v1056_v62 }
  0xfd   : > { %v1057_v4 = vld [vmem:[#allocation2 + $0x48] sm:$0xf] }
  0xfe   : > { %v1058_v5 = vld [vmem:[#allocation2 + $0x4c] sm:$0x1]  ;;  %v4243_v16 = vunpack.c.l.bf16 %v1057_v4 }
  0xff   : > { %v4245_v17 = vunpack.c.l.bf16 %v1058_v5 }
 0x100   : > { %5494 = vst [vmem:[#allocation33_spill] sm:$0xff] %v4243_v16 }
 0x101   : > { %5495 = vst [vmem:[#allocation34_spill] sm:$0xff] %v4245_v17 }
 0x186   : > { %v698_v31 = vpop.f32.mrf.mxu0 }
 0x187   : > { %v699_v35 = vadd.f32 %v698_v31, %v627_v26 }
 0x188   : > { %v3209_v41 = vpop.f32.mrf.mxu0 }
 0x189   : > { %v702_v49 = vmul.f32 %v699_v35, %v699_v35  ;;  %v4199_v50 = vrot.slane %v699_v35, %v4177_v28 }
 0x18b   : > { %v787_v63 = vmul.f32 %v4199_v50, %v779_v0  ;;  %v788_v1 = vmul.f32 %v4199_v50, %v780_v32  ;;  %3215 = vmatmul.mubr.msk.f32.vlgmr.msra.gmra.mxu1 %vm628_vm1, %v702_v49  ;;  %v789_v6 = vmul.f32 %v4199_v50, %v781_v40 }
 0x18d   : > { %v4228_v10 = vrot.slane %v787_v63, %v4177_v28  ;;  %v4231_v11 = vrot.slane %v787_v63, %v4180_v54  ;;  %v4238_v14 = vrot.slane %v787_v63, %v4183_v25  ;;  %v4241_v15 = vrot.slane %v787_v63, %v4186_v33 }
 0x18e   : > { %v4248_v18 = vrot.slane %v788_v1, %v4177_v28  ;;  %v4251_v19 = vrot.slane %v788_v1, %v4180_v54  ;;  %v4254_v20 = vrot.slane %v788_v1, %v4183_v25  ;;  %v4257_v21 = vrot.slane %v788_v1, %v4186_v33 }
 0x18f   : > { %v4260_v22 = vrot.slane %v789_v6, %v4177_v28  ;;  %v4263_v48 = vrot.slane %v789_v6, %v4180_v54  ;;  %v4266_v23 = vrot.slane %v789_v6, %v4183_v25  ;;  %v4269_v26 = vrot.slane %v789_v6, %v4186_v33 }
 0x190   : > { %v1071_v27 = vmul.f32 %v4228_v10, %v4205_v57  ;;  %v1072_v29 = vmul.f32 %v4228_v10, %v4207_v58  ;;  %v1092_v30 = vmul.f32 %v4231_v11, %v4207_v58  ;;  %v1093_v31 = vmul.f32 %v4231_v11, %v4188_v38 }
 0x191   : > { %v1120_v0 = vmul.f32 %v4238_v14, %v4205_v57  ;;  %v1121_v32 = vmul.f32 %v4238_v14, %v4216_v2  ;;  %v1122_v34 = vmul.f32 %v4238_v14, %v4207_v58  ;;  %v1123_v35 = vmul.f32 %v4238_v14, %v4203_v52 }
 0x192   : > { %v1100_v36 = vadd.f32 %v1092_v30, %v1071_v27  ;;  %v1101_v37 = vadd.f32 %v1093_v31, %v1072_v29  ;;  %v1198_v39 = vmul.f32 %v4241_v15, %v4207_v58  ;;  %v1199_v40 = vmul.f32 %v4241_v15, %v4203_v52 }
 0x193   : > { %v1153_v41 = vrot.slane %v1120_v0, 1  ;;  %v1154_v42 = vrot.slane %v1121_v32, 1  ;;  %v1156_v47 = vrot.slane %v1122_v34, 1  ;;  %v1157_v49 = vrot.slane %v1123_v35, 1 }
 0x194   : > { %v1200_v53 = vmul.f32 %v4241_v15, %v4188_v38  ;;  %v1201_v55 = vmul.f32 %v4241_v15, %v4209_v59  ;;  %v1230_v56 = vrot.slane %v1198_v39, 1  ;;  %v1231_v61 = vrot.slane %v1199_v40, 1 }
 0x195   : > { %v1155_v62 = vsel %vm1152_vm9, %v1153_v41, %v1154_v42  ;;  %v1158_v63 = vsel %vm1152_vm9, %v1156_v47, %v1157_v49  ;;  %v1530_v1 = vmul.f32 %v4260_v22, %v4207_v58  ;;  %v1531_v4 = vmul.f32 %v4260_v22, %v4188_v38 }
 0x196   : > { %v1185_v5 = vadd.f32 %v1155_v62, %v1100_v36  ;;  %v1186_v6 = vadd.f32 %v1158_v63, %v1101_v37  ;;  %v1232_v27 = vsel %vm1152_vm9, %v1230_v56, %v1231_v61  ;;  %v1233_v29 = vrot.slane %v1200_v53, 1 }
 0x197   : > { %v1234_v30 = vrot.slane %v1201_v55, 1  ;;  %v1551_v31 = vmul.f32 %v4263_v48, %v4188_v38  ;;  %v1552_v0 = vmul.f32 %v4263_v48, %v4190_v43  ;;  %v1571_v32 = vmul.f32 %v4266_v23, %v4207_v58 }
 0x198   : > { %v1262_v34 = vadd.f32 %v1232_v27, %v1185_v5  ;;  %v1572_v35 = vmul.f32 %v4266_v23, %v4203_v52  ;;  %v1573_v36 = vmul.f32 %v4266_v23, %v4188_v38  ;;  %v1574_v37 = vmul.f32 %v4266_v23, %v4209_v59 }
 0x199   : > { %v1235_v39 = vsel %vm1152_vm9, %v1233_v29, %v1234_v30  ;;  %v1559_v40 = vadd.f32 %v1551_v31, %v1530_v1  ;;  %v1560_v41 = vadd.f32 %v1552_v0, %v1531_v4  ;;  %v1603_v42 = vrot.slane %v1571_v32, 1 }
 0x19a   : > { %v1263_v47 = vadd.f32 %v1235_v39, %v1186_v6  ;;  %v1604_v49 = vrot.slane %v1572_v35, 1  ;;  %v1606_v53 = vrot.slane %v1573_v36, 1  ;;  %v1607_v55 = vrot.slane %v1574_v37, 1 }
 0x19b   : > { %v1648_v56 = vmul.f32 %v4269_v26, %v4188_v38  ;;  %v1649_v61 = vmul.f32 %v4269_v26, %v4209_v59  ;;  %v1650_v62 = vmul.f32 %v4269_v26, %v4190_v43  ;;  %v1651_v63 = vmul.f32 %v4269_v26, %v4211_v60 }
 0x19c   : > { %v2072_v5 = vpack.c.bf16 %v1263_v47, %v1262_v34  ;;  %v1605_v1 = vsel %vm1152_vm9, %v1603_v42, %v1604_v49  ;;  %v1608_v4 = vsel %vm1152_vm9, %v1606_v53, %v1607_v55  ;;  %v1073_v6 = vmul.f32 %v4228_v10, %v4188_v38 }
 0x19d   : > { %v1635_v27 = vadd.f32 %v1605_v1, %v1559_v40  ;;  %v1636_v29 = vadd.f32 %v1608_v4, %v1560_v41  ;;  %v1680_v30 = vrot.slane %v1648_v56, 1  ;;  %v1681_v31 = vrot.slane %v1649_v61, 1 }
 0x19e   : > { %3219 = vmatprep.mubr.msk.bf16.mxu0 %vm628_vm1, %v2072_v5  ;;  %v1683_v0 = vrot.slane %v1650_v62, 1  ;;  %v1684_v32 = vrot.slane %v1651_v63, 1  ;;  %v1074_v35 = vmul.f32 %v4228_v10, %v4190_v43  ;;  %v1094_v34 = vmul.f32 %v4231_v11, %v4190_v43 }
 0x19f   : > { %v1682_v36 = vsel %vm1152_vm9, %v1680_v30, %v1681_v31  ;;  %v1095_v37 = vmul.f32 %v4231_v11, %v4192_v44  ;;  %v1124_v39 = vmul.f32 %v4238_v14, %v4188_v38  ;;  %v1125_v40 = vmul.f32 %v4238_v14, %v4209_v59 }
 0x1a0   : > { %v1685_v41 = vsel %vm1152_vm9, %v1683_v0, %v1684_v32  ;;  %v1712_v42 = vadd.f32 %v1682_v36, %v1635_v27  ;;  %v1102_v47 = vadd.f32 %v1094_v34, %v1073_v6  ;;  %v1126_v49 = vmul.f32 %v4238_v14, %v4190_v43 }
 0x1a1   : > { %v1713_v53 = vadd.f32 %v1685_v41, %v1636_v29  ;;  %v1103_v55 = vadd.f32 %v1095_v37, %v1074_v35  ;;  %v1127_v56 = vmul.f32 %v4238_v14, %v4211_v60  ;;  %v1159_v61 = vrot.slane %v1124_v39, 1 }
 0x1a2   : > { %v1160_v62 = vrot.slane %v1125_v40, 1  ;;  %v1162_v63 = vrot.slane %v1126_v49, 1  ;;  %v1202_v5 = vmul.f32 %v4241_v15, %v4190_v43  ;;  %v1203_v1 = vmul.f32 %v4241_v15, %v4211_v60 }
 0x1a3   : > { %v2080_v4 = vpack.c.bf16 %v1713_v53, %v1712_v42  ;;  %v1163_v27 = vrot.slane %v1127_v56, 1  ;;  %v1204_v6 = vmul.f32 %v4241_v15, %v4192_v44  ;;  %v1205_v29 = vmul.f32 %v4241_v15, %v4218_v3 }
 0x1a4   : > { %v1161_v30 = vsel %vm1152_vm9, %v1159_v61, %v1160_v62  ;;  %v1236_v31 = vrot.slane %v1202_v5, 1  ;;  %v1237_v0 = vrot.slane %v1203_v1, 1  ;;  %v1532_v32 = vmul.f32 %v4260_v22, %v4190_v43 }
 0x1a5   : > { %3235 = vmatprep.mubr.msk.bf16.mxu1 %vm628_vm1, %v2080_v4  ;;  %v1164_v35 = vsel %vm1152_vm9, %v1162_v63, %v1163_v27  ;;  %v1187_v34 = vadd.f32 %v1161_v30, %v1102_v47  ;;  %v1239_v36 = vrot.slane %v1204_v6, 1  ;;  %v1240_v37 = vrot.slane %v1205_v29, 1 }
 0x1a6   : > { %v1188_v39 = vadd.f32 %v1164_v35, %v1103_v55  ;;  %v1238_v40 = vsel %vm1152_vm9, %v1236_v31, %v1237_v0  ;;  %v1533_v41 = vmul.f32 %v4260_v22, %v4192_v44  ;;  %v1553_v42 = vmul.f32 %v4263_v48, %v4192_v44 }
 0x1a7   : > { %v1241_v49 = vsel %vm1152_vm9, %v1239_v36, %v1240_v37  ;;  %v4363_v53 = vadd.f32 %v1238_v40, %v1187_v34  ;;  %v1554_v56 = vmul.f32 %v4263_v48, %v4194_v45  ;;  %v1575_v47 = vmul.f32 %v4266_v23, %v4190_v43 }
 0x1a8   : > { %v4369_v61 = vadd.f32 %v1241_v49, %v1188_v39  ;;  %v1561_v55 = vadd.f32 %v1553_v42, %v1532_v32  ;;  %v1576_v62 = vmul.f32 %v4266_v23, %v4211_v60  ;;  %v1577_v63 = vmul.f32 %v4266_v23, %v4192_v44 }
 0x1a9   : > { %5496 = vst [vmem:[#allocation35_spill] sm:$0xff] %v4363_v53  ;;  %v1562_v5 = vadd.f32 %v1554_v56, %v1533_v41  ;;  %v1578_v1 = vmul.f32 %v4266_v23, %v4218_v3  ;;  %v1609_v4 = vrot.slane %v1575_v47, 1  ;;  %v1652_v27 = vmul.f32 %v4269_v26, %v4192_v44 }
 0x1aa   : > { %5497 = vst [vmem:[#allocation36_spill] sm:$0xff] %v4369_v61  ;;  %v1610_v29 = vrot.slane %v1576_v62, 1  ;;  %v1612_v30 = vrot.slane %v1577_v63, 1  ;;  %v1653_v31 = vmul.f32 %v4269_v26, %v4218_v3  ;;  %v1654_v32 = vmul.f32 %v4269_v26, %v4194_v45 }
 0x1ab   : > { %v1613_v0 = vrot.slane %v1578_v1, 1  ;;  %v1655_v35 = vmul.f32 %v4269_v26, %v4221_v7  ;;  %v1686_v34 = vrot.slane %v1652_v27, 1  ;;  %v1075_v39 = vmul.f32 %v4228_v10, %v4192_v44 }
 0x1ac   : > { %v1611_v36 = vsel %vm1152_vm9, %v1609_v4, %v1610_v29  ;;  %v1687_v37 = vrot.slane %v1653_v31, 1  ;;  %v1076_v40 = vmul.f32 %v4228_v10, %v4194_v45  ;;  %v1689_v49 = vrot.slane %v1654_v32, 1 }
 0x1ad   : > { %v1614_v41 = vsel %vm1152_vm9, %v1612_v30, %v1613_v0  ;;  %v1637_v42 = vadd.f32 %v1611_v36, %v1561_v55  ;;  %v1690_v56 = vrot.slane %v1655_v35, 1  ;;  %v1096_v63 = vmul.f32 %v4231_v11, %v4194_v45 }
 0x1ae   : > { %v1638_v47 = vadd.f32 %v1614_v41, %v1562_v5  ;;  %v1688_v62 = vsel %vm1152_vm9, %v1686_v34, %v1687_v37  ;;  %v1097_v1 = vmul.f32 %v4231_v11, %v4196_v46  ;;  %v1128_v29 = vmul.f32 %v4238_v14, %v4192_v44 }
 0x1af   : > { %v1691_v4 = vsel %vm1152_vm9, %v1689_v49, %v1690_v56  ;;  %v4399_v27 = vadd.f32 %v1688_v62, %v1637_v42  ;;  %v1129_v55 = vmul.f32 %v4238_v14, %v4218_v3  ;;  %v1104_v5 = vadd.f32 %v1096_v63, %v1075_v39 }
 0x1b0   : > { %v4405_v30 = vadd.f32 %v1691_v4, %v1638_v47  ;;  %v1105_v31 = vadd.f32 %v1097_v1, %v1076_v40  ;;  %v1130_v0 = vmul.f32 %v4238_v14, %v4194_v45  ;;  %v1131_v32 = vmul.f32 %v4238_v14, %v4221_v7 }
 0x1b1   : > { %5498 = vst [vmem:[#allocation37_spill] sm:$0xff] %v4399_v27  ;;  %v1165_v35 = vrot.slane %v1128_v29, 1  ;;  %v1166_v34 = vrot.slane %v1129_v55, 1  ;;  %v1206_v36 = vmul.f32 %v4241_v15, %v4194_v45  ;;  %v1207_v42 = vmul.f32 %v4241_v15, %v4221_v7 }
 0x1b2   : > { %5499 = vst [vmem:[#allocation38_spill] sm:$0xff] %v4405_v30  ;;  %v1168_v41 = vrot.slane %v1130_v0, 1  ;;  %v1208_v39 = vmul.f32 %v4241_v15, %v4196_v46  ;;  %v1169_v49 = vrot.slane %v1131_v32, 1  ;;  %v1209_v56 = vmul.f32 %v4241_v15, %v4223_v8 }
 0x1b3   : > { %v1167_v40 = vsel %vm1152_vm9, %v1165_v35, %v1166_v34  ;;  %v1242_v47 = vrot.slane %v1206_v36, 1  ;;  %v1243_v63 = vrot.slane %v1207_v42, 1  ;;  %v1534_v4 = vmul.f32 %v4260_v22, %v4194_v45 }
 0x1b4   : > { %v1189_v62 = vadd.f32 %v1167_v40, %v1104_v5  ;;  %v1245_v1 = vrot.slane %v1208_v39, 1  ;;  %v1170_v29 = vsel %vm1152_vm9, %v1168_v41, %v1169_v49  ;;  %v1246_v55 = vrot.slane %v1209_v56, 1 }
 0x1b5   : > { %v1535_v0 = vmul.f32 %v4260_v22, %v4196_v46  ;;  %v1555_v35 = vmul.f32 %v4263_v48, %v4196_v46  ;;  %v1190_v32 = vadd.f32 %v1170_v29, %v1105_v31  ;;  %v1244_v34 = vsel %vm1152_vm9, %v1242_v47, %v1243_v63 }
 0x1b6   : > { %v1556_v5 = vmul.f32 %v4263_v48, %v4201_v51  ;;  %v1579_v36 = vmul.f32 %v4266_v23, %v4194_v45  ;;  %v1247_v42 = vsel %vm1152_vm9, %v1245_v1, %v1246_v55  ;;  %v4435_v39 = vadd.f32 %v1244_v34, %v1189_v62 }
 0x1b7   : > { %v1563_v41 = vadd.f32 %v1555_v35, %v1534_v4  ;;  %v1580_v40 = vmul.f32 %v4266_v23, %v4221_v7  ;;  %v4439_v49 = vadd.f32 %v1247_v42, %v1190_v32  ;;  %v1581_v31 = vmul.f32 %v4266_v23, %v4196_v46 }
 0x1b8   : > { %5500 = vst [vmem:[#allocation39_spill] sm:$0xff] %v4435_v39  ;;  %v1564_v56 = vadd.f32 %v1556_v5, %v1535_v0  ;;  %v1582_v47 = vmul.f32 %v4266_v23, %v4223_v8  ;;  %v1615_v63 = vrot.slane %v1579_v36, 1  ;;  %v1656_v1 = vmul.f32 %v4269_v26, %v4196_v46 }
 0x1b9   : > { %5501 = vst [vmem:[#allocation40_spill] sm:$0xff] %v4439_v49  ;;  %v1616_v29 = vrot.slane %v1580_v40, 1  ;;  %v1657_v62 = vmul.f32 %v4269_v26, %v4223_v8  ;;  %v1618_v55 = vrot.slane %v1581_v31, 1  ;;  %v1658_v0 = vmul.f32 %v4269_v26, %v4201_v51  ;;  %v4736_v49 = vld [vmem:[#allocation11 + $0x18] sm:$0xff] }
 0x1ba   : > { %v1619_v35 = vrot.slane %v1582_v47, 1  ;;  %v1659_v34 = vmul.f32 %v4269_v26, %v4225_v9  ;;  %v1692_v5 = vrot.slane %v1656_v1, 1  ;;  %v1077_v6 = vmul.f32 %v4228_v10, %v4196_v46 }
 0x1bb   : > { %v1617_v32 = vsel %vm1152_vm9, %v1615_v63, %v1616_v29  ;;  %v1693_v36 = vrot.slane %v1657_v62, 1  ;;  %v1695_v37 = vrot.slane %v1658_v0, 1  ;;  %v1078_v39 = vmul.f32 %v4228_v10, %v4201_v51 }
 0x1bc   : > { %v1620_v42 = vsel %vm1152_vm9, %v1618_v55, %v1619_v35  ;;  %v1639_v40 = vadd.f32 %v1617_v32, %v1563_v41  ;;  %v1696_v47 = vrot.slane %v1659_v34, 1  ;;  %v1098_v29 = vmul.f32 %v4231_v11, %v4201_v51 }
 0x1bd   : > { %v1640_v4 = vadd.f32 %v1620_v42, %v1564_v56  ;;  %v1694_v31 = vsel %vm1152_vm9, %v1692_v5, %v1693_v36  ;;  %v1099_v1 = vmul.f32 %v4231_v11, %v4233_v12  ;;  %v1132_v41 = vmul.f32 %v4238_v14, %v4196_v46 }
 0x1be   : > { %v4462_v63 = vadd.f32 %v1694_v31, %v1639_v40  ;;  %v1697_v62 = vsel %vm1152_vm9, %v1695_v37, %v1696_v47  ;;  %v1133_v56 = vmul.f32 %v4238_v14, %v4223_v8  ;;  %v1134_v55 = vmul.f32 %v4238_v14, %v4201_v51 }
 0x1bf   : > { %v1135_v10 = vmul.f32 %v4238_v14, %v4225_v9  ;;  %v4477_v35 = vadd.f32 %v1697_v62, %v1640_v4  ;;  %v1106_v0 = vadd.f32 %v1098_v29, %v1077_v6  ;;  %v1107_v32 = vadd.f32 %v1099_v1, %v1078_v39 }
 0x1c0   : > { %5502 = vst [vmem:[#allocation41_spill] sm:$0xff] %v4462_v63  ;;  %v1171_v34 = vrot.slane %v1132_v41, 1  ;;  %v1172_v11 = vrot.slane %v1133_v56, 1  ;;  %v1174_v5 = vrot.slane %v1134_v55, 1  ;;  %v1210_v37 = vmul.f32 %v4241_v15, %v4201_v51 }
 0x1c1   : > { %5503 = vst [vmem:[#allocation42_spill] sm:$0xff] %v4477_v35  ;;  %v1175_v36 = vrot.slane %v1135_v10, 1  ;;  %v1211_v40 = vmul.f32 %v4241_v15, %v4225_v9  ;;  %v1212_v14 = vmul.f32 %v4241_v15, %v4233_v12  ;;  %v1213_v6 = vmul.f32 %v4241_v15, %v4235_v13 }
 0x1c2   : > { %v1173_v39 = vsel %vm1152_vm9, %v1171_v34, %v1172_v11  ;;  %v1248_v31 = vrot.slane %v1210_v37, 1  ;;  %v1536_v47 = vmul.f32 %v4260_v22, %v4201_v51  ;;  %v1537_v55 = vmul.f32 %v4260_v22, %v4233_v12 }
 0x1c3   : > { %v1176_v4 = vsel %vm1152_vm9, %v1174_v5, %v1175_v36  ;;  %v1191_v29 = vadd.f32 %v1173_v39, %v1106_v0  ;;  %v1249_v41 = vrot.slane %v1211_v40, 1  ;;  %v1251_v62 = vrot.slane %v1212_v14, 1 }
 0x1c4   : > { %v1192_v1 = vadd.f32 %v1176_v4, %v1107_v32  ;;  %v1252_v56 = vrot.slane %v1213_v6, 1  ;;  %v1557_v10 = vmul.f32 %v4263_v48, %v4233_v12  ;;  %v1558_v15 = vmul.f32 %v4263_v48, %v4243_v16 }
 0x1c5   : > { %v1250_v34 = vsel %vm1152_vm9, %v1248_v31, %v1249_v41  ;;  %v1583_v11 = vmul.f32 %v4266_v23, %v4201_v51  ;;  %v1584_v0 = vmul.f32 %v4266_v23, %v4225_v9  ;;  %v1585_v32 = vmul.f32 %v4266_v23, %v4233_v12 }
 0x1c6   : > { %v1253_v5 = vsel %vm1152_vm9, %v1251_v62, %v1252_v56  ;;  %v4507_v22 = vadd.f32 %v1250_v34, %v1191_v29  ;;  %v1565_v36 = vadd.f32 %v1557_v10, %v1536_v47  ;;  %v1566_v37 = vadd.f32 %v1558_v15, %v1537_v55 }
 0x1c7   : > { %v4509_v40 = vadd.f32 %v1253_v5, %v1192_v1  ;;  %v1586_v48 = vmul.f32 %v4266_v23, %v4235_v13  ;;  %v1621_v14 = vrot.slane %v1583_v11, 1  ;;  %v1622_v6 = vrot.slane %v1584_v0, 1 }
 0x1c8   : > { %5504 = vst [vmem:[#allocation43_spill] sm:$0xff] %v4507_v22  ;;  %v1624_v39 = vrot.slane %v1585_v32, 1  ;;  %v1660_v4 = vmul.f32 %v4269_v26, %v4233_v12  ;;  %v1661_v31 = vmul.f32 %v4269_v26, %v4235_v13  ;;  %v1662_v29 = vmul.f32 %v4269_v26, %v4243_v16 }
 0x1c9   : > { %5505 = vst [vmem:[#allocation44_spill] sm:$0xff] %v4509_v40  ;;  %v1623_v1 = vsel %vm1152_vm9, %v1621_v14, %v1622_v6  ;;  %v1625_v41 = vrot.slane %v1586_v48, 1  ;;  %v1663_v23 = vmul.f32 %v4269_v26, %v4245_v17  ;;  %v1274_v11 = vmul.f32 %v4248_v18, %v4205_v57 }
 0x1ca   : > { %v1641_v62 = vadd.f32 %v1623_v1, %v1565_v36  ;;  %v1698_v56 = vrot.slane %v1660_v4, 1  ;;  %v1699_v55 = vrot.slane %v1661_v31, 1  ;;  %v1701_v10 = vrot.slane %v1662_v29, 1 }
 0x1cb   : > { %v1626_v15 = vsel %vm1152_vm9, %v1624_v39, %v1625_v41  ;;  %v1702_v34 = vrot.slane %v1663_v23, 1  ;;  %v1275_v0 = vmul.f32 %v4248_v18, %v4216_v2  ;;  %v1276_v48 = vmul.f32 %v4248_v18, %v4207_v58 }
 0x1cc   : > { %v1642_v32 = vadd.f32 %v1626_v15, %v1566_v37  ;;  %v1700_v5 = vsel %vm1152_vm9, %v1698_v56, %v1699_v55  ;;  %v1277_v26 = vmul.f32 %v4248_v18, %v4203_v52  ;;  %v1310_v6 = vmul.f32 %v4251_v19, %v4207_v58 }
 0x1cd   : > { %v1703_v36 = vsel %vm1152_vm9, %v1701_v10, %v1702_v34  ;;  %v4535_v14 = vadd.f32 %v1700_v5, %v1641_v62  ;;  %v1311_v39 = vmul.f32 %v4251_v19, %v4203_v52  ;;  %v1312_v37 = vmul.f32 %v4251_v19, %v4188_v38 }
 0x1ce   : > { %v4541_v4 = vadd.f32 %v1703_v36, %v1642_v32  ;;  %v1313_v31 = vmul.f32 %v4251_v19, %v4209_v59  ;;  %v1346_v29 = vmul.f32 %v4254_v20, %v4205_v57  ;;  %v1326_v1 = vadd.f32 %v1310_v6, %v1274_v11 }
 0x1cf   : > { %5506 = vst [vmem:[#allocation45_spill] sm:$0xff] %v4535_v14  ;;  %v1327_v41 = vadd.f32 %v1311_v39, %v1275_v0  ;;  %v1347_v23 = vmul.f32 %v4254_v20, %v4216_v2  ;;  %v1348_v62 = vmul.f32 %v4254_v20, %v4207_v58  ;;  %v1328_v55 = vadd.f32 %v1312_v37, %v1276_v48 }
 0x1d0   : > { %5507 = vst [vmem:[#allocation46_spill] sm:$0xff] %v4541_v4  ;;  %v1329_v10 = vadd.f32 %v1313_v31, %v1277_v26  ;;  %v1349_v15 = vmul.f32 %v4254_v20, %v4203_v52  ;;  %v1378_v34 = vrot.slane %v1346_v29, 1  ;;  %v1438_v57 = vmul.f32 %v4257_v21, %v4207_v58 }
 0x1d1   : > { %v1379_v32 = vrot.slane %v1347_v23, 1  ;;  %v1381_v5 = vrot.slane %v1348_v62, 1  ;;  %v1439_v2 = vmul.f32 %v4257_v21, %v4203_v52  ;;  %v1440_v0 = vmul.f32 %v4257_v21, %v4188_v38 }
 0x1d2   : > { %v1382_v11 = vrot.slane %v1349_v15, 1  ;;  %v1441_v48 = vmul.f32 %v4257_v21, %v4209_v59  ;;  %v1470_v6 = vrot.slane %v1438_v57, 1  ;;  %v1449_v17 = vmul.f32 %v4257_v21, %v4223_v8 }
 0x1d3   : > { %v1380_v26 = vsel %vm1152_vm9, %v1378_v34, %v1379_v32  ;;  %v1419_v36 = vadd.f32 %v1379_v32, %v1327_v41  ;;  %v1471_v29 = vrot.slane %v1439_v2, 1  ;;  %v1473_v62 = vrot.slane %v1440_v0, 1 }
 0x1d4   : > { %v1383_v39 = vsel %vm1152_vm9, %v1381_v5, %v1382_v11  ;;  %v1418_v37 = vadd.f32 %v1380_v26, %v1326_v1  ;;  %v1421_v31 = vadd.f32 %v1382_v11, %v1329_v10  ;;  %v1474_v15 = vrot.slane %v1441_v48, 1  ;;  %v782_v10 = vld [vmem:[#allocation15 + $0xc] sm:$0xf] }
 0x1d5   : > { %v1420_v23 = vadd.f32 %v1383_v39, %v1328_v55  ;;  %v1472_v56 = vsel %vm1152_vm9, %v1470_v6, %v1471_v29  ;;  %v1511_v47 = vadd.f32 %v1471_v29, %v1419_v36  ;;  %v790_v57 = vmul.f32 %v4199_v50, %v782_v10 }
 0x1d6   : > { %v1475_v42 = vsel %vm1152_vm9, %v1473_v62, %v1474_v15  ;;  %v1510_v14 = vadd.f32 %v1472_v56, %v1418_v37  ;;  %v1513_v4 = vadd.f32 %v1474_v15, %v1421_v31 }
 0x1d7   : > { %v1512_v22 = vadd.f32 %v1475_v42, %v1420_v23  ;;  %v1993_v40 = vrot.slane %v1511_v47, 1  ;;  %v4579_v56 = vrot.slane %v790_v57, %v4183_v25  ;;  %v4582_v42 = vrot.slane %v790_v57, %v4177_v28 }
 0x1d8   : > { %v1992_v34 = vrot.slane %v1510_v14, 1  ;;  %v1996_v41 = vrot.slane %v1513_v4, 1  ;;  %v4596_v4 = vrot.slane %v790_v57, %v4186_v33 }
 0x1d9   : > { %v1995_v32 = vrot.slane %v1512_v22, 1  ;;  %v4585_v22 = vrot.slane %v790_v57, %v4180_v54  ;;  %v1797_v47 = vmul.f32 %v4579_v56, %v4203_v52  ;;  %v1798_v14 = vmul.f32 %v4579_v56, %v4188_v38 }
 0x1da   : > { %v4570_v5 = vsel %vm1152_vm9, %v1992_v34, %v1993_v40  ;;  %v1796_v40 = vmul.f32 %v4579_v56, %v4207_v58  ;;  %v1799_v50 = vmul.f32 %v4579_v56, %v4209_v59  ;;  %v1724_v11 = vmul.f32 %v4582_v42, %v4207_v58 }
 0x1db   : > { %5508 = vst [vmem:[#allocation47_spill] sm:$0xff] %v4570_v5  ;;  %v4573_v1 = vsel %vm1152_vm9, %v1995_v32, %v1996_v41  ;;  %v1725_v2 = vmul.f32 %v4582_v42, %v4203_v52  ;;  %v1726_v0 = vmul.f32 %v4582_v42, %v4188_v38  ;;  %v1727_v48 = vmul.f32 %v4582_v42, %v4209_v59 }
 0x1dc   : > { %5509 = vst [vmem:[#allocation48_spill] sm:$0xff] %v4573_v1  ;;  %v1760_v26 = vmul.f32 %v4585_v22, %v4188_v38  ;;  %v1761_v36 = vmul.f32 %v4585_v22, %v4209_v59  ;;  %v1762_v6 = vmul.f32 %v4585_v22, %v4190_v43  ;;  %v1763_v58 = vmul.f32 %v4585_v22, %v4211_v60 }
 0x1dd   : > { %v1828_v39 = vrot.slane %v1796_v40, 1  ;;  %v1829_v52 = vrot.slane %v1797_v47, 1  ;;  %v1831_v37 = vrot.slane %v1798_v14, 1  ;;  %v1832_v31 = vrot.slane %v1799_v50, 1 }
 0x1de   : > { %v1888_v29 = vmul.f32 %v4596_v4, %v4188_v38  ;;  %v1889_v23 = vmul.f32 %v4596_v4, %v4209_v59  ;;  %v1776_v62 = vadd.f32 %v1760_v26, %v1724_v11  ;;  %v1777_v15 = vadd.f32 %v1761_v36, %v1725_v2 }
 0x1df   : > { %v1890_v34 = vmul.f32 %v4596_v4, %v4190_v43  ;;  %v1891_v41 = vmul.f32 %v4596_v4, %v4211_v60  ;;  %v1778_v32 = vadd.f32 %v1762_v6, %v1726_v0  ;;  %v1779_v10 = vadd.f32 %v1763_v58, %v1727_v48 }
 0x1e0   : > { %v1830_v57 = vsel %vm1152_vm9, %v1828_v39, %v1829_v52  ;;  %v1833_v40 = vsel %vm1152_vm9, %v1831_v37, %v1832_v31  ;;  %v1920_v47 = vrot.slane %v1888_v29, 1  ;;  %v1921_v14 = vrot.slane %v1889_v23, 1 }
 0x1e1   : > { %v1868_v50 = vadd.f32 %v1830_v57, %v1776_v62  ;;  %v1869_v55 = vadd.f32 %v1829_v52, %v1777_v15  ;;  %v1923_v5 = vrot.slane %v1890_v34, 1  ;;  %v1924_v1 = vrot.slane %v1891_v41, 1 }
 0x1e2   : > { %v1870_v11 = vadd.f32 %v1833_v40, %v1778_v32  ;;  %v1871_v2 = vadd.f32 %v1832_v31, %v1779_v10  ;;  %v1922_v26 = vsel %vm1152_vm9, %v1920_v47, %v1921_v14  ;;  %v1278_v6 = vmul.f32 %v4248_v18, %v4188_v38 }
 0x1e3   : > { %v1925_v36 = vsel %vm1152_vm9, %v1923_v5, %v1924_v1  ;;  %v1960_v63 = vadd.f32 %v1922_v26, %v1868_v50  ;;  %v1961_v35 = vadd.f32 %v1921_v14, %v1869_v55  ;;  %v1279_v58 = vmul.f32 %v4248_v18, %v4209_v59  ;;  %v4654_v14 = vld [vmem:[#allocation11 + $0x8] sm:$0xff] }
 0x1e4   : > { %v1962_v0 = vadd.f32 %v1925_v36, %v1870_v11  ;;  %v1963_v48 = vadd.f32 %v1924_v1, %v1871_v2  ;;  %v1280_v39 = vmul.f32 %v4248_v18, %v4190_v43  ;;  %v1281_v52 = vmul.f32 %v4248_v18, %v4211_v60 }
 0x1e5   : > { %v1350_v37 = vmul.f32 %v4254_v20, %v4188_v38  ;;  %v1351_v5 = vmul.f32 %v4254_v20, %v4209_v59  ;;  %v1352_v1 = vmul.f32 %v4254_v20, %v4190_v43  ;;  %v1353_v55 = vmul.f32 %v4254_v20, %v4211_v60 }
 0x1e6   : > { %v2040_v31 = vrot.slane %v1960_v63, 1  ;;  %v2041_v29 = vrot.slane %v1961_v35, 1  ;;  %v1314_v23 = vmul.f32 %v4251_v19, %v4190_v43  ;;  %v1315_v62 = vmul.f32 %v4251_v19, %v4211_v60 }
 0x1e7   : > { %v2043_v15 = vrot.slane %v1962_v0, 1  ;;  %v2044_v34 = vrot.slane %v1963_v48, 1  ;;  %v1316_v38 = vmul.f32 %v4251_v19, %v4192_v44  ;;  %v1317_v59 = vmul.f32 %v4251_v19, %v4218_v3 }
 0x1e8   : > { %v1442_v41 = vmul.f32 %v4257_v21, %v4190_v43  ;;  %v1443_v63 = vmul.f32 %v4257_v21, %v4211_v60  ;;  %v1384_v35 = vrot.slane %v1350_v37, 1  ;;  %v1385_v32 = vrot.slane %v1351_v5, 1 }
 0x1e9   : > { %v1387_v10 = vrot.slane %v1352_v1, 1  ;;  %v1388_v57 = vrot.slane %v1353_v55, 1  ;;  %v1330_v40 = vadd.f32 %v1314_v23, %v1278_v6  ;;  %v1331_v47 = vadd.f32 %v1315_v62, %v1279_v58 }
 0x1ea   : > { %v4657_v50 = vsel %vm1152_vm9, %v2040_v31, %v2041_v29  ;;  %v4660_v11 = vsel %vm1152_vm9, %v2043_v15, %v2044_v34  ;;  %v1332_v2 = vadd.f32 %v1316_v38, %v1280_v39  ;;  %v1333_v26 = vadd.f32 %v1317_v59, %v1281_v52 }
 0x1eb   : > { %5510 = vst [vmem:[#allocation49_spill] sm:$0xff] %v4657_v50  ;;  %5511 = vst [vmem:[#allocation50_spill] sm:$0xff] %v4660_v11  ;;  %v1444_v36 = vmul.f32 %v4257_v21, %v4192_v44  ;;  %v1445_v0 = vmul.f32 %v4257_v21, %v4218_v3  ;;  %v1476_v48 = vrot.slane %v1442_v41, 1  ;;  %v1477_v37 = vrot.slane %v1443_v63, 1 }
 0x1ec   : > { %v1386_v6 = vsel %vm1152_vm9, %v1384_v35, %v1385_v32  ;;  %v1389_v58 = vsel %vm1152_vm9, %v1387_v10, %v1388_v57  ;;  %v2360_v5 = vrot.slane %v4654_v14, %v4177_v28  ;;  %v2374_v1 = vrot.slane %v4654_v14, %v4180_v54 }
 0x1ed   : > { %v1423_v52 = vadd.f32 %v1385_v32, %v1331_v47  ;;  %v2367_v55 = vrot.slane %v4654_v14, %v4183_v25  ;;  %v2381_v31 = vrot.slane %v4654_v14, %v4186_v33  ;;  %v4679_v29 = vsub.s32 4, %v4174_v24 }
 0x1ee   : > { %2362 = vbcast.lane.b32.xlu0 %v2360_v5, 256  ;;  %2376 = vbcast.lane.b32.xlu1 %v2374_v1, 256  ;;  %v4682_v23 = vsub.s32 5, %v4174_v24  ;;  %v1422_v62 = vadd.f32 %v1386_v6, %v1330_v40  ;;  %v1424_v15 = vadd.f32 %v1389_v58, %v1332_v2  ;;  %v1425_v34 = vadd.f32 %v1388_v57, %v1333_v26 }
 0x1ef   : > { %v1478_v38 = vsel %vm1152_vm9, %v1476_v48, %v1477_v37  ;;  %v1479_v59 = vrot.slane %v1444_v36, 1  ;;  %v1480_v41 = vrot.slane %v1445_v0, 1  ;;  %v1729_v63 = vmul.f32 %v4582_v42, %v4211_v60 }
 0x1f0   : > { %v1765_v35 = vmul.f32 %v4585_v22, %v4218_v3  ;;  %v1800_v32 = vmul.f32 %v4579_v56, %v4190_v43  ;;  %v1801_v10 = vmul.f32 %v4579_v56, %v4211_v60  ;;  %v1802_v40 = vmul.f32 %v4579_v56, %v4192_v44 }
 0x1f1   : > { %v1803_v57 = vmul.f32 %v4579_v56, %v4218_v3  ;;  %v2388_v47 = vrot.slane %v4654_v14, %v4679_v29  ;;  %v2395_v2 = vrot.slane %v4654_v14, %v4682_v23  ;;  %v4702_v26 = vsub.s32 6, %v4174_v24 }
 0x1f2   : > { %2369 = vbcast.lane.b32.xlu0 %v2367_v55, 256  ;;  %2383 = vbcast.lane.b32.xlu1 %v2381_v31, 256  ;;  %v4705_v36 = vsub.s32 7, %v4174_v24  ;;  %v4707_v60 = vadd.f32 %v1477_v37, %v1423_v52  ;;  %v1728_v0 = vmul.f32 %v4582_v42, %v4190_v43  ;;  %v1730_v48 = vmul.f32 %v4582_v42, %v4192_v44 }
 0x1f3   : > { %v1731_v6 = vmul.f32 %v4582_v42, %v4218_v3  ;;  %v1764_v58 = vmul.f32 %v4585_v22, %v4192_v44  ;;  %v1766_v5 = vmul.f32 %v4585_v22, %v4194_v45  ;;  %v1767_v24 = vmul.f32 %v4585_v22, %v4221_v7 }
 0x1f4   : > { %v1781_v37 = vadd.f32 %v1765_v35, %v1729_v63  ;;  %v1834_v1 = vrot.slane %v1800_v32, 1  ;;  %v1835_v52 = vrot.slane %v1801_v10, 1  ;;  %v1892_v43 = vmul.f32 %v4596_v4, %v4192_v44 }
 0x1f5   : > { %v1893_v55 = vmul.f32 %v4596_v4, %v4218_v3  ;;  %v1837_v31 = vrot.slane %v1802_v40, 1  ;;  %v1838_v39 = vrot.slane %v1803_v57, 1  ;;  %v2402_v50 = vrot.slane %v4654_v14, %v4702_v26 }
 0x1f6   : > { %2390 = vbcast.lane.b32.xlu0 %v2388_v47, 256  ;;  %2397 = vbcast.lane.b32.xlu1 %v2395_v2, 256  ;;  %v2409_v11 = vrot.slane %v4654_v14, %v4705_v36  ;;  %v1481_v63 = vsel %vm1152_vm9, %v1479_v59, %v1480_v41  ;;  %v4730_v35 = vadd.f32 %v1478_v38, %v1422_v62  ;;  %v1926_v30 = vrot.slane %v1892_v43, 1 }
 0x1f7   : > { %v4732_v32 = vadd.f32 %v1480_v41, %v1425_v34  ;;  %v1894_v10 = vmul.f32 %v4596_v4, %v4194_v45  ;;  %v1780_v40 = vadd.f32 %v1764_v58, %v1728_v0  ;;  %v1782_v57 = vadd.f32 %v1766_v5, %v1730_v48 }
 0x1f8   : > { %v1783_v47 = vadd.f32 %v1767_v24, %v1731_v6  ;;  %v1895_v2 = vmul.f32 %v4596_v4, %v4221_v7  ;;  %v1836_v27 = vsel %vm1152_vm9, %v1834_v1, %v1835_v52  ;;  %v1873_v14 = vadd.f32 %v1835_v52, %v1781_v37 }
 0x1f9   : > { %v1927_v59 = vrot.slane %v1893_v55, 1  ;;  %v1839_v62 = vsel %vm1152_vm9, %v1837_v31, %v1838_v39  ;;  %v2472_v34 = vrot.slane %v4736_v49, %v4177_v28  ;;  %v2479_v38 = vrot.slane %v4736_v49, %v4183_v25 }
 0x1fa   : > { %2404 = vbcast.lane.b32.xlu0 %v2402_v50, 256  ;;  %2411 = vbcast.lane.b32.xlu1 %v2409_v11, 256  ;;  %v4746_v41 = vadd.f32 %v1481_v63, %v1424_v15  ;;  %v1998_v0 = vrot.slane %v4730_v35, 1  ;;  %v1999_v48 = vrot.slane %v4707_v60, 1  ;;  %v1929_v6 = vrot.slane %v1894_v10, 1 }
 0x1fb   : > { %v1872_v58 = vadd.f32 %v1836_v27, %v1780_v40  ;;  %v1875_v5 = vadd.f32 %v1838_v39, %v1783_v47  ;;  %v1354_v24 = vmul.f32 %v4254_v20, %v4192_v44  ;;  %v1355_v50 = vmul.f32 %v4254_v20, %v4218_v3 }
 0x1fc   : > { %v1874_v11 = vadd.f32 %v1839_v62, %v1782_v57  ;;  %v1928_v37 = vsel %vm1152_vm9, %v1926_v30, %v1927_v59  ;;  %v4755_v1 = vadd.f32 %v1927_v59, %v1873_v14  ;;  %v1356_v15 = vmul.f32 %v4254_v20, %v4194_v45 }
 0x1fd   : > { %v1930_v52 = vrot.slane %v1895_v2, 1  ;;  %v1357_v60 = vmul.f32 %v4254_v20, %v4221_v7  ;;  %v2486_v27 = vrot.slane %v4736_v49, %v4180_v54  ;;  %v2493_v39 = vrot.slane %v4736_v49, %v4186_v33 }
 0x1fe   : > { %2474 = vbcast.lane.b32.xlu0 %v2472_v34, 256  ;;  %2481 = vbcast.lane.b32.xlu1 %v2479_v38, 256  ;;  %v1282_v30 = vmul.f32 %v4248_v18, %v4192_v44  ;;  %v1283_v43 = vmul.f32 %v4248_v18, %v4218_v3  ;;  %v1318_v55 = vmul.f32 %v4251_v19, %v4194_v45  ;;  %v1390_v10 = vrot.slane %v1354_v24, 1 }
 0x1ff   : > { %v1319_v31 = vmul.f32 %v4251_v19, %v4221_v7  ;;  %v1284_v63 = vmul.f32 %v4248_v18, %v4194_v45  ;;  %v1320_v35 = vmul.f32 %v4251_v19, %v4196_v46  ;;  %v1391_v40 = vrot.slane %v1355_v50, 1 }
 0x200   : > { %v1285_v44 = vmul.f32 %v4248_v18, %v4221_v7  ;;  %v1321_v3 = vmul.f32 %v4251_v19, %v4223_v8  ;;  %v1446_v57 = vmul.f32 %v4257_v21, %v4194_v45  ;;  %v1447_v47 = vmul.f32 %v4257_v21, %v4221_v7 }
 0x201   : > { %v1393_v2 = vrot.slane %v1356_v15, 1  ;;  %v1394_v14 = vrot.slane %v1357_v60, 1  ;;  %v2500_v59 = vrot.slane %v4736_v49, %v4679_v29  ;;  %v2507_v62 = vrot.slane %v4736_v49, %v4682_v23 }
 0x202   : > { %2488 = vbcast.lane.b32.xlu0 %v2486_v27, 256  ;;  %2495 = vbcast.lane.b32.xlu1 %v2493_v39, 256  ;;  %v1931_v34 = vsel %vm1152_vm9, %v1929_v6, %v1930_v52  ;;  %v4790_v38 = vadd.f32 %v1928_v37, %v1872_v58  ;;  %v1334_v24 = vadd.f32 %v1318_v55, %v1282_v30  ;;  %v1482_v16 = vrot.slane %v1446_v57, 1  ;;  %v4810_v55 = vld [vmem:[#allocation11] sm:$0xff] }
 0x203   : > { %v1335_v50 = vadd.f32 %v1319_v31, %v1283_v43  ;;  %v4792_v53 = vadd.f32 %v1931_v34, %v1874_v11  ;;  %v4794_v61 = vadd.f32 %v1930_v52, %v1875_v5  ;;  %v1336_v15 = vadd.f32 %v1320_v35, %v1284_v63 }
 0x204   : > { %v1392_v60 = vsel %vm1152_vm9, %v1390_v10, %v1391_v40  ;;  %v1337_v27 = vadd.f32 %v1321_v3, %v1285_v44  ;;  %v1448_v39 = vmul.f32 %v4257_v21, %v4196_v46  ;;  %v1395_v6 = vsel %vm1152_vm9, %v1393_v2, %v1394_v14 }
 0x205   : > { %v1483_v58 = vrot.slane %v1447_v47, 1  ;;  %v2514_v5 = vrot.slane %v4736_v49, %v4702_v26  ;;  %v2521_v11 = vrot.slane %v4736_v49, %v4705_v36  ;;  %v4807_v37 = vsel %vm1152_vm9, %v1998_v0, %v1999_v48 }
 0x206   : > { %2502 = vbcast.lane.b32.xlu0 %v2500_v59, 256  ;;  %2509 = vbcast.lane.b32.xlu1 %v2507_v62, 256  ;;  %v2002_v52 = vrot.slane %v4732_v32, 1  ;;  %v1426_v30 = vadd.f32 %v1392_v60, %v1334_v24  ;;  %v1427_v43 = vadd.f32 %v1391_v40, %v1335_v50  ;;  %v2001_v31 = vrot.slane %v4746_v41, 1 }
 0x207   : > { %v2047_v35 = vrot.slane %v4755_v1, 1  ;;  %v1428_v44 = vadd.f32 %v1395_v6, %v1336_v15  ;;  %v1429_v3 = vadd.f32 %v1394_v14, %v1337_v27  ;;  %v1485_v49 = vrot.slane %v1448_v39, 1 }
 0x208   : > { %v1486_v57 = vrot.slane %v1449_v17, 1  ;;  %v1484_v48 = vsel %vm1152_vm9, %v1482_v16, %v1483_v58  ;;  %v2304_v40 = vrot.slane %v4810_v55, %v4177_v28  ;;  %v2311_v47 = vrot.slane %v4810_v55, %v4183_v25 }
 0x209   : > { %v1518_v2 = vadd.f32 %v1484_v48, %v1426_v30  ;;  %v1519_v59 = vadd.f32 %v1483_v58, %v1427_v43  ;;  %v1804_v62 = vmul.f32 %v4579_v56, %v4194_v45  ;;  %v1805_v17 = vmul.f32 %v4579_v56, %v4221_v7 }
 0x20a   : > { %2516 = vbcast.lane.b32.xlu0 %v2514_v5, 256  ;;  %2523 = vbcast.lane.b32.xlu1 %v2521_v11, 256  ;;  %v1732_v14 = vmul.f32 %v4582_v42, %v4194_v45  ;;  %v1733_v16 = vmul.f32 %v4582_v42, %v4221_v7  ;;  %v1734_v34 = vmul.f32 %v4582_v42, %v4196_v46 }
 0x20b   : > { %v1769_v24 = vmul.f32 %v4585_v22, %v4223_v8  ;;  %v1487_v15 = vsel %vm1152_vm9, %v1485_v49, %v1486_v57  ;;  %v1521_v60 = vadd.f32 %v1486_v57, %v1429_v3  ;;  %v1806_v27 = vmul.f32 %v4579_v56, %v4196_v46 }
 0x20c   : > { %v1807_v39 = vmul.f32 %v4579_v56, %v4223_v8  ;;  %v1768_v7 = vmul.f32 %v4585_v22, %v4196_v46  ;;  %v2318_v6 = vrot.slane %v4810_v55, %v4180_v54  ;;  %v2325_v58 = vrot.slane %v4810_v55, %v4186_v33 }
 0x20d   : > { %v1735_v11 = vmul.f32 %v4582_v42, %v4223_v8  ;;  %v1771_v30 = vmul.f32 %v4585_v22, %v4225_v9  ;;  %v1840_v43 = vrot.slane %v1804_v62, 1  ;;  %v1841_v3 = vrot.slane %v1805_v17, 1 }
 0x20e   : > { %2306 = vbcast.lane.b32.xlu0 %v2304_v40, 256  ;;  %2313 = vbcast.lane.b32.xlu1 %v2311_v47, 256  ;;  %v1520_v49 = vadd.f32 %v1487_v15, %v1428_v44  ;;  %v1770_v57 = vmul.f32 %v4585_v22, %v4201_v51  ;;  %v1785_v48 = vadd.f32 %v1769_v24, %v1733_v16  ;;  %v1843_v40 = vrot.slane %v1806_v27, 1 }
 0x20f   : > { %v1844_v47 = vrot.slane %v1807_v39, 1  ;;  %v2005_v0 = vrot.slane %v1519_v59, 1  ;;  %v1784_v10 = vadd.f32 %v1768_v7, %v1732_v14  ;;  %v2332_v62 = vrot.slane %v4810_v55, %v4679_v29 }
 0x210   : > { %v2339_v44 = vrot.slane %v4810_v55, %v4682_v23  ;;  %v2004_v17 = vrot.slane %v1518_v2, 1  ;;  %v2008_v16 = vrot.slane %v1521_v60, 1  ;;  %v1787_v24 = vadd.f32 %v1771_v30, %v1735_v11 }
 0x211   : > { %v1842_v15 = vsel %vm1152_vm9, %v1840_v43, %v1841_v3  ;;  %v2007_v27 = vrot.slane %v1520_v49, 1  ;;  %v1786_v39 = vadd.f32 %v1770_v57, %v1734_v34  ;;  %v1899_v59 = vmul.f32 %v4596_v4, %v4225_v9 }
 0x212   : > { %2320 = vbcast.lane.b32.xlu0 %v2318_v6, 256  ;;  %2327 = vbcast.lane.b32.xlu1 %v2325_v58, 256  ;;  %v1845_v14 = vsel %vm1152_vm9, %v1843_v40, %v1844_v47  ;;  %v1877_v7 = vadd.f32 %v1841_v3, %v1785_v48  ;;  %v1876_v63 = vadd.f32 %v1842_v15, %v1784_v10  ;;  %v5512_v11 = vrot.slane %v4790_v38, 1  ;;  %v4890_v3 = vld [vmem:[#allocation11 + $0x10] sm:$0xff] }
 0x213   : > { %v2346_v2 = vrot.slane %v4810_v55, %v4702_v26  ;;  %v2353_v34 = vrot.slane %v4810_v55, %v4705_v36  ;;  %v4874_v60 = vsel %vm1152_vm9, %v2001_v31, %v2002_v52  ;;  %v5513_v30 = vrot.slane %v4794_v61, 1 }
 0x214   : > { %v4881_v10 = vsel %vm1152_vm9, %v5512_v11, %v2047_v35  ;;  %v5514_v43 = vrot.slane %v4792_v53, 1  ;;  %v1879_v32 = vadd.f32 %v1844_v47, %v1787_v24  ;;  %v4893_v41 = vsel %vm1152_vm9, %v2004_v17, %v2005_v0  ;;  %v791_v17 = vld [vmem:[%s5400_s9] sm:$0xff] }
 0x215   : > { %v4896_v1 = vsel %vm1152_vm9, %v2007_v27, %v2008_v16  ;;  %v1936_v52 = vrot.slane %v1899_v59, 1  ;;  %v1878_v31 = vadd.f32 %v1845_v14, %v1786_v39  ;;  %v1286_v53 = vmul.f32 %v4248_v18, %v4196_v46  ;;  %v792_v16 = vld [vmem:[%s5400_s9 + $0x8] sm:$0xff] }
 0x216   : > { %2334 = vbcast.lane.b32.xlu0 %v2332_v62, 256  ;;  %2341 = vbcast.lane.b32.xlu1 %v2339_v44, 256  ;;  %v4888_v55 = vsel %vm1152_vm9, %v5514_v43, %v5513_v30  ;;  %v2416_v0 = vrot.slane %v4890_v3, %v4177_v28  ;;  %v2423_v57 = vrot.slane %v4890_v3, %v4183_v25 }
 0x217   : > { %v4909_v48 = vadd.f32 %v1936_v52, %v1879_v32  ;;  %v1287_v40 = vmul.f32 %v4248_v18, %v4223_v8  ;;  %v1322_v47 = vmul.f32 %v4251_v19, %v4201_v51  ;;  %v1289_v62 = vmul.f32 %v4248_v18, %v4225_v9 }
 0x218   : > { %v1324_v25 = vmul.f32 %v4251_v19, %v4233_v12  ;;  %v1325_v27 = vmul.f32 %v4251_v19, %v4235_v13  ;;  %v2430_v59 = vrot.slane %v4890_v3, %v4180_v54  ;;  %v2437_v14 = vrot.slane %v4890_v3, %v4186_v33 }
 0x219   : > { %v1360_v54 = vmul.f32 %v4254_v20, %v4201_v51  ;;  %v1361_v33 = vmul.f32 %v4254_v20, %v4225_v9  ;;  %v4960_v11 = vmul.f32 %v4257_v21, %v4201_v51  ;;  %v4964_v30 = vmul.f32 %v4257_v21, %v4225_v9 }
 0x21a   : > { %2348 = vbcast.lane.b32.xlu0 %v2346_v2, 256  ;;  %2355 = vbcast.lane.b32.xlu1 %v2353_v34, 256  ;;  %v1341_v34 = vadd.f32 %v1325_v27, %v1289_v62  ;;  %v2444_v32 = vrot.slane %v4890_v3, %v4679_v29  ;;  %v1809_v29 = vmul.f32 %v4579_v56, %v4225_v9  ;;  %v5515_v62 = vld [vmem:[#allocation33_spill] sm:$0xff] }
 0x21b   : > { %v5521_v27 = vld [vmem:[#allocation37_spill] sm:$0xff] }
 0x21e   : > { %2418 = vbcast.lane.b32.xlu0 %v2416_v0, 256  ;;  %2425 = vbcast.lane.b32.xlu1 %v2423_v57, 256  ;;  %v1811_v0 = vmul.f32 %v4579_v56, %v4235_v13  ;;  %v1400_v57 = vrot.slane %v1361_v33, 1 }
 0x222   : > { %2432 = vbcast.lane.b32.xlu0 %v2430_v59, 256  ;;  %2439 = vbcast.lane.b32.xlu1 %v2437_v14, 256  ;;  %v1850_v59 = vrot.slane %v1811_v0, 1  ;;  %v5523_v14 = vld [vmem:[#allocation40_spill] sm:$0xff] }
 0x226   : > { %2446 = vbcast.lane.b32.xlu0 %v2444_v32, 256  ;;  %v1488_v32 = vrot.slane %v4960_v11, 1 }
 0x24b   : > { %v774_v50 = vpop.f32.mrf.mxu1 }
 0x24c   : > { %v775_v45 = vadd.f32 1e-08, %v774_v50  ;;  %v1896_v50 = vmul.f32 %v4596_v4, %v4196_v46 }
 0x24d   : > { %v3216_v5 = vpop.f32.mrf.mxu1 }
 0x24e   : > { %3390 = vrsqrt.f32 %v775_v45  ;;  %v1897_v5 = vmul.f32 %v4596_v4, %v4223_v8  ;;  %v1898_v45 = vmul.f32 %v4596_v4, %v4201_v51  ;;  %v1932_v6 = vrot.slane %v1896_v50, 1 }
 0x250   : > { %v1933_v58 = vrot.slane %v1897_v5, 1  ;;  %v1935_v38 = vrot.slane %v1898_v45, 1  ;;  %v1288_v5 = vmul.f32 %v4248_v18, %v4201_v51  ;;  %v1358_v18 = vmul.f32 %v4254_v20, %v4196_v46 }
 0x251   : > { %v4950_v46 = vmul.f32 %v4254_v20, %v4223_v8 }
 0x252   : > { %v1934_v35 = vsel %vm1152_vm9, %v1932_v6, %v1933_v58  ;;  %v4899_v61 = vadd.f32 %v1933_v58, %v1877_v7  ;;  %v1937_v50 = vsel %vm1152_vm9, %v1935_v38, %v1936_v52  ;;  %v2056_v7 = vrot.slane %v4909_v48, 1 }
 0x253   : > { %v4903_v49 = vadd.f32 %v1934_v35, %v1876_v63  ;;  %v1323_v63 = vmul.f32 %v4251_v19, %v4225_v9  ;;  %v4930_v24 = vadd.f32 %v1937_v50, %v1878_v31  ;;  %v4944_v6 = vadd.f32 %v1322_v47, %v1286_v53 }
 0x254   : > { %v2053_v15 = vrot.slane %v4899_v61, 1  ;;  %v4952_v2 = vadd.f32 %v1324_v25, %v1288_v5  ;;  %v1396_v43 = vrot.slane %v1358_v18, 1  ;;  %v2451_v38 = vrot.slane %v4890_v3, %v4682_v23 }
 0x255   : > { %v2052_v45 = vrot.slane %v4903_v49, 1  ;;  %v4946_v19 = vadd.f32 %v1323_v63, %v1287_v40  ;;  %v1397_v20 = vrot.slane %v4950_v46, 1  ;;  %v4973_v52 = vmul.f32 %v4257_v21, %v4233_v12  ;;  %v5524_v46 = vld [vmem:[#allocation39_spill] sm:$0xff] }
 0x256   : > { %v4977_v31 = vmul.f32 %v4257_v21, %v4235_v13  ;;  %v1808_v35 = vmul.f32 %v4579_v56, %v4201_v51  ;;  %v1399_v53 = vrot.slane %v1360_v54, 1  ;;  %v1810_v23 = vmul.f32 %v4579_v56, %v4233_v12  ;;  %2453 = vbcast.lane.b32.xlu1 %v2451_v38, 256 }
 0x257   : > { %v1736_v21 = vmul.f32 %v4582_v42, %v4201_v51  ;;  %v1737_v40 = vmul.f32 %v4582_v42, %v4225_v9  ;;  %v1738_v47 = vmul.f32 %v4582_v42, %v4233_v12  ;;  %v2055_v63 = vrot.slane %v4930_v24, 1 }
 0x258   : > { %v1739_v50 = vmul.f32 %v4582_v42, %v4235_v13  ;;  %v2458_v56 = vrot.slane %v4890_v3, %v4702_v26  ;;  %v2465_v5 = vrot.slane %v4890_v3, %v4705_v36  ;;  %v1772_v51 = vmul.f32 %v4585_v22, %v4233_v12  ;;  %v5520_v26 = vld [vmem:[#allocation38_spill] sm:$0xff] }
 0x259   : > { %v1773_v9 = vmul.f32 %v4585_v22, %v4235_v13  ;;  %v1774_v25 = vmul.f32 %v4585_v22, %v5515_v62  ;;  %v5522_v36 = vpack.c.bf16 %v5520_v26, %v5521_v27  ;;  %v1846_v3 = vrot.slane %v1808_v35, 1 }
 0x25a   : > { %v1847_v18 = vrot.slane %v1809_v29, 1  ;;  %v1398_v33 = vsel %vm1152_vm9, %v1396_v43, %v1397_v20  ;;  %v1900_v38 = vmul.f32 %v4596_v4, %v4233_v12  ;;  %v1489_v35 = vrot.slane %v4964_v30, 1  ;;  %2460 = vbcast.lane.b32.xlu0 %v2458_v56, 256  ;;  %2467 = vbcast.lane.b32.xlu1 %v2465_v5, 256 }
 0x25b   : > { %v3391_v44 = vpop.eup %3390  ;;  %v1901_v29 = vmul.f32 %v4596_v4, %v4235_v13  ;;  %v1788_v43 = vadd.f32 %v1772_v51, %v1736_v21  ;;  %v1433_v12 = vadd.f32 %v1400_v57, %v1341_v34  ;;  %v1430_v13 = vadd.f32 %v1398_v33, %v4944_v6  ;;  %v5532_v6 = vld [vmem:[#allocation46_spill] sm:$0xff] }
 0x25c   : > { %v796_v39 = vrot.slane %v3391_v44, %v4177_v28  ;;  %v5516_v44 = vld [vmem:[#allocation34_spill] sm:$0xff]  ;;  %v1848_v30 = vsel %vm1152_vm9, %v1846_v3, %v1847_v18  ;;  %v1491_v26 = vrot.slane %v4973_v52, 1  ;;  %v1938_v56 = vrot.slane %v1900_v38, 1  ;;  %v5539_v3 = vld [vmem:[#allocation49_spill] sm:$0xff] }
 0x25d   : > { %v1775_v42 = vmul.f32 %v4585_v22, %v5516_v44  ;;  %v5526_v22 = vld [vmem:[#allocation42_spill] sm:$0xff]  ;;  %v1903_v0 = vmul.f32 %v4596_v4, %v5516_v44  ;;  %v1939_v21 = vrot.slane %v1901_v29, 1  ;;  %v2054_v52 = vsel %vm1152_vm9, %v2052_v45, %v2053_v15  ;;  %v5535_v44 = vld [vmem:[#allocation48_spill] sm:$0xff] }
 0x25e   : > { %v797_v28 = vmul.f32 %v796_v39, %v791_v17  ;;  %v798_v58 = vmul.f32 %v796_v39, %v792_v16  ;;  %v5517_v17 = vld [vmem:[#allocation36_spill] sm:$0xff]  ;;  %v5518_v16 = vld [vmem:[#allocation35_spill] sm:$0xff]  ;;  %v1849_v39 = vrot.slane %v1810_v23, 1  ;;  %v1902_v23 = vmul.f32 %v4596_v4, %v5515_v62 }
 0x25f   : > { %v5519_v24 = vpack.c.bf16 %v5517_v17, %v5518_v16  ;;  %v1790_v17 = vadd.f32 %v1774_v25, %v1738_v47  ;;  %v1791_v11 = vadd.f32 %v1775_v42, %v1739_v50  ;;  %v1431_v16 = vadd.f32 %v1397_v20, %v4946_v19  ;;  %v5529_v20 = vld [vmem:[#allocation44_spill] sm:$0xff]  ;;  %v5536_v42 = vld [vmem:[#allocation47_spill] sm:$0xff] }
 0x260   : > { %v799_v8 = vpack.c.bf16 %v798_v58, %v797_v28  ;;  %v5525_v28 = vpack.c.bf16 %v5523_v14, %v5524_v46  ;;  %v5527_v58 = vld [vmem:[#allocation41_spill] sm:$0xff]  ;;  %v1492_v4 = vrot.slane %v4977_v31, 1  ;;  %v1942_v47 = vrot.slane %v1903_v0, 1 }
 0x261   : > { %v5528_v54 = vpack.c.bf16 %v5526_v22, %v5527_v58  ;;  %v1880_v50 = vadd.f32 %v1848_v30, %v1788_v43  ;;  %v1883_v34 = vadd.f32 %v1850_v59, %v1791_v11  ;;  %v2057_v31 = vsel %vm1152_vm9, %v2055_v63, %v2056_v7  ;;  %v5087_v43 = vpop.permute.xlu0 %2362 }
 0x262   : > { %3217 = vmatprep.subr.bf16.mxu0 %v799_v8  ;;  %3251 = vmatprep.subr.bf16.mxu1 %v799_v8  ;;  %v1490_v25 = vsel %vm1152_vm9, %v1488_v32, %v1489_v35  ;;  %v5537_v27 = vpack.c.bf16 %v5535_v44, %v5536_v42  ;;  %v1493_v61 = vsel %vm1152_vm9, %v1491_v26, %v1492_v4  ;;  %v5122_v42 = vld [vmem:[%s5541_s16] ss:$0 sm:$0xff] }
 0x263   : > { %3218 = vmatpush3.bf16.msra.mxu0 %v799_v8  ;;  %3252 = vmatpush3.bf16.msra.mxu1 %v799_v8  ;;  %v1401_v8 = vsel %vm1152_vm9, %v1399_v53, %v1400_v57  ;;  %v1789_v53 = vadd.f32 %v1773_v9, %v1737_v40  ;;  %v1941_v40 = vrot.slane %v1902_v23, 1  ;;  %v5530_v57 = vld [vmem:[#allocation43_spill] sm:$0xff]  ;;  %v5533_v9 = vld [vmem:[#allocation45_spill] sm:$0xff]  ;;  %v1522_v49 = vadd.f32 %v1490_v25, %v1430_v13 }
 0x264   : > { %v1432_v62 = vadd.f32 %v1401_v8, %v4952_v2  ;;  %v5531_v51 = vpack.c.bf16 %v5529_v20, %v5530_v57  ;;  %v5534_v2 = vpack.c.bf16 %v5532_v6, %v5533_v9  ;;  %v1523_v15 = vadd.f32 %v1489_v35, %v1431_v16 }
 0x265   : > { %v1881_v5 = vadd.f32 %v1847_v18, %v1789_v53  ;;  %v1525_v48 = vadd.f32 %v1492_v4, %v1433_v12  ;;  %v1940_v7 = vsel %vm1152_vm9, %v1938_v56, %v1939_v21  ;;  %v1943_v63 = vsel %vm1152_vm9, %v1941_v40, %v1942_v47  ;;  %v5089_v53 = vpop.permute.xlu1 %2376 }
 0x266   : > { %3220 = vmatmul.mubr.msk.bf16.vlgmr.msra.gmra.mxu0 %vm628_vm1, %v5519_v24  ;;  %3236 = vmatmul.mubr.msk.bf16.vlgmr.msra.gmra.mxu1 %vm628_vm1, %v5522_v36  ;;  %v1851_v24 = vsel %vm1152_vm9, %v1849_v39, %v1850_v59  ;;  %v5538_v36 = vld [vmem:[#allocation50_spill] sm:$0xff]  ;;  %v1524_v45 = vadd.f32 %v1493_v61, %v1432_v62  ;;  %v1972_v39 = vadd.f32 %v1940_v7, %v1880_v50  ;;  %v2010_v33 = vrot.slane %v1522_v49, 1 }
 0x267   : > { %3223 = vmatprep.mubr.msk.bf16.mxu0 %vm628_vm1, %v5525_v28  ;;  %3239 = vmatprep.mubr.msk.bf16.mxu1 %vm628_vm1, %v5528_v54  ;;  %v1882_v19 = vadd.f32 %v1851_v24, %v1790_v17  ;;  %v5540_v18 = vpack.c.bf16 %v5538_v36, %v5539_v3  ;;  %v1973_v59 = vadd.f32 %v1939_v21, %v1881_v5  ;;  %v2011_v8 = vrot.slane %v1523_v15, 1  ;;  %v5091_v17 = vpop.permute.xlu0 %2369 }
 0x268   : > { %v1975_v46 = vadd.f32 %v1942_v47, %v1883_v34  ;;  %v2077_v28 = vpack.c.bf16 %v4874_v60, %v4807_v37  ;;  %v2085_v22 = vpack.c.bf16 %v4888_v55, %v4881_v10  ;;  %v2078_v58 = vpack.c.bf16 %v4896_v1, %v4893_v41 }
 0x269   : > { %v1974_v14 = vadd.f32 %v1943_v63, %v1882_v19  ;;  %v2086_v54 = vpack.c.bf16 %v2057_v31, %v2054_v52  ;;  %v2013_v32 = vrot.slane %v1524_v45, 1  ;;  %v2014_v38 = vrot.slane %v1525_v48, 1  ;;  %v5093_v11 = vpop.permute.xlu1 %2383 }
 0x26a   : > { %v2058_v35 = vrot.slane %v1972_v39, 1  ;;  %v2059_v29 = vrot.slane %v1973_v59, 1  ;;  %v2062_v0 = vrot.slane %v1975_v46, 1  ;;  %v2012_v37 = vsel %vm1152_vm9, %v2010_v33, %v2011_v8 }
 0x26b   : > { %v2061_v23 = vrot.slane %v1974_v14, 1  ;;  %v2015_v60 = vsel %vm1152_vm9, %v2013_v32, %v2014_v38  ;;  %v5095_v16 = vpop.permute.xlu0 %2390 }
 0x26c   : > { %v2060_v10 = vsel %vm1152_vm9, %v2058_v35, %v2059_v29  ;;  %v2079_v41 = vpack.c.bf16 %v2015_v60, %v2012_v37 }
 0x26d   : > { %v2063_v55 = vsel %vm1152_vm9, %v2061_v23, %v2062_v0  ;;  %v5097_v12 = vpop.permute.xlu1 %2397 }
 0x26e   : > { %3224 = vmatmul.mubr.msk.bf16.gmra.mxu0 %vm628_vm1, %v5531_v51  ;;  %3240 = vmatmul.mubr.msk.bf16.gmra.mxu1 %vm628_vm1, %v5534_v2  ;;  %v2087_v1 = vpack.c.bf16 %v2063_v55, %v2060_v10 }
 0x26f   : > { %3227 = vmatprep.mubr.msk.bf16.mxu0 %vm628_vm1, %v5537_v27  ;;  %3243 = vmatprep.mubr.msk.bf16.mxu1 %vm628_vm1, %v5540_v18  ;;  %v5099_v30 = vpop.permute.xlu0 %2404 }
 0x271   : > { %v5101_v24 = vpop.permute.xlu1 %2411 }
 0x273   : > { %v5103_v13 = vpop.permute.xlu0 %2474 }
 0x275   : > { %v5105_v62 = vpop.permute.xlu1 %2481 }
 0x276   : > { %3228 = vmatmul.mubr.msk.bf16.gmra.mxu0 %vm628_vm1, %v2077_v28  ;;  %3244 = vmatmul.mubr.msk.bf16.gmra.mxu1 %vm628_vm1, %v2085_v22 }
 0x277   : > { %3231 = vmatprep.mubr.msk.bf16.mxu0 %vm628_vm1, %v2078_v58  ;;  %3247 = vmatprep.mubr.msk.bf16.mxu1 %vm628_vm1, %v2086_v54  ;;  %v5107_v26 = vpop.permute.xlu0 %2488 }
 0x279   : > { %v5109_v4 = vpop.permute.xlu1 %2495 }
 0x27b   : > { %v5111_v56 = vpop.permute.xlu0 %2502 }
 0x27d   : > { %v5113_v21 = vpop.permute.xlu1 %2509 }
 0x27e   : > { %3232 = vmatmul.mubr.msk.bf16.gmra.mxu0 %vm628_vm1, %v2079_v41  ;;  %3248 = vmatmul.mubr.msk.bf16.gmra.mxu1 %vm628_vm1, %v2087_v1 }
 0x27f   : > { %v5115_v40 = vpop.permute.xlu0 %2516 }
 0x281   : > { %v5117_v47 = vpop.permute.xlu1 %2523 }
 0x283   : > { %v2307_v50 = vpop.permute.xlu0 %2306 }
 0x285   : > { %v2314_v5 = vpop.permute.xlu1 %2313 }
 0x287   : > { %v2321_v19 = vpop.permute.xlu0 %2320 }
 0x289   : > { %v2328_v34 = vpop.permute.xlu1 %2327 }
 0x28b   : > { %v2335_v20 = vpop.permute.xlu0 %2334 }
 0x28d   : > { %v2342_v57 = vpop.permute.xlu1 %2341 }
 0x28f   : > { %v2349_v51 = vpop.permute.xlu0 %2348 }
 0x291   : > { %v2356_v6 = vpop.permute.xlu1 %2355 }
 0x293   : > { %v2419_v9 = vpop.permute.xlu0 %2418 }
 0x295   : > { %v2426_v2 = vpop.permute.xlu1 %2425 }
 0x297   : > { %v2433_v52 = vpop.permute.xlu0 %2432 }
 0x299   : > { %v2440_v31 = vpop.permute.xlu1 %2439 }
 0x29b   : > { %v2447_v25 = vpop.permute.xlu0 %2446 }
 0x2c8   : > { %v2454_v7 = vpop.permute.xlu1 %2453 }
 0x2cc   : > { %v2461_v46 = vpop.permute.xlu0 %2460  ;;  %v2468_v10 = vpop.permute.xlu1 %2467 }
 0x326   : > { %v3221_v44 = vpop.f32.mrf.mxu0  ;;  %v3237_v27 = vpop.f32.mrf.mxu1 }
 0x327   : > { %v2527_v36 = vadd.f32 %v3221_v44, %v2321_v19  ;;  %v2543_v3 = vadd.f32 %v3237_v27, %v2433_v52 }
 0x328   : > { %v2170_v18 = vpop.f32.mrf.mxu0  ;;  %v2234_v61 = vpop.f32.mrf.mxu1 }
 0x329   : > { %v5125_v49 = vadd.f32 %v5122_v42, %v2527_v36  ;;  %v5128_v15 = vadd.f32 %v5122_v42, %v2543_v3  ;;  %v2525_v45 = vadd.f32 %v2307_v50, %v2170_v18  ;;  %v2541_v48 = vadd.f32 %v2419_v9, %v2234_v61 }
 0x32a   : > { %v3222_v63 = vpop.f32.mrf.mxu0  ;;  %v3238_v39 = vpop.f32.mrf.mxu1 }
 0x32b   : > { %v5131_v59 = vadd.f32 %v5122_v42, %v2525_v45  ;;  %v5134_v14 = vadd.f32 %v5122_v42, %v2541_v48  ;;  %v2528_v28 = vadd.f32 %v3222_v63, %v2328_v34  ;;  %v2544_v22 = vadd.f32 %v3238_v39, %v2440_v31 }
 0x32c   : > { %v2173_v58 = vpop.f32.mrf.mxu0  ;;  %v2237_v54 = vpop.f32.mrf.mxu1 }
 0x32d   : > { %v2526_v33 = vadd.f32 %v2314_v5, %v2173_v58  ;;  %v2542_v8 = vadd.f32 %v2426_v2, %v2237_v54  ;;  %v5137_v32 = vadd.f32 %v5122_v42, %v2528_v28  ;;  %v5140_v38 = vadd.f32 %v5122_v42, %v2544_v22 }
 0x32e   : > { %v3225_v35 = vpop.f32.mrf.mxu0  ;;  %v3241_v29 = vpop.f32.mrf.mxu1 }
 0x32f   : > { %v5143_v23 = vadd.f32 %v5122_v42, %v2526_v33  ;;  %v5146_v0 = vadd.f32 %v5122_v42, %v2542_v8  ;;  %v2531_v37 = vadd.f32 %v3225_v35, %v2349_v51  ;;  %v2547_v60 = vadd.f32 %v3241_v29, %v2461_v46 }
 0x330   : > { %v2186_v55 = vpop.f32.mrf.mxu0  ;;  %v2250_v41 = vpop.f32.mrf.mxu1 }
 0x331   : > { %v5149_v1 = vadd.f32 %v5122_v42, %v2531_v37  ;;  %v5152_v50 = vadd.f32 %v5122_v42, %v2547_v60  ;;  %v2529_v5 = vadd.f32 %v2335_v20, %v2186_v55  ;;  %v2545_v19 = vadd.f32 %v2447_v25, %v2250_v41 }
 0x332   : > { %v3226_v34 = vpop.f32.mrf.mxu0  ;;  %v3242_v9 = vpop.f32.mrf.mxu1 }
 0x333   : > { %v2532_v2 = vadd.f32 %v3226_v34, %v2356_v6  ;;  %v2548_v52 = vadd.f32 %v3242_v9, %v2468_v10  ;;  %v5155_v31 = vadd.f32 %v5122_v42, %v2529_v5  ;;  %v5158_v51 = vadd.f32 %v5122_v42, %v2545_v19 }
 0x334   : > { %v2189_v44 = vpop.f32.mrf.mxu0  ;;  %v2253_v27 = vpop.f32.mrf.mxu1 }
 0x335   : > { %v5161_v36 = vadd.f32 %v5122_v42, %v2532_v2  ;;  %v5164_v3 = vadd.f32 %v5122_v42, %v2548_v52  ;;  %v2530_v20 = vadd.f32 %v2342_v57, %v2189_v44  ;;  %v2546_v25 = vadd.f32 %v2454_v7, %v2253_v27 }
 0x336   : > { %v3229_v18 = vpop.f32.mrf.mxu0  ;;  %v3245_v61 = vpop.f32.mrf.mxu1 }
 0x337   : > { %v5167_v6 = vadd.f32 %v5122_v42, %v2530_v20  ;;  %v5170_v45 = vadd.f32 %v5122_v42, %v2546_v25  ;;  %v2535_v48 = vadd.f32 %v3229_v18, %v5089_v53  ;;  %v2551_v63 = vadd.f32 %v3245_v61, %v5107_v26 }
 0x338   : > { %v2202_v39 = vpop.f32.mrf.mxu0  ;;  %v2266_v46 = vpop.f32.mrf.mxu1 }
 0x339   : > { %v2533_v28 = vadd.f32 %v5087_v43, %v2202_v39  ;;  %v2574_v22 = vadd.f32 %v5122_v42, %v2535_v48  ;;  %v2590_v57 = vadd.f32 %v5122_v42, %v2551_v63  ;;  %v2549_v29 = vadd.f32 %v5103_v13, %v2266_v46 }
 0x33a   : > { %v3230_v7 = vpop.f32.mrf.mxu0  ;;  %v3246_v58 = vpop.f32.mrf.mxu1 }
 0x33b   : > { %v2536_v54 = vadd.f32 %v3230_v7, %v5093_v11  ;;  %v2552_v33 = vadd.f32 %v3246_v58, %v5109_v4  ;;  %vm2606_vm10 = vcmp.ge.f32.partialorder %v2574_v22, 0.0  ;;  %v2638_v53 = vmul.f32 0.2, %v2574_v22 }
 0x33c   : > { %v2205_v8 = vpop.f32.mrf.mxu0  ;;  %v2269_v35 = vpop.f32.mrf.mxu1  ;;  %v2572_v26 = vadd.f32 %v5122_v42, %v2533_v28  ;;  %v2654_v37 = vmul.f32 0.2, %v2590_v57  ;;  %vm2622_vm11 = vcmp.ge.f32.partialorder %v2590_v57, 0.0  ;;  %v2588_v13 = vadd.f32 %v5122_v42, %v2549_v29 }
 0x33d   : > { %v2575_v43 = vadd.f32 %v5122_v42, %v2536_v54  ;;  %v2591_v60 = vadd.f32 %v5122_v42, %v2552_v33  ;;  %v2534_v10 = vadd.f32 %v5091_v17, %v2205_v8  ;;  %v2670_v41 = vsel %vm2606_vm10, %v2574_v22, %v2638_v53 }
 0x33e   : > { %v3249_v55 = vpop.f32.mrf.mxu1  ;;  %v3233_v11 = vpop.f32.mrf.mxu0  ;;  %2720 = vrot.lane.b32.xlu0 %v2670_v41, %s3751_s17  ;;  %v2550_v4 = vadd.f32 %v5105_v62, %v2269_v35  ;;  %v2686_v9 = vsel %vm2622_vm11, %v2590_v57, %v2654_v37  ;;  %v2636_v2 = vmul.f32 0.2, %v2572_v26  ;;  %vm2604_vm13 = vcmp.ge.f32.partialorder %v2572_v26, 0.0 }
 0x33f   : > { %vm2607_vm12 = vcmp.ge.f32.partialorder %v2575_v43, 0.0  ;;  %v2639_v19 = vmul.f32 0.2, %v2575_v43  ;;  %v2539_v34 = vadd.f32 %v3233_v11, %v5099_v30  ;;  %v2573_v17 = vadd.f32 %v5122_v42, %v2534_v10 }
 0x340   : > { %v2218_v5 = vpop.f32.mrf.mxu0  ;;  %v2282_v52 = vpop.f32.mrf.mxu1  ;;  %v2655_v20 = vmul.f32 0.2, %v2591_v60  ;;  %vm2623_vm14 = vcmp.ge.f32.partialorder %v2591_v60, 0.0  ;;  %v2589_v62 = vadd.f32 %v5122_v42, %v2550_v4  ;;  %v2668_v18 = vsel %vm2604_vm13, %v2572_v26, %v2636_v2 }
 0x341   : > { %v2671_v44 = vsel %vm2607_vm12, %v2575_v43, %v2639_v19  ;;  %v2578_v25 = vadd.f32 %v5122_v42, %v2539_v34  ;;  %v2537_v30 = vadd.f32 %v5095_v16, %v2218_v5  ;;  %v2652_v61 = vmul.f32 0.2, %v2588_v13 }
 0x342   : > { %v3234_v27 = vpop.f32.mrf.mxu0  ;;  %2793 = vrot.lane.b32.xlu0 %v2686_v9, %s3751_s17  ;;  %2722 = vrot.lane.b32.xlu1 %v2671_v44, %s3751_s17  ;;  %v3250_v48 = vpop.f32.mrf.mxu1  ;;  %v2687_v46 = vsel %vm2623_vm14, %v2591_v60, %v2655_v20  ;;  %vm2620_vm15 = vcmp.ge.f32.partialorder %v2588_v13, 0.0  ;;  %v2637_v28 = vmul.f32 0.2, %v2573_v17  ;;  %vm2605_vm0 = vcmp.ge.f32.partialorder %v2573_v17, 0.0 }
 0x343   : > { %v2540_v63 = vadd.f32 %v3234_v27, %v5101_v24  ;;  %v2576_v22 = vadd.f32 %v5122_v42, %v2537_v30  ;;  %v2553_v57 = vadd.f32 %v5111_v56, %v2282_v52  ;;  %v2684_v7 = vsel %vm2620_vm15, %v2588_v13, %v2652_v61  ;;  %v3175_v27 = vld [vmem:[%s4042_s6 + $0x18] sm:$0xff]  }
 0x344   : > { %v2221_v39 = vpop.f32.mrf.mxu0  ;;  %v2285_v54 = vpop.f32.mrf.mxu1  ;;  %v2669_v24 = vsel %vm2605_vm0, %v2573_v17, %v2637_v28  ;;  %v2653_v33 = vmul.f32 0.2, %v2589_v62  ;;  %v2642_v8 = vmul.f32 0.2, %v2578_v25  ;;  %vm2621_vm2 = vcmp.ge.f32.partialorder %v2589_v62, 0.0  ;;  %v3174_v17 = vld [vmem:[%s4042_s6 + $0x10] sm:$0xff]  }
 0x345   : > { %v2538_v16 = vadd.f32 %v5097_v12, %v2221_v39  ;;  %v2579_v58 = vadd.f32 %v5122_v42, %v2540_v63  ;;  %vm2610_vm3 = vcmp.ge.f32.partialorder %v2578_v25, 0.0  ;;  %v2555_v35 = vadd.f32 %v3249_v55, %v5115_v40 }
 0x346   : > { %2716 = vrot.lane.b32.xlu0 %v2668_v18, %s3751_s17  ;;  %2795 = vrot.lane.b32.xlu1 %v2687_v46, %s3751_s17  ;;  %v2592_v53 = vadd.f32 %v5122_v42, %v2553_v57  ;;  %v2554_v12 = vadd.f32 %v5113_v21, %v2285_v54  ;;  %v2685_v26 = vsel %vm2621_vm2, %v2589_v62, %v2653_v33  ;;  %v2640_v43 = vmul.f32 0.2, %v2576_v22  ;;  %v3142_v46 = vld [vmem:[%s4042_s6] sm:$0xff]  }
 0x347   : > { %v2577_v56 = vadd.f32 %v5122_v42, %v2538_v16  ;;  %v2674_v29 = vsel %vm2610_vm3, %v2578_v25, %v2642_v8  ;;  %v2643_v37 = vmul.f32 0.2, %v2579_v58  ;;  %vm2608_vm4 = vcmp.ge.f32.partialorder %v2576_v22, 0.0 }
 0x348   : > { %vm2611_vm5 = vcmp.ge.f32.partialorder %v2579_v58, 0.0  ;;  %v2594_v60 = vadd.f32 %v5122_v42, %v2555_v35  ;;  %v2556_v40 = vadd.f32 %v3250_v48, %v5117_v47  ;;  %v2593_v10 = vadd.f32 %v5122_v42, %v2554_v12 }
 0x349   : > { %v2672_v55 = vsel %vm2608_vm4, %v2576_v22, %v2640_v43  ;;  %v2675_v41 = vsel %vm2611_vm5, %v2579_v58, %v2643_v37  ;;  %v2656_v11 = vmul.f32 0.2, %v2592_v53  ;;  %v2641_v21 = vmul.f32 0.2, %v2577_v56 }
 0x34a   : > { %2789 = vrot.lane.b32.xlu0 %v2684_v7, %s3751_s17  ;;  %2718 = vrot.lane.b32.xlu1 %v2669_v24, %s3751_s17  ;;  %vm2624_vm6 = vcmp.ge.f32.partialorder %v2592_v53, 0.0  ;;  %vm2609_vm7 = vcmp.ge.f32.partialorder %v2577_v56, 0.0  ;;  %v2595_v4 = vadd.f32 %v5122_v42, %v2556_v40  ;;  %v2658_v13 = vmul.f32 0.2, %v2594_v60 }
 0x34b   : > { %v2688_v5 = vsel %vm2624_vm6, %v2592_v53, %v2656_v11  ;;  %v2673_v19 = vsel %vm2609_vm7, %v2577_v56, %v2641_v21  ;;  %v2657_v34 = vmul.f32 0.2, %v2593_v10  ;;  %vm2626_vm8 = vcmp.ge.f32.partialorder %v2594_v60, 0.0  ;;  %v3173_v53 = vld [vmem:[%s4042_s6 + $0x8] sm:$0xff]   ;;  %v5261_v21 = vld [vmem:[%s4042_s6 + $0x30] sm:$0xff]  }
 0x34c   : > { %vm2625_vm9 = vcmp.ge.f32.partialorder %v2593_v10, 0.0  ;;  %v2690_v47 = vsel %vm2626_vm8, %v2594_v60, %v2658_v13  ;;  %v2659_v2 = vmul.f32 0.2, %v2595_v4  ;;  %vm2627_vm10 = vcmp.ge.f32.partialorder %v2595_v4, 0.0 }
 0x34d   : > { %v2689_v9 = vsel %vm2625_vm9, %v2593_v10, %v2657_v34  ;;  %v2630_v52 = vmul.f32 0.2, %v5125_v49  ;;  %vm2598_vm11 = vcmp.ge.f32.partialorder %v5125_v49, 0.0  ;;  %v3151_v44 = vunpack.c.l.bf16 %v3174_v17 }
 0x34e   : > { %2791 = vrot.lane.b32.xlu1 %v2685_v26, %s3751_s17  ;;  %2728 = vrot.lane.b32.xlu0 %v2674_v29, %s3751_s17  ;;  %v2691_v42 = vsel %vm2627_vm10, %v2595_v4, %v2659_v2  ;;  %v2646_v20 = vmul.f32 0.2, %v5128_v15  ;;  %v2631_v62 = vmul.f32 0.2, %v5137_v32  ;;  %vm2614_vm12 = vcmp.ge.f32.partialorder %v5128_v15, 0.0 }
 0x34f   : > { %v2662_v25 = vsel %vm2598_vm11, %v5125_v49, %v2630_v52  ;;  %vm2599_vm13 = vcmp.ge.f32.partialorder %v5137_v32, 0.0  ;;  %v3152_v48 = vunpack.c.h.bf16 %v3174_v17  ;;  %v3155_v63 = vunpack.c.l.bf16 %v3175_v27 }
 0x350   : > { %v2628_v39 = vmul.f32 0.2, %v5131_v59  ;;  %vm2772_vm14 = vcmask 257024   ;;  %v2647_v28 = vmul.f32 0.2, %v5140_v38  ;;  %v2678_v49 = vsel %vm2614_vm12, %v5128_v15, %v2646_v20  ;;  %v5278_v20 = vld [vmem:[%s4042_s6 + $0x38] sm:$0xff]  }
 0x351   : > { %v2663_v16 = vsel %vm2599_vm13, %v5137_v32, %v2631_v62  ;;  %vm2596_vm15 = vcmp.ge.f32.partialorder %v5131_v59, 0.0  ;;  %vm2615_vm0 = vcmp.ge.f32.partialorder %v5140_v38, 0.0  ;;  %v3143_v33 = vunpack.c.l.bf16 %v3142_v46 }
 0x352   : > { %2724 = vrot.lane.b32.xlu0 %v2672_v55, %s3751_s17  ;;  %2730 = vrot.lane.b32.xlu1 %v2675_v41, %s3751_s17  ;;  %v3156_v32 = vunpack.c.h.bf16 %v3175_v27  ;;  %v2644_v8 = vmul.f32 0.2, %v5134_v14  ;;  %v2629_v35 = vmul.f32 0.2, %v5143_v23  ;;  %v2660_v26 = vsel %vm2596_vm15, %v5131_v59, %v2628_v39  ;;  %v3176_v27 = vld [vmem:[%s4042_s6 + $0x20] sm:$0xff]  }
 0x353   : > { %v2679_v43 = vsel %vm2615_vm0, %v5140_v38, %v2647_v28  ;;  %vm2612_vm2 = vcmp.ge.f32.partialorder %v5134_v14, 0.0  ;;  %vm2597_vm3 = vcmp.ge.f32.partialorder %v5143_v23, 0.0  ;;  %v3144_v59 = vunpack.c.h.bf16 %v3142_v46 }
 0x354   : > { %v3147_v41 = vunpack.c.l.bf16 %v3173_v53  ;;  %v2645_v38 = vmul.f32 0.2, %v5146_v0  ;;  %v2634_v11 = vmul.f32 0.2, %v5149_v1  ;;  %v2661_v34 = vsel %vm2597_vm3, %v5143_v23, %v2629_v35 }
 0x355   : > { %vm2613_vm4 = vcmp.ge.f32.partialorder %v5146_v0, 0.0  ;;  %vm2602_vm5 = vcmp.ge.f32.partialorder %v5149_v1, 0.0  ;;  %v3148_v17 = vunpack.c.h.bf16 %v3173_v53  ;;  %v3167_v52 = vunpack.c.l.bf16 %v5261_v21 }
 0x356   : > { %2797 = vrot.lane.b32.xlu0 %v2688_v5, %s3751_s17  ;;  %2726 = vrot.lane.b32.xlu1 %v2673_v19, %s3751_s17  ;;  %v2676_v19 = vsel %vm2612_vm2, %v5134_v14, %v2644_v8  ;;  %v2632_v23 = vmul.f32 0.2, %v5155_v31  ;;  %vm2600_vm6 = vcmp.ge.f32.partialorder %v5155_v31, 0.0  ;;  %vm2603_vm7 = vcmp.ge.f32.partialorder %v5161_v36, 0.0 }
 0x357   : > { %vm2616_vm8 = vcmp.ge.f32.partialorder %v5158_v51, 0.0  ;;  %vm2601_vm9 = vcmp.ge.f32.partialorder %v5167_v6, 0.0  ;;  %vm2618_vm10 = vcmp.ge.f32.partialorder %v5152_v50, 0.0  ;;  %vm2617_vm11 = vcmp.ge.f32.partialorder %v5170_v45, 0.0 }
 0x358   : > { %vm2619_vm12 = vcmp.ge.f32.partialorder %v5164_v3, 0.0 }
 0x35a   : > { %2801 = vrot.lane.b32.xlu0 %v2690_v47, %s3751_s17  ;;  %2799 = vrot.lane.b32.xlu1 %v2689_v9, %s3751_s17 }
 0x35e   : > { %2803 = vrot.lane.b32.xlu1 %v2691_v42, %s3751_s17 }
 0x3b0   : > { %v2721_v30 = vpop.permute.xlu0 %2720 }
 0x3b1   : > { %v2742_v18 = vsel %vm628_vm1, %v2662_v25, %v2721_v30  ;;  %v2677_v30 = vsel %vm2613_vm4, %v5146_v0, %v2645_v38  ;;  %v3159_v0 = vunpack.c.l.bf16 %v3176_v27 }
 0x3b2   : > { %v2758_v61 = vadd.f32 %v3151_v44, %v2742_v18  ;;  %v2635_v44 = vmul.f32 0.2, %v5161_v36 }
 0x3b4   : > { %v2766_v22 = vpack.c.bf16 %v2758_v61, %v2758_v61  ;;  %v2794_v57 = vpop.permute.xlu0 %2793  ;;  %v2723_v7 = vpop.permute.xlu1 %2722  ;;  %v2666_v61 = vsel %vm2602_vm5, %v5149_v1, %v2634_v11  ;;  %v3171_v1 = vunpack.c.l.bf16 %v5278_v20 }
 0x3b5   : > { %v2815_v58 = vsel %vm628_vm1, %v2678_v49, %v2794_v57  ;;  %v2743_v54 = vsel %vm628_vm1, %v2663_v16, %v2723_v7  ;;  %v2633_v49 = vmul.f32 0.2, %v5167_v6  ;;  %v3177_v57 = vld [vmem:[%s4042_s6 + $0x28] sm:$0xff]   ;;  %s3752_s6 = smov [#allocation18]  }
 0x3b6   : > { %2775 = vst.msk [vmem:[%s5241_s10 + $0x10] sm:$0xf] %vm2772_vm14, %v2766_v22  ;;  %v2831_v15 = vadd.f32 %v3152_v48, %v2815_v58  ;;  %v2759_v24 = vadd.f32 %v3155_v63, %v2743_v54  ;;  %v2648_v22 = vmul.f32 0.2, %v5158_v51  ;;  %v2664_v58 = vsel %vm2600_vm6, %v5155_v31, %v2632_v23  ;;  %s3638_s19 = sshll.u32 %s3752_s6, 4  ;;  %s3639_s19 = int_to_ptr.vmem [resolvable:$false] %s3638_s19 }
 0x3b7   : > { %v3160_v31 = vunpack.c.h.bf16 %v3176_v27  ;;  %v3163_v53 = vunpack.c.l.bf16 %v3177_v57  ;;  %s3640_s20 = scalar_lea.vmem %s3639_s19, 2048  ;;  %p3641_p5 = scmp.lt.s32.totalorder %s5341_s12, %s3639_s19 }
 0x3b8   : > { %v2839_v56 = vpack.c.bf16 %v2831_v15, %v2831_v15  ;;  %v2767_v12 = vpack.c.bf16 %v2759_v24, %v2759_v24  ;;  %v2717_v29 = vpop.permute.xlu0 %2716  ;;  %v2796_v37 = vpop.permute.xlu1 %2795  ;;  %v2667_v15 = vsel %vm2603_vm7, %v5161_v36, %v2635_v44  ;;  %v2650_v36 = vmul.f32 0.2, %v5152_v50  ;;  %p3642_p1 = scmp.lt.s32.totalorder %s3640_s20, %s3634_s14 }
 0x3b9   : > { %v2740_v60 = vsel %vm628_vm1, %v2660_v26, %v2717_v29  ;;  %v2816_v40 = vsel %vm628_vm1, %v2679_v43, %v2796_v37  ;;  %v2680_v29 = vsel %vm2616_vm8, %v5158_v51, %v2648_v22  ;;  %v2665_v37 = vsel %vm2601_vm9, %v5167_v6, %v2633_v49 }
 0x3ba   : > { %3126 = vst.msk [vmem:[%s5241_s10 + $0x14] sm:$0xf] %vm2772_vm14, %v2839_v56  ;;  %2776 = vst.msk [vmem:[%s5241_s10 + $0x18] sm:$0xf] %vm2772_vm14, %v2767_v12  ;;  %v2756_v10 = vadd.f32 %v3143_v33, %v2740_v60  ;;  %v2832_v55 = vadd.f32 %v3156_v32, %v2816_v40  ;;  %v2649_v56 = vmul.f32 0.2, %v5170_v45  ;;  %v3164_v6 = vunpack.c.h.bf16 %v3177_v57  ;;  %p3643_p10 = por %p3642_p1, %p3641_p5 }
 0x3bc   : > { %v2764_v4 = vpack.c.bf16 %v2756_v10, %v2756_v10  ;;  %v2840_v5 = vpack.c.bf16 %v2832_v55, %v2832_v55  ;;  %v2790_v13 = vpop.permute.xlu0 %2789  ;;  %v2719_v47 = vpop.permute.xlu1 %2718  ;;  %p3644_p7 = pnand %p3643_p10, %p3637_p0 }
 0x3bd   : > { %v2813_v9 = vsel %vm628_vm1, %v2676_v19, %v2790_v13  ;;  %v2741_v2 = vsel %vm628_vm1, %v2661_v34, %v2719_v47  ;;  %v2681_v19 = vsel %vm2617_vm11, %v5170_v45, %v2649_v56 }
 0x3be   : > { %2773 = vst.msk [vmem:[%s5241_s10] sm:$0xf] %vm2772_vm14, %v2764_v4  ;;  %3127 = vst.msk [vmem:[%s5241_s10 + $0x1c] sm:$0xf] %vm2772_vm14, %v2840_v5  ;;  %v2829_v42 = vadd.f32 %v3144_v59, %v2813_v9  ;;  %v2757_v14 = vadd.f32 %v3147_v41, %v2741_v2  ;;  %v3168_v59 = vunpack.c.h.bf16 %v5261_v21  ;;  %v2651_v41 = vmul.f32 0.2, %v5164_v3 }
 0x3bf   : > { %v2682_v4 = vsel %vm2618_vm10, %v5152_v50, %v2650_v36  ;;  %v3172_v9 = vunpack.c.h.bf16 %v5278_v20 }
 0x3c0   : > { %v2837_v62 = vpack.c.bf16 %v2829_v42, %v2829_v42  ;;  %v2765_v25 = vpack.c.bf16 %v2757_v14, %v2757_v14  ;;  %v2792_v18 = vpop.permute.xlu1 %2791  ;;  %v2729_v48 = vpop.permute.xlu0 %2728  ;;  %v2683_v42 = vsel %vm2619_vm12, %v5164_v3, %v2651_v41 }
 0x3c1   : > { %v2814_v63 = vsel %vm628_vm1, %v2677_v30, %v2792_v18  ;;  %v2746_v39 = vsel %vm628_vm1, %v2666_v61, %v2729_v48 }
 0x3c2   : > { %3124 = vst.msk [vmem:[%s5241_s10 + $0x4] sm:$0xf] %vm2772_vm14, %v2837_v62  ;;  %2774 = vst.msk [vmem:[%s5241_s10 + $0x8] sm:$0xf] %vm2772_vm14, %v2765_v25  ;;  %v2830_v46 = vadd.f32 %v3148_v17, %v2814_v63  ;;  %v2762_v28 = vadd.f32 %v3167_v52, %v2746_v39 }
 0x3c4   : > { %v2838_v16 = vpack.c.bf16 %v2830_v46, %v2830_v46  ;;  %v2770_v7 = vpack.c.bf16 %v2762_v28, %v2762_v28  ;;  %v2725_v54 = vpop.permute.xlu0 %2724  ;;  %v2731_v24 = vpop.permute.xlu1 %2730 }
 0x3c5   : > { %v2744_v33 = vsel %vm628_vm1, %v2664_v58, %v2725_v54  ;;  %v2747_v32 = vsel %vm628_vm1, %v2667_v15, %v2731_v24 }
 0x3c6   : > { %3125 = vst.msk [vmem:[%s5241_s10 + $0xc] sm:$0xf] %vm2772_vm14, %v2838_v16  ;;  %2779 = vst.msk [vmem:[%s5241_s10 + $0x30] sm:$0xf] %vm2772_vm14, %v2770_v7  ;;  %v2760_v8 = vadd.f32 %v3159_v0, %v2744_v33  ;;  %v2763_v35 = vadd.f32 %v3171_v1, %v2747_v32 }
 0x3c8   : > { %v2768_v12 = vpack.c.bf16 %v2760_v8, %v2760_v8  ;;  %v2771_v26 = vpack.c.bf16 %v2763_v35, %v2763_v35  ;;  %v2798_v43 = vpop.permute.xlu0 %2797  ;;  %v2727_v60 = vpop.permute.xlu1 %2726 }
 0x3c9   : > { %v2817_v40 = vsel %vm628_vm1, %v2680_v29, %v2798_v43  ;;  %v2745_v10 = vsel %vm628_vm1, %v2665_v37, %v2727_v60 }
 0x3ca   : > { %2777 = vst.msk [vmem:[%s5241_s10 + $0x20] sm:$0xf] %vm2772_vm14, %v2768_v12  ;;  %2780 = vst.msk [vmem:[%s5241_s10 + $0x38] sm:$0xf] %vm2772_vm14, %v2771_v26  ;;  %v2833_v55 = vadd.f32 %v3160_v31, %v2817_v40  ;;  %v2761_v51 = vadd.f32 %v3163_v53, %v2745_v10 }
 0x3cc   : > { %v2841_v38 = vpack.c.bf16 %v2833_v55, %v2833_v55  ;;  %v2769_v11 = vpack.c.bf16 %v2761_v51, %v2761_v51  ;;  %v2802_v5 = vpop.permute.xlu0 %2801  ;;  %v2800_v13 = vpop.permute.xlu1 %2799 }
 0x3cd   : > { %v2819_v34 = vsel %vm628_vm1, %v2682_v4, %v2802_v5  ;;  %v2818_v47 = vsel %vm628_vm1, %v2681_v19, %v2800_v13 }
 0x3ce   : > { %3128 = vst.msk [vmem:[%s5241_s10 + $0x24] sm:$0xf] %vm2772_vm14, %v2841_v38  ;;  %2778 = vst.msk [vmem:[%s5241_s10 + $0x28] sm:$0xf] %vm2772_vm14, %v2769_v11  ;;  %v2835_v21 = vadd.f32 %v3168_v59, %v2819_v34  ;;  %v2834_v50 = vadd.f32 %v3164_v6, %v2818_v47 }
 0x3d0   : > { %v2843_v45 = vpack.c.bf16 %v2835_v21, %v2835_v21  ;;  %v2842_v2 = vpack.c.bf16 %v2834_v50, %v2834_v50  ;;  %v2804_v14 = vpop.permute.xlu1 %2803 }
 0x3d1   : > { %v2820_v17 = vsel %vm628_vm1, %v2683_v42, %v2804_v14 }
 0x3d2   : > { %3130 = vst.msk [vmem:[%s5241_s10 + $0x34] sm:$0xf] %vm2772_vm14, %v2843_v45  ;;  %3129 = vst.msk [vmem:[%s5241_s10 + $0x2c] sm:$0xf] %vm2772_vm14, %v2842_v2  ;;  %v2836_v52 = vadd.f32 %v3172_v9, %v2820_v17 }
 0x3d4   : > { %v2844_v3 = vpack.c.bf16 %v2836_v52, %v2836_v52 }
 0x3d6   : > { %3131 = vst.msk [vmem:[%s5241_s10 + $0x3c] sm:$0xf] %vm2772_vm14, %v2844_v3 }
 0x3d7   : > { %3647 = shalt.err (!%p3644_p7)
}
 0x3d8   : > { %s3648_s23 = scalar_lea.hbm %s5339_s5, 1024  ;;  %s3652_s1 = scalar_lea.hbm %s5544_s28, 2048 }
 0x3d9   : > { %p3649_p8 = scmp.ne.s32.totalorder %s5339_s5, %s3648_s23  ;;  %p3653_p13 = scmp.lt.s32.totalorder %s5339_s5, %s5544_s28 }
 0x3da   : > { %p3654_p3 = scmp.lt.s32.totalorder %s3652_s1, %s3648_s23 }
 0x3db   : > { %p3650_p4 = pnand %p3649_p8, %p5545_p9 }
 0x3dc   : > { %p3655_p11 = por %p3654_p3, %p3653_p13 }
 0x3dd   : > { %p3651_p12 = pneg %p3650_p4 }
 0x3df   : > { %p3656_p2 = pnand %p3655_p11, %p3651_p12 }
 0x3e1   : > { %3659 = shalt.err (!%p3656_p2)
}
 0x3e2   : > { %s3753_s16 = smov 64   ;;  %s3754_s17 = smov 4  }
 0x3e3   : > { %3281 = dma.vmem_to_hbm [thread:$0]  (%p5545_p9), %s5341_s12, 1024, %s5339_s5, %s2855_s11, %s3753_s16, %s3753_s16, %s3754_s17  }
 0x3e4 PF: > { %s5546_s10 = sld [smem:[#allocation26_spill]]  ;;  %p5549_p0 = scmp.ge.s32.totalorder %s3734_s22, 2 }
 0x3e5   : > { %s5547_s13 = sld [smem:[#allocation29_spill]] }
 0x3ea   : > { %s2886_s7 = sand.u32 1, %s5546_s10  }
 0x3eb   : > { %p5548_p6 = scmp.ne.s32.totalorder %s5547_s13, 0  ;;  %s2887_s26 = scalar_lea.sflag [#allocation5], %s2886_s7 }
 0x3ed   : > { %p3313_p5 = pnand %p5549_p0, %p5548_p6 }
 0x3ef   : > { %p3314_p1 = pneg %p3313_p5 }
 0x3f1   : > { %3709 = dma.done.wait (%p3314_p1), %s2887_s26, 1024  }
 0x3f2   : > { %3711 = vsyncadd (%p3314_p1), %s2887_s26, 4294966272  ;;  %s35_s22 = sadd.s32 1, %s3734_s22   ;;  %s5550_s27 = sld [smem:[#allocation27_spill]] }
 0x3f3   : > { %p32_p10 = scmp.ge.s32.totalorder %s35_s22, 4   ;;  %s5551_s19 = sld [smem:[#allocation32_spill]] }
 0x3f4   : > { %s5552_s29 = sld [smem:[#allocation31_spill]]  ;;  %s5553_s17 = smov %s3718_s18 }
 0x3f5   : > { %s5555_s20 = smov %s3730_s21 }
 0x3f6   :  { %34 = sbr.rel (!%p32_p10) target bundleno = 20 (0x14), region = 170 }
 0x3f8   : > { %s5554_s18 = smov %s5550_s27 }
 0x3fa   : > { %s5556_s21 = smov %s5552_s29 }
 0x3fb   :  { %2892 = vsyncpa [#allocation4], 1 }
 0x3fc   :  { %2894 = vsyncpa [#allocation4 + $0x1], 1 }
 0x3fd   :  { %2895 = vsyncpa [#allocation7], 1 }
 0x3fe   :  { %2897 = vsyncpa [#allocation7 + $0x1], 1 }
 0x3ff   :  { %2898 = vsyncpa [#allocation10], 1 }
 0x400   :  { %2900 = vsyncpa [#allocation10 + $0x1], 1 }
 0x401   :  { %2901 = vsyncpa [#allocation13], 1 }
 0x402   :  { %2902 = vsyncpa [#allocation16], 1 }
 0x403   :  { %2903 = vsyncpa [#allocation5], 1 }
 0x404   :  { %2905 = vsyncpa [#allocation5 + $0x1], 1 }

</bundles_post_ra>
